<compile_context>
chip_gen: v7x
topology: tpu7x:2x2x1
jax: 0.10.0
libtpu: 0.0.40
codegen_flags: <defaults>
</compile_context>

<pallas_src>
import jax
import jax.numpy as jnp
from jax.experimental import pallas as pl
from jax.experimental.pallas import tpu as pltpu

_LANES = 128   # vocab ids handled per inner chunk (one lane-dense w row)
_SB = 64       # batch rows (sublanes) handled per sub-block inside a tile


def _round_up(a, m):
    return ((a + m - 1) // m) * m


def _tree_or(cmps):
    """Pairwise (log-depth) OR of a list of boolean arrays."""
    while len(cmps) > 1:
        nxt = [jnp.logical_or(cmps[i], cmps[i + 1])
               for i in range(0, len(cmps) - 1, 2)]
        if len(cmps) % 2:
            nxt.append(cmps[-1])
        cmps = nxt
    return cmps[0]


def nb2_score_kernel(x_ref, y_ref, w_ref, b_ref, out_ref):
    # x_ref  : (TB, L)      int32  tokens; batch on sublanes, positions on lanes
    # y_ref  : (TB, 1)      int32  labels
    # w_ref  : (R, 128)     f32    lane-dense weights, vocab id = r*128 + lane
    # b_ref  : (1, 1)       f32    bias scalar                          (SMEM)
    # out_ref: (TB, 1)      int32  per-example "correct" flags
    TB, L = x_ref.shape
    R = w_ref.shape[0]
    bias = b_ref[0, 0]

    # Hoisted lane iota: vocab-lane offsets 0..127.
    lane_ids = jax.lax.broadcasted_iota(jnp.int32, (1, _LANES), 1)

    # Unroll factor for the vocab chunk loop: largest power of two (<=8)
    # dividing R, so the scan grouping is exact.
    unroll = 8
    while R % unroll:
        unroll //= 2

    for sb in range(TB // _SB):                     # static batch sub-block loop
        rows = pl.ds(sb * _SB, _SB)
        # Token columns for this sub-block, loaded once (hoisted out of the
        # vocab loop so the compares below don't re-read / re-slice them).
        x_cols = [x_ref[rows, l:l + 1] for l in range(L)]   # each (SB, 1) int32

        def chunk(r, acc):
            ids = lane_ids + r * _LANES                      # (1, 128) vocab ids
            # Binary presence of each of the 128 vocab ids in the sequence:
            # tree-OR of the L compares (duplicates count once).
            f = _tree_or([c == ids for c in x_cols])         # (SB, 128) bool
            wrow = w_ref[pl.ds(r, 1), :]                     # (1, 128) f32
            # Predicate select (no f32 one-hot, no MXU — see review item 10).
            return acc + jnp.where(f, wrow, 0.0)             # (SB, 128) f32

        acc = jax.lax.fori_loop(0, R, chunk,
                                jnp.zeros((_SB, _LANES), jnp.float32),
                                unroll=unroll)

        # Single lane (XLU) reduction per sub-block -> per-example score.
        score = jnp.sum(acc, axis=1, keepdims=True) + bias   # (SB, 1)
        # torch: predict = (sign(score) > 0).long()  <=>  score > 0
        predict = (score > 0.0).astype(jnp.int32)
        out_ref[rows, :] = (predict == y_ref[rows, :]).astype(jnp.int32)


def nb2_forward(x, y, w, b, *, tb=512):
    """Pallas equivalent of NB2.forward(x, y) -> scalar int (num correct)."""
    L, B = x.shape
    V = w.shape[0]

    # ---- vocab: pad to whole 128-lane rows; store w lane-dense (R, 128).
    R = _round_up(V, _LANES) // _LANES
    Vp = R * _LANES
    wp = jnp.pad(w.astype(jnp.float32), (0, Vp - V)).reshape(R, _LANES)

    # ---- batch tiling (sublane axis of the kernel views).
    Bp = _round_up(B, _SB)
    TB = max(_SB, (min(tb, Bp) // _SB) * _SB)
    if TB >= Bp and Bp >= 2 * _SB:
        # Keep >= 2 batch tiles so the "parallel" grid axis can shard across
        # the two TensorCores on v7x (harmless on single-TC v5e/v6e).
        TB = max(_SB, ((Bp // 2) // _SB) * _SB)
    Bp = _round_up(Bp, TB)
    grid = (Bp // TB,)

    xp = x.astype(jnp.int32).T                      # (B, L): batch on sublanes
    yp = y.astype(jnp.int32).reshape(B, 1)
    if Bp != B:
        xp = jnp.pad(xp, ((0, Bp - B), (0, 0)))     # pad with token 0 (discarded)
        yp = jnp.pad(yp, ((0, Bp - B), (0, 0)))
    b2 = jnp.asarray(b, jnp.float32).reshape(1, 1)

    # VMEM budget: double-buffered lane-padded x/y/out blocks + lane-dense w.
    need = 2 * 4 * (3 * TB * _LANES + Vp)
    vmem_limit = min(32 * 1024 * 1024, max(16 * 1024 * 1024, 2 * need))

    correct_flags = pl.pallas_call(
        nb2_score_kernel,
        out_shape=jax.ShapeDtypeStruct((Bp, 1), jnp.int32),
        grid_spec=pltpu.PrefetchScalarGridSpec(
            num_scalar_prefetch=0,
            grid=grid,
            in_specs=[
                pl.BlockSpec((TB, L), lambda bi: (bi, 0)),        # x tile
                pl.BlockSpec((TB, 1), lambda bi: (bi, 0)),        # y tile
                pl.BlockSpec((R, _LANES), lambda bi: (0, 0)),     # full w, DMA'd once
                pl.BlockSpec((1, 1), lambda bi: (0, 0),
                             memory_space=pltpu.MemorySpace.SMEM),  # bias scalar
            ],
            out_specs=pl.BlockSpec((TB, 1), lambda bi: (bi, 0)),
        ),
        compiler_params=pltpu.CompilerParams(
            dimension_semantics=("parallel",),
            vmem_limit_bytes=vmem_limit,
        ),
    )(xp, yp, wp, b2)

    # Tiny final reduction (and padded-batch slice) in plain JAX.
    return jnp.sum(correct_flags[:B, 0])


def nb2_forward_ref(x, y, w, b):
    """Pure-JAX reference matching the PyTorch module exactly."""
    V = w.shape[0]
    onehot = jax.nn.one_hot(x, V, dtype=jnp.float32)     # (L, B, V)
    f = jnp.max(onehot, axis=0).T                        # (V, B) binary BoW
    scores = jnp.matmul(w, f) + b                        # (B,)
    predict = (jnp.sign(scores) > 0).astype(jnp.int32)
    return jnp.sum((predict == y.astype(jnp.int32)).astype(jnp.int32))


if __name__ == "__main__":
    key = jax.random.PRNGKey(0)
    k1, k2, k3, k4 = jax.random.split(key, 4)

    # Small but grid-exercising shapes: vocab=1024 (8 lane-dense w rows),
    # batch=256 (2 batch tiles), seq length=8.
    V, L, B = 1024, 8, 256
    alpha = 1.0

    # Deterministic synthetic NB statistics (stand-in for update_counts()),
    # then the get_probs() formula to produce w and b.
    p = jax.random.uniform(k1, (V,), minval=0.0, maxval=5.0) + alpha
    q = jax.random.uniform(k2, (V,), minval=0.0, maxval=5.0) + alpha
    N = jnp.array([3.0, 5.0], jnp.float32)
    w = jnp.log((p / jnp.sum(jnp.abs(p))) / (q / jnp.sum(jnp.abs(q))))
    b = jnp.log(N[1] / N[0])

    x = jax.random.randint(k3, (L, B), 0, V, dtype=jnp.int32)
    y = jax.random.randint(k4, (B,), 0, 2, dtype=jnp.int32)

    out = nb2_forward(x, y, w, b)
    jax.block_until_ready(out)
    ref = nb2_forward_ref(x, y, w, b)
    assert int(out) == int(ref), (int(out), int(ref))

    # Ragged shapes (exercise the vocab/batch padding path).
    V2, L2, B2 = 300, 5, 100
    k5, k6, k7 = jax.random.split(k4, 3)
    w2 = jax.random.normal(k5, (V2,), dtype=jnp.float32)
    x2 = jax.random.randint(k6, (L2, B2), 0, V2, dtype=jnp.int32)
    y2 = jax.random.randint(k7, (B2,), 0, 2, dtype=jnp.int32)
    out2 = nb2_forward(x2, y2, w2, b)
    jax.block_until_ready(out2)
    ref2 = nb2_forward_ref(x2, y2, w2, b)
    assert int(out2) == int(ref2), (int(out2), int(ref2))

    print("KERNEL_OK")
</pallas_src>

<mosaic_0001>
module attributes {stable_mosaic.version = 11 : i64} {
  func.func @nb2_score_kernel(%arg0: i32, %arg1: memref<128x8xi32, #tpu.memory_space<vmem>>, %arg2: memref<128x1xi32, #tpu.memory_space<vmem>>, %arg3: memref<8x128xf32, #tpu.memory_space<vmem>>, %arg4: memref<1x1xf32, #tpu.memory_space<smem>>, %arg5: memref<128x1xi32, #tpu.memory_space<vmem>>) attributes {dimension_semantics = [#tpu.dimension_semantics<parallel>], iteration_bounds = array<i64: 2>, scalar_prefetch = 0 : i64, scratch_operands = 0 : i64, tpu.core_type = #tpu.core_type<tc>, window_params = [{transform_indices = @transform_0, window_bounds = array<i64: 128, 8>}, {transform_indices = @transform_1, window_bounds = array<i64: 128, 1>}, {pipeline_mode = #tpu.pipeline_mode<synchronous>, transform_indices = @transform_2, window_bounds = array<i64: 8, 128>}, {transform_indices = @transform_3, window_bounds = array<i64: 1, 1>}, {transform_indices = @transform_4, window_bounds = array<i64: 128, 1>}]} {
    %c0 = arith.constant 0 : index
    %c0_0 = arith.constant 0 : index
    %0 = memref.load %arg4[%c0, %c0_0] : memref<1x1xf32, #tpu.memory_space<smem>>
    %1 = tpu.iota {dimensions = array<i32: 1>} : vector<1x128xi32>
    %c0_1 = arith.constant 0 : index
    %c0_2 = arith.constant 0 : index
    %2 = vector.load %arg1[%c0_1, %c0_2] : memref<128x8xi32, #tpu.memory_space<vmem>>, vector<64x1xi32>
    %c0_3 = arith.constant 0 : index
    %c1 = arith.constant 1 : index
    %3 = vector.load %arg1[%c0_3, %c1] : memref<128x8xi32, #tpu.memory_space<vmem>>, vector<64x1xi32>
    %c0_4 = arith.constant 0 : index
    %c2 = arith.constant 2 : index
    %4 = vector.load %arg1[%c0_4, %c2] : memref<128x8xi32, #tpu.memory_space<vmem>>, vector<64x1xi32>
    %c0_5 = arith.constant 0 : index
    %c3 = arith.constant 3 : index
    %5 = vector.load %arg1[%c0_5, %c3] : memref<128x8xi32, #tpu.memory_space<vmem>>, vector<64x1xi32>
    %c0_6 = arith.constant 0 : index
    %c4 = arith.constant 4 : index
    %6 = vector.load %arg1[%c0_6, %c4] : memref<128x8xi32, #tpu.memory_space<vmem>>, vector<64x1xi32>
    %c0_7 = arith.constant 0 : index
    %c5 = arith.constant 5 : index
    %7 = vector.load %arg1[%c0_7, %c5] : memref<128x8xi32, #tpu.memory_space<vmem>>, vector<64x1xi32>
    %c0_8 = arith.constant 0 : index
    %c6 = arith.constant 6 : index
    %8 = vector.load %arg1[%c0_8, %c6] : memref<128x8xi32, #tpu.memory_space<vmem>>, vector<64x1xi32>
    %c0_9 = arith.constant 0 : index
    %c7 = arith.constant 7 : index
    %9 = vector.load %arg1[%c0_9, %c7] : memref<128x8xi32, #tpu.memory_space<vmem>>, vector<64x1xi32>
    %cst = arith.constant 0.000000e+00 : f32
    %10 = vector.broadcast %cst : f32 to vector<64x128xf32>
    %c0_i32 = arith.constant 0 : i32
    %c128_i32 = arith.constant 128 : i32
    %11 = arith.muli %c0_i32, %c128_i32 : i32
    %12 = vector.broadcast %11 : i32 to vector<1x128xi32>
    %13 = arith.addi %1, %12 : vector<1x128xi32>
    %14 = vector.broadcast %2 : vector<64x1xi32> to vector<64x128xi32>
    %15 = vector.broadcast %13 : vector<1x128xi32> to vector<64x128xi32>
    %16 = arith.cmpi eq, %14, %15 : vector<64x128xi32>
    %17 = vector.broadcast %3 : vector<64x1xi32> to vector<64x128xi32>
    %18 = vector.broadcast %13 : vector<1x128xi32> to vector<64x128xi32>
    %19 = arith.cmpi eq, %17, %18 : vector<64x128xi32>
    %20 = vector.broadcast %4 : vector<64x1xi32> to vector<64x128xi32>
    %21 = vector.broadcast %13 : vector<1x128xi32> to vector<64x128xi32>
    %22 = arith.cmpi eq, %20, %21 : vector<64x128xi32>
    %23 = vector.broadcast %5 : vector<64x1xi32> to vector<64x128xi32>
    %24 = vector.broadcast %13 : vector<1x128xi32> to vector<64x128xi32>
    %25 = arith.cmpi eq, %23, %24 : vector<64x128xi32>
    %26 = vector.broadcast %6 : vector<64x1xi32> to vector<64x128xi32>
    %27 = vector.broadcast %13 : vector<1x128xi32> to vector<64x128xi32>
    %28 = arith.cmpi eq, %26, %27 : vector<64x128xi32>
    %29 = vector.broadcast %7 : vector<64x1xi32> to vector<64x128xi32>
    %30 = vector.broadcast %13 : vector<1x128xi32> to vector<64x128xi32>
    %31 = arith.cmpi eq, %29, %30 : vector<64x128xi32>
    %32 = vector.broadcast %8 : vector<64x1xi32> to vector<64x128xi32>
    %33 = vector.broadcast %13 : vector<1x128xi32> to vector<64x128xi32>
    %34 = arith.cmpi eq, %32, %33 : vector<64x128xi32>
    %35 = vector.broadcast %9 : vector<64x1xi32> to vector<64x128xi32>
    %36 = vector.broadcast %13 : vector<1x128xi32> to vector<64x128xi32>
    %37 = arith.cmpi eq, %35, %36 : vector<64x128xi32>
    %38 = arith.ori %16, %19 : vector<64x128xi1>
    %39 = arith.ori %22, %25 : vector<64x128xi1>
    %40 = arith.ori %28, %31 : vector<64x128xi1>
    %41 = arith.ori %34, %37 : vector<64x128xi1>
    %42 = arith.ori %38, %39 : vector<64x128xi1>
    %43 = arith.ori %40, %41 : vector<64x128xi1>
    %44 = arith.ori %42, %43 : vector<64x128xi1>
    %45 = arith.index_cast %c0_i32 : i32 to index
    %c0_10 = arith.constant 0 : index
    %46 = vector.load %arg3[%45, %c0_10] : memref<8x128xf32, #tpu.memory_space<vmem>>, vector<1x128xf32>
    %cst_11 = arith.constant 0.000000e+00 : f32
    %47 = vector.shape_cast %46 : vector<1x128xf32> to vector<1x128xf32>
    %48 = vector.broadcast %47 : vector<1x128xf32> to vector<64x128xf32>
    %49 = vector.broadcast %cst_11 : f32 to vector<64x128xf32>
    %50 = arith.select %44, %48, %49 : vector<64x128xi1>, vector<64x128xf32>
    %51 = arith.addf %10, %50 : vector<64x128xf32>
    %c1_i32 = arith.constant 1 : i32
    %c128_i32_12 = arith.constant 128 : i32
    %52 = arith.muli %c1_i32, %c128_i32_12 : i32
    %53 = vector.broadcast %52 : i32 to vector<1x128xi32>
    %54 = arith.addi %1, %53 : vector<1x128xi32>
    %55 = vector.broadcast %2 : vector<64x1xi32> to vector<64x128xi32>
    %56 = vector.broadcast %54 : vector<1x128xi32> to vector<64x128xi32>
    %57 = arith.cmpi eq, %55, %56 : vector<64x128xi32>
    %58 = vector.broadcast %3 : vector<64x1xi32> to vector<64x128xi32>
    %59 = vector.broadcast %54 : vector<1x128xi32> to vector<64x128xi32>
    %60 = arith.cmpi eq, %58, %59 : vector<64x128xi32>
    %61 = vector.broadcast %4 : vector<64x1xi32> to vector<64x128xi32>
    %62 = vector.broadcast %54 : vector<1x128xi32> to vector<64x128xi32>
    %63 = arith.cmpi eq, %61, %62 : vector<64x128xi32>
    %64 = vector.broadcast %5 : vector<64x1xi32> to vector<64x128xi32>
    %65 = vector.broadcast %54 : vector<1x128xi32> to vector<64x128xi32>
    %66 = arith.cmpi eq, %64, %65 : vector<64x128xi32>
    %67 = vector.broadcast %6 : vector<64x1xi32> to vector<64x128xi32>
    %68 = vector.broadcast %54 : vector<1x128xi32> to vector<64x128xi32>
    %69 = arith.cmpi eq, %67, %68 : vector<64x128xi32>
    %70 = vector.broadcast %7 : vector<64x1xi32> to vector<64x128xi32>
    %71 = vector.broadcast %54 : vector<1x128xi32> to vector<64x128xi32>
    %72 = arith.cmpi eq, %70, %71 : vector<64x128xi32>
    %73 = vector.broadcast %8 : vector<64x1xi32> to vector<64x128xi32>
    %74 = vector.broadcast %54 : vector<1x128xi32> to vector<64x128xi32>
    %75 = arith.cmpi eq, %73, %74 : vector<64x128xi32>
    %76 = vector.broadcast %9 : vector<64x1xi32> to vector<64x128xi32>
    %77 = vector.broadcast %54 : vector<1x128xi32> to vector<64x128xi32>
    %78 = arith.cmpi eq, %76, %77 : vector<64x128xi32>
    %79 = arith.ori %57, %60 : vector<64x128xi1>
    %80 = arith.ori %63, %66 : vector<64x128xi1>
    %81 = arith.ori %69, %72 : vector<64x128xi1>
    %82 = arith.ori %75, %78 : vector<64x128xi1>
    %83 = arith.ori %79, %80 : vector<64x128xi1>
    %84 = arith.ori %81, %82 : vector<64x128xi1>
    %85 = arith.ori %83, %84 : vector<64x128xi1>
    %86 = arith.index_cast %c1_i32 : i32 to index
    %c0_13 = arith.constant 0 : index
    %87 = vector.load %arg3[%86, %c0_13] : memref<8x128xf32, #tpu.memory_space<vmem>>, vector<1x128xf32>
    %cst_14 = arith.constant 0.000000e+00 : f32
    %88 = vector.shape_cast %87 : vector<1x128xf32> to vector<1x128xf32>
    %89 = vector.broadcast %88 : vector<1x128xf32> to vector<64x128xf32>
    %90 = vector.broadcast %cst_14 : f32 to vector<64x128xf32>
    %91 = arith.select %85, %89, %90 : vector<64x128xi1>, vector<64x128xf32>
    %92 = arith.addf %51, %91 : vector<64x128xf32>
    %c2_i32 = arith.constant 2 : i32
    %c128_i32_15 = arith.constant 128 : i32
    %93 = arith.muli %c2_i32, %c128_i32_15 : i32
    %94 = vector.broadcast %93 : i32 to vector<1x128xi32>
    %95 = arith.addi %1, %94 : vector<1x128xi32>
    %96 = vector.broadcast %2 : vector<64x1xi32> to vector<64x128xi32>
    %97 = vector.broadcast %95 : vector<1x128xi32> to vector<64x128xi32>
    %98 = arith.cmpi eq, %96, %97 : vector<64x128xi32>
    %99 = vector.broadcast %3 : vector<64x1xi32> to vector<64x128xi32>
    %100 = vector.broadcast %95 : vector<1x128xi32> to vector<64x128xi32>
    %101 = arith.cmpi eq, %99, %100 : vector<64x128xi32>
    %102 = vector.broadcast %4 : vector<64x1xi32> to vector<64x128xi32>
    %103 = vector.broadcast %95 : vector<1x128xi32> to vector<64x128xi32>
    %104 = arith.cmpi eq, %102, %103 : vector<64x128xi32>
    %105 = vector.broadcast %5 : vector<64x1xi32> to vector<64x128xi32>
    %106 = vector.broadcast %95 : vector<1x128xi32> to vector<64x128xi32>
    %107 = arith.cmpi eq, %105, %106 : vector<64x128xi32>
    %108 = vector.broadcast %6 : vector<64x1xi32> to vector<64x128xi32>
    %109 = vector.broadcast %95 : vector<1x128xi32> to vector<64x128xi32>
    %110 = arith.cmpi eq, %108, %109 : vector<64x128xi32>
    %111 = vector.broadcast %7 : vector<64x1xi32> to vector<64x128xi32>
    %112 = vector.broadcast %95 : vector<1x128xi32> to vector<64x128xi32>
    %113 = arith.cmpi eq, %111, %112 : vector<64x128xi32>
    %114 = vector.broadcast %8 : vector<64x1xi32> to vector<64x128xi32>
    %115 = vector.broadcast %95 : vector<1x128xi32> to vector<64x128xi32>
    %116 = arith.cmpi eq, %114, %115 : vector<64x128xi32>
    %117 = vector.broadcast %9 : vector<64x1xi32> to vector<64x128xi32>
    %118 = vector.broadcast %95 : vector<1x128xi32> to vector<64x128xi32>
    %119 = arith.cmpi eq, %117, %118 : vector<64x128xi32>
    %120 = arith.ori %98, %101 : vector<64x128xi1>
    %121 = arith.ori %104, %107 : vector<64x128xi1>
    %122 = arith.ori %110, %113 : vector<64x128xi1>
    %123 = arith.ori %116, %119 : vector<64x128xi1>
    %124 = arith.ori %120, %121 : vector<64x128xi1>
    %125 = arith.ori %122, %123 : vector<64x128xi1>
    %126 = arith.ori %124, %125 : vector<64x128xi1>
    %127 = arith.index_cast %c2_i32 : i32 to index
    %c0_16 = arith.constant 0 : index
    %128 = vector.load %arg3[%127, %c0_16] : memref<8x128xf32, #tpu.memory_space<vmem>>, vector<1x128xf32>
    %cst_17 = arith.constant 0.000000e+00 : f32
    %129 = vector.shape_cast %128 : vector<1x128xf32> to vector<1x128xf32>
    %130 = vector.broadcast %129 : vector<1x128xf32> to vector<64x128xf32>
    %131 = vector.broadcast %cst_17 : f32 to vector<64x128xf32>
    %132 = arith.select %126, %130, %131 : vector<64x128xi1>, vector<64x128xf32>
    %133 = arith.addf %92, %132 : vector<64x128xf32>
    %c3_i32 = arith.constant 3 : i32
    %c128_i32_18 = arith.constant 128 : i32
    %134 = arith.muli %c3_i32, %c128_i32_18 : i32
    %135 = vector.broadcast %134 : i32 to vector<1x128xi32>
    %136 = arith.addi %1, %135 : vector<1x128xi32>
    %137 = vector.broadcast %2 : vector<64x1xi32> to vector<64x128xi32>
    %138 = vector.broadcast %136 : vector<1x128xi32> to vector<64x128xi32>
    %139 = arith.cmpi eq, %137, %138 : vector<64x128xi32>
    %140 = vector.broadcast %3 : vector<64x1xi32> to vector<64x128xi32>
    %141 = vector.broadcast %136 : vector<1x128xi32> to vector<64x128xi32>
    %142 = arith.cmpi eq, %140, %141 : vector<64x128xi32>
    %143 = vector.broadcast %4 : vector<64x1xi32> to vector<64x128xi32>
    %144 = vector.broadcast %136 : vector<1x128xi32> to vector<64x128xi32>
    %145 = arith.cmpi eq, %143, %144 : vector<64x128xi32>
    %146 = vector.broadcast %5 : vector<64x1xi32> to vector<64x128xi32>
    %147 = vector.broadcast %136 : vector<1x128xi32> to vector<64x128xi32>
    %148 = arith.cmpi eq, %146, %147 : vector<64x128xi32>
    %149 = vector.broadcast %6 : vector<64x1xi32> to vector<64x128xi32>
    %150 = vector.broadcast %136 : vector<1x128xi32> to vector<64x128xi32>
    %151 = arith.cmpi eq, %149, %150 : vector<64x128xi32>
    %152 = vector.broadcast %7 : vector<64x1xi32> to vector<64x128xi32>
    %153 = vector.broadcast %136 : vector<1x128xi32> to vector<64x128xi32>
    %154 = arith.cmpi eq, %152, %153 : vector<64x128xi32>
    %155 = vector.broadcast %8 : vector<64x1xi32> to vector<64x128xi32>
    %156 = vector.broadcast %136 : vector<1x128xi32> to vector<64x128xi32>
    %157 = arith.cmpi eq, %155, %156 : vector<64x128xi32>
    %158 = vector.broadcast %9 : vector<64x1xi32> to vector<64x128xi32>
    %159 = vector.broadcast %136 : vector<1x128xi32> to vector<64x128xi32>
    %160 = arith.cmpi eq, %158, %159 : vector<64x128xi32>
    %161 = arith.ori %139, %142 : vector<64x128xi1>
    %162 = arith.ori %145, %148 : vector<64x128xi1>
    %163 = arith.ori %151, %154 : vector<64x128xi1>
    %164 = arith.ori %157, %160 : vector<64x128xi1>
    %165 = arith.ori %161, %162 : vector<64x128xi1>
    %166 = arith.ori %163, %164 : vector<64x128xi1>
    %167 = arith.ori %165, %166 : vector<64x128xi1>
    %168 = arith.index_cast %c3_i32 : i32 to index
    %c0_19 = arith.constant 0 : index
    %169 = vector.load %arg3[%168, %c0_19] : memref<8x128xf32, #tpu.memory_space<vmem>>, vector<1x128xf32>
    %cst_20 = arith.constant 0.000000e+00 : f32
    %170 = vector.shape_cast %169 : vector<1x128xf32> to vector<1x128xf32>
    %171 = vector.broadcast %170 : vector<1x128xf32> to vector<64x128xf32>
    %172 = vector.broadcast %cst_20 : f32 to vector<64x128xf32>
    %173 = arith.select %167, %171, %172 : vector<64x128xi1>, vector<64x128xf32>
    %174 = arith.addf %133, %173 : vector<64x128xf32>
    %c4_i32 = arith.constant 4 : i32
    %c128_i32_21 = arith.constant 128 : i32
    %175 = arith.muli %c4_i32, %c128_i32_21 : i32
    %176 = vector.broadcast %175 : i32 to vector<1x128xi32>
    %177 = arith.addi %1, %176 : vector<1x128xi32>
    %178 = vector.broadcast %2 : vector<64x1xi32> to vector<64x128xi32>
    %179 = vector.broadcast %177 : vector<1x128xi32> to vector<64x128xi32>
    %180 = arith.cmpi eq, %178, %179 : vector<64x128xi32>
    %181 = vector.broadcast %3 : vector<64x1xi32> to vector<64x128xi32>
    %182 = vector.broadcast %177 : vector<1x128xi32> to vector<64x128xi32>
    %183 = arith.cmpi eq, %181, %182 : vector<64x128xi32>
    %184 = vector.broadcast %4 : vector<64x1xi32> to vector<64x128xi32>
    %185 = vector.broadcast %177 : vector<1x128xi32> to vector<64x128xi32>
    %186 = arith.cmpi eq, %184, %185 : vector<64x128xi32>
    %187 = vector.broadcast %5 : vector<64x1xi32> to vector<64x128xi32>
    %188 = vector.broadcast %177 : vector<1x128xi32> to vector<64x128xi32>
    %189 = arith.cmpi eq, %187, %188 : vector<64x128xi32>
    %190 = vector.broadcast %6 : vector<64x1xi32> to vector<64x128xi32>
    %191 = vector.broadcast %177 : vector<1x128xi32> to vector<64x128xi32>
    %192 = arith.cmpi eq, %190, %191 : vector<64x128xi32>
    %193 = vector.broadcast %7 : vector<64x1xi32> to vector<64x128xi32>
    %194 = vector.broadcast %177 : vector<1x128xi32> to vector<64x128xi32>
    %195 = arith.cmpi eq, %193, %194 : vector<64x128xi32>
    %196 = vector.broadcast %8 : vector<64x1xi32> to vector<64x128xi32>
    %197 = vector.broadcast %177 : vector<1x128xi32> to vector<64x128xi32>
    %198 = arith.cmpi eq, %196, %197 : vector<64x128xi32>
    %199 = vector.broadcast %9 : vector<64x1xi32> to vector<64x128xi32>
    %200 = vector.broadcast %177 : vector<1x128xi32> to vector<64x128xi32>
    %201 = arith.cmpi eq, %199, %200 : vector<64x128xi32>
    %202 = arith.ori %180, %183 : vector<64x128xi1>
    %203 = arith.ori %186, %189 : vector<64x128xi1>
    %204 = arith.ori %192, %195 : vector<64x128xi1>
    %205 = arith.ori %198, %201 : vector<64x128xi1>
    %206 = arith.ori %202, %203 : vector<64x128xi1>
    %207 = arith.ori %204, %205 : vector<64x128xi1>
    %208 = arith.ori %206, %207 : vector<64x128xi1>
    %209 = arith.index_cast %c4_i32 : i32 to index
    %c0_22 = arith.constant 0 : index
    %210 = vector.load %arg3[%209, %c0_22] : memref<8x128xf32, #tpu.memory_space<vmem>>, vector<1x128xf32>
    %cst_23 = arith.constant 0.000000e+00 : f32
    %211 = vector.shape_cast %210 : vector<1x128xf32> to vector<1x128xf32>
    %212 = vector.broadcast %211 : vector<1x128xf32> to vector<64x128xf32>
    %213 = vector.broadcast %cst_23 : f32 to vector<64x128xf32>
    %214 = arith.select %208, %212, %213 : vector<64x128xi1>, vector<64x128xf32>
    %215 = arith.addf %174, %214 : vector<64x128xf32>
    %c5_i32 = arith.constant 5 : i32
    %c128_i32_24 = arith.constant 128 : i32
    %216 = arith.muli %c5_i32, %c128_i32_24 : i32
    %217 = vector.broadcast %216 : i32 to vector<1x128xi32>
    %218 = arith.addi %1, %217 : vector<1x128xi32>
    %219 = vector.broadcast %2 : vector<64x1xi32> to vector<64x128xi32>
    %220 = vector.broadcast %218 : vector<1x128xi32> to vector<64x128xi32>
    %221 = arith.cmpi eq, %219, %220 : vector<64x128xi32>
    %222 = vector.broadcast %3 : vector<64x1xi32> to vector<64x128xi32>
    %223 = vector.broadcast %218 : vector<1x128xi32> to vector<64x128xi32>
    %224 = arith.cmpi eq, %222, %223 : vector<64x128xi32>
    %225 = vector.broadcast %4 : vector<64x1xi32> to vector<64x128xi32>
    %226 = vector.broadcast %218 : vector<1x128xi32> to vector<64x128xi32>
    %227 = arith.cmpi eq, %225, %226 : vector<64x128xi32>
    %228 = vector.broadcast %5 : vector<64x1xi32> to vector<64x128xi32>
    %229 = vector.broadcast %218 : vector<1x128xi32> to vector<64x128xi32>
    %230 = arith.cmpi eq, %228, %229 : vector<64x128xi32>
    %231 = vector.broadcast %6 : vector<64x1xi32> to vector<64x128xi32>
    %232 = vector.broadcast %218 : vector<1x128xi32> to vector<64x128xi32>
    %233 = arith.cmpi eq, %231, %232 : vector<64x128xi32>
    %234 = vector.broadcast %7 : vector<64x1xi32> to vector<64x128xi32>
    %235 = vector.broadcast %218 : vector<1x128xi32> to vector<64x128xi32>
    %236 = arith.cmpi eq, %234, %235 : vector<64x128xi32>
    %237 = vector.broadcast %8 : vector<64x1xi32> to vector<64x128xi32>
    %238 = vector.broadcast %218 : vector<1x128xi32> to vector<64x128xi32>
    %239 = arith.cmpi eq, %237, %238 : vector<64x128xi32>
    %240 = vector.broadcast %9 : vector<64x1xi32> to vector<64x128xi32>
    %241 = vector.broadcast %218 : vector<1x128xi32> to vector<64x128xi32>
    %242 = arith.cmpi eq, %240, %241 : vector<64x128xi32>
    %243 = arith.ori %221, %224 : vector<64x128xi1>
    %244 = arith.ori %227, %230 : vector<64x128xi1>
    %245 = arith.ori %233, %236 : vector<64x128xi1>
    %246 = arith.ori %239, %242 : vector<64x128xi1>
    %247 = arith.ori %243, %244 : vector<64x128xi1>
    %248 = arith.ori %245, %246 : vector<64x128xi1>
    %249 = arith.ori %247, %248 : vector<64x128xi1>
    %250 = arith.index_cast %c5_i32 : i32 to index
    %c0_25 = arith.constant 0 : index
    %251 = vector.load %arg3[%250, %c0_25] : memref<8x128xf32, #tpu.memory_space<vmem>>, vector<1x128xf32>
    %cst_26 = arith.constant 0.000000e+00 : f32
    %252 = vector.shape_cast %251 : vector<1x128xf32> to vector<1x128xf32>
    %253 = vector.broadcast %252 : vector<1x128xf32> to vector<64x128xf32>
    %254 = vector.broadcast %cst_26 : f32 to vector<64x128xf32>
    %255 = arith.select %249, %253, %254 : vector<64x128xi1>, vector<64x128xf32>
    %256 = arith.addf %215, %255 : vector<64x128xf32>
    %c6_i32 = arith.constant 6 : i32
    %c128_i32_27 = arith.constant 128 : i32
    %257 = arith.muli %c6_i32, %c128_i32_27 : i32
    %258 = vector.broadcast %257 : i32 to vector<1x128xi32>
    %259 = arith.addi %1, %258 : vector<1x128xi32>
    %260 = vector.broadcast %2 : vector<64x1xi32> to vector<64x128xi32>
    %261 = vector.broadcast %259 : vector<1x128xi32> to vector<64x128xi32>
    %262 = arith.cmpi eq, %260, %261 : vector<64x128xi32>
    %263 = vector.broadcast %3 : vector<64x1xi32> to vector<64x128xi32>
    %264 = vector.broadcast %259 : vector<1x128xi32> to vector<64x128xi32>
    %265 = arith.cmpi eq, %263, %264 : vector<64x128xi32>
    %266 = vector.broadcast %4 : vector<64x1xi32> to vector<64x128xi32>
    %267 = vector.broadcast %259 : vector<1x128xi32> to vector<64x128xi32>
    %268 = arith.cmpi eq, %266, %267 : vector<64x128xi32>
    %269 = vector.broadcast %5 : vector<64x1xi32> to vector<64x128xi32>
    %270 = vector.broadcast %259 : vector<1x128xi32> to vector<64x128xi32>
    %271 = arith.cmpi eq, %269, %270 : vector<64x128xi32>
    %272 = vector.broadcast %6 : vector<64x1xi32> to vector<64x128xi32>
    %273 = vector.broadcast %259 : vector<1x128xi32> to vector<64x128xi32>
    %274 = arith.cmpi eq, %272, %273 : vector<64x128xi32>
    %275 = vector.broadcast %7 : vector<64x1xi32> to vector<64x128xi32>
    %276 = vector.broadcast %259 : vector<1x128xi32> to vector<64x128xi32>
    %277 = arith.cmpi eq, %275, %276 : vector<64x128xi32>
    %278 = vector.broadcast %8 : vector<64x1xi32> to vector<64x128xi32>
    %279 = vector.broadcast %259 : vector<1x128xi32> to vector<64x128xi32>
    %280 = arith.cmpi eq, %278, %279 : vector<64x128xi32>
    %281 = vector.broadcast %9 : vector<64x1xi32> to vector<64x128xi32>
    %282 = vector.broadcast %259 : vector<1x128xi32> to vector<64x128xi32>
    %283 = arith.cmpi eq, %281, %282 : vector<64x128xi32>
    %284 = arith.ori %262, %265 : vector<64x128xi1>
    %285 = arith.ori %268, %271 : vector<64x128xi1>
    %286 = arith.ori %274, %277 : vector<64x128xi1>
    %287 = arith.ori %280, %283 : vector<64x128xi1>
    %288 = arith.ori %284, %285 : vector<64x128xi1>
    %289 = arith.ori %286, %287 : vector<64x128xi1>
    %290 = arith.ori %288, %289 : vector<64x128xi1>
    %291 = arith.index_cast %c6_i32 : i32 to index
    %c0_28 = arith.constant 0 : index
    %292 = vector.load %arg3[%291, %c0_28] : memref<8x128xf32, #tpu.memory_space<vmem>>, vector<1x128xf32>
    %cst_29 = arith.constant 0.000000e+00 : f32
    %293 = vector.shape_cast %292 : vector<1x128xf32> to vector<1x128xf32>
    %294 = vector.broadcast %293 : vector<1x128xf32> to vector<64x128xf32>
    %295 = vector.broadcast %cst_29 : f32 to vector<64x128xf32>
    %296 = arith.select %290, %294, %295 : vector<64x128xi1>, vector<64x128xf32>
    %297 = arith.addf %256, %296 : vector<64x128xf32>
    %c7_i32 = arith.constant 7 : i32
    %c128_i32_30 = arith.constant 128 : i32
    %298 = arith.muli %c7_i32, %c128_i32_30 : i32
    %299 = vector.broadcast %298 : i32 to vector<1x128xi32>
    %300 = arith.addi %1, %299 : vector<1x128xi32>
    %301 = vector.broadcast %2 : vector<64x1xi32> to vector<64x128xi32>
    %302 = vector.broadcast %300 : vector<1x128xi32> to vector<64x128xi32>
    %303 = arith.cmpi eq, %301, %302 : vector<64x128xi32>
    %304 = vector.broadcast %3 : vector<64x1xi32> to vector<64x128xi32>
    %305 = vector.broadcast %300 : vector<1x128xi32> to vector<64x128xi32>
    %306 = arith.cmpi eq, %304, %305 : vector<64x128xi32>
    %307 = vector.broadcast %4 : vector<64x1xi32> to vector<64x128xi32>
    %308 = vector.broadcast %300 : vector<1x128xi32> to vector<64x128xi32>
    %309 = arith.cmpi eq, %307, %308 : vector<64x128xi32>
    %310 = vector.broadcast %5 : vector<64x1xi32> to vector<64x128xi32>
    %311 = vector.broadcast %300 : vector<1x128xi32> to vector<64x128xi32>
    %312 = arith.cmpi eq, %310, %311 : vector<64x128xi32>
    %313 = vector.broadcast %6 : vector<64x1xi32> to vector<64x128xi32>
    %314 = vector.broadcast %300 : vector<1x128xi32> to vector<64x128xi32>
    %315 = arith.cmpi eq, %313, %314 : vector<64x128xi32>
    %316 = vector.broadcast %7 : vector<64x1xi32> to vector<64x128xi32>
    %317 = vector.broadcast %300 : vector<1x128xi32> to vector<64x128xi32>
    %318 = arith.cmpi eq, %316, %317 : vector<64x128xi32>
    %319 = vector.broadcast %8 : vector<64x1xi32> to vector<64x128xi32>
    %320 = vector.broadcast %300 : vector<1x128xi32> to vector<64x128xi32>
    %321 = arith.cmpi eq, %319, %320 : vector<64x128xi32>
    %322 = vector.broadcast %9 : vector<64x1xi32> to vector<64x128xi32>
    %323 = vector.broadcast %300 : vector<1x128xi32> to vector<64x128xi32>
    %324 = arith.cmpi eq, %322, %323 : vector<64x128xi32>
    %325 = arith.ori %303, %306 : vector<64x128xi1>
    %326 = arith.ori %309, %312 : vector<64x128xi1>
    %327 = arith.ori %315, %318 : vector<64x128xi1>
    %328 = arith.ori %321, %324 : vector<64x128xi1>
    %329 = arith.ori %325, %326 : vector<64x128xi1>
    %330 = arith.ori %327, %328 : vector<64x128xi1>
    %331 = arith.ori %329, %330 : vector<64x128xi1>
    %332 = arith.index_cast %c7_i32 : i32 to index
    %c0_31 = arith.constant 0 : index
    %333 = vector.load %arg3[%332, %c0_31] : memref<8x128xf32, #tpu.memory_space<vmem>>, vector<1x128xf32>
    %cst_32 = arith.constant 0.000000e+00 : f32
    %334 = vector.shape_cast %333 : vector<1x128xf32> to vector<1x128xf32>
    %335 = vector.broadcast %334 : vector<1x128xf32> to vector<64x128xf32>
    %336 = vector.broadcast %cst_32 : f32 to vector<64x128xf32>
    %337 = arith.select %331, %335, %336 : vector<64x128xi1>, vector<64x128xf32>
    %338 = arith.addf %297, %337 : vector<64x128xf32>
    %c8_i32 = arith.constant 8 : i32
    %cst_33 = arith.constant dense<0.000000e+00> : vector<64xf32>
    %339 = vector.multi_reduction <add>, %338, %cst_33 [1] : vector<64x128xf32> to vector<64xf32>
    %340 = vector.shape_cast %339 : vector<64xf32> to vector<64x1xf32>
    %341 = vector.broadcast %0 : f32 to vector<64x1xf32>
    %342 = arith.addf %340, %341 : vector<64x1xf32>
    %cst_34 = arith.constant 0.000000e+00 : f32
    %343 = vector.broadcast %cst_34 : f32 to vector<64x1xf32>
    %344 = arith.cmpf ogt, %342, %343 : vector<64x1xf32>
    %345 = arith.extui %344 : vector<64x1xi1> to vector<64x1xi32>
    %c0_35 = arith.constant 0 : index
    %c0_36 = arith.constant 0 : index
    %346 = vector.load %arg2[%c0_35, %c0_36] : memref<128x1xi32, #tpu.memory_space<vmem>>, vector<64x1xi32>
    %347 = arith.cmpi eq, %345, %346 : vector<64x1xi32>
    %348 = arith.extui %347 : vector<64x1xi1> to vector<64x1xi32>
    %c0_37 = arith.constant 0 : index
    %c0_38 = arith.constant 0 : index
    %349 = vector.load %arg5[%c0_37, %c0_38] : memref<128x1xi32, #tpu.memory_space<vmem>>, vector<64x1xi32>
    tpu.vector_store %arg5[%c0_37, %c0_38], %348 {strides = array<i32>} : memref<128x1xi32, #tpu.memory_space<vmem>>, vector<64x1xi32>,
    %c64 = arith.constant 64 : index
    %c0_39 = arith.constant 0 : index
    %350 = vector.load %arg1[%c64, %c0_39] : memref<128x8xi32, #tpu.memory_space<vmem>>, vector<64x1xi32>
    %c64_40 = arith.constant 64 : index
    %c1_41 = arith.constant 1 : index
    %351 = vector.load %arg1[%c64_40, %c1_41] : memref<128x8xi32, #tpu.memory_space<vmem>>, vector<64x1xi32>
    %c64_42 = arith.constant 64 : index
    %c2_43 = arith.constant 2 : index
    %352 = vector.load %arg1[%c64_42, %c2_43] : memref<128x8xi32, #tpu.memory_space<vmem>>, vector<64x1xi32>
    %c64_44 = arith.constant 64 : index
    %c3_45 = arith.constant 3 : index
    %353 = vector.load %arg1[%c64_44, %c3_45] : memref<128x8xi32, #tpu.memory_space<vmem>>, vector<64x1xi32>
    %c64_46 = arith.constant 64 : index
    %c4_47 = arith.constant 4 : index
    %354 = vector.load %arg1[%c64_46, %c4_47] : memref<128x8xi32, #tpu.memory_space<vmem>>, vector<64x1xi32>
    %c64_48 = arith.constant 64 : index
    %c5_49 = arith.constant 5 : index
    %355 = vector.load %arg1[%c64_48, %c5_49] : memref<128x8xi32, #tpu.memory_space<vmem>>, vector<64x1xi32>
    %c64_50 = arith.constant 64 : index
    %c6_51 = arith.constant 6 : index
    %356 = vector.load %arg1[%c64_50, %c6_51] : memref<128x8xi32, #tpu.memory_space<vmem>>, vector<64x1xi32>
    %c64_52 = arith.constant 64 : index
    %c7_53 = arith.constant 7 : index
    %357 = vector.load %arg1[%c64_52, %c7_53] : memref<128x8xi32, #tpu.memory_space<vmem>>, vector<64x1xi32>
    %cst_54 = arith.constant 0.000000e+00 : f32
    %358 = vector.broadcast %cst_54 : f32 to vector<64x128xf32>
    %c0_i32_55 = arith.constant 0 : i32
    %c128_i32_56 = arith.constant 128 : i32
    %359 = arith.muli %c0_i32_55, %c128_i32_56 : i32
    %360 = vector.broadcast %359 : i32 to vector<1x128xi32>
    %361 = arith.addi %1, %360 : vector<1x128xi32>
    %362 = vector.broadcast %350 : vector<64x1xi32> to vector<64x128xi32>
    %363 = vector.broadcast %361 : vector<1x128xi32> to vector<64x128xi32>
    %364 = arith.cmpi eq, %362, %363 : vector<64x128xi32>
    %365 = vector.broadcast %351 : vector<64x1xi32> to vector<64x128xi32>
    %366 = vector.broadcast %361 : vector<1x128xi32> to vector<64x128xi32>
    %367 = arith.cmpi eq, %365, %366 : vector<64x128xi32>
    %368 = vector.broadcast %352 : vector<64x1xi32> to vector<64x128xi32>
    %369 = vector.broadcast %361 : vector<1x128xi32> to vector<64x128xi32>
    %370 = arith.cmpi eq, %368, %369 : vector<64x128xi32>
    %371 = vector.broadcast %353 : vector<64x1xi32> to vector<64x128xi32>
    %372 = vector.broadcast %361 : vector<1x128xi32> to vector<64x128xi32>
    %373 = arith.cmpi eq, %371, %372 : vector<64x128xi32>
    %374 = vector.broadcast %354 : vector<64x1xi32> to vector<64x128xi32>
    %375 = vector.broadcast %361 : vector<1x128xi32> to vector<64x128xi32>
    %376 = arith.cmpi eq, %374, %375 : vector<64x128xi32>
    %377 = vector.broadcast %355 : vector<64x1xi32> to vector<64x128xi32>
    %378 = vector.broadcast %361 : vector<1x128xi32> to vector<64x128xi32>
    %379 = arith.cmpi eq, %377, %378 : vector<64x128xi32>
    %380 = vector.broadcast %356 : vector<64x1xi32> to vector<64x128xi32>
    %381 = vector.broadcast %361 : vector<1x128xi32> to vector<64x128xi32>
    %382 = arith.cmpi eq, %380, %381 : vector<64x128xi32>
    %383 = vector.broadcast %357 : vector<64x1xi32> to vector<64x128xi32>
    %384 = vector.broadcast %361 : vector<1x128xi32> to vector<64x128xi32>
    %385 = arith.cmpi eq, %383, %384 : vector<64x128xi32>
    %386 = arith.ori %364, %367 : vector<64x128xi1>
    %387 = arith.ori %370, %373 : vector<64x128xi1>
    %388 = arith.ori %376, %379 : vector<64x128xi1>
    %389 = arith.ori %382, %385 : vector<64x128xi1>
    %390 = arith.ori %386, %387 : vector<64x128xi1>
    %391 = arith.ori %388, %389 : vector<64x128xi1>
    %392 = arith.ori %390, %391 : vector<64x128xi1>
    %393 = arith.index_cast %c0_i32_55 : i32 to index
    %c0_57 = arith.constant 0 : index
    %394 = vector.load %arg3[%393, %c0_57] : memref<8x128xf32, #tpu.memory_space<vmem>>, vector<1x128xf32>
    %cst_58 = arith.constant 0.000000e+00 : f32
    %395 = vector.shape_cast %394 : vector<1x128xf32> to vector<1x128xf32>
    %396 = vector.broadcast %395 : vector<1x128xf32> to vector<64x128xf32>
    %397 = vector.broadcast %cst_58 : f32 to vector<64x128xf32>
    %398 = arith.select %392, %396, %397 : vector<64x128xi1>, vector<64x128xf32>
    %399 = arith.addf %358, %398 : vector<64x128xf32>
    %c1_i32_59 = arith.constant 1 : i32
    %c128_i32_60 = arith.constant 128 : i32
    %400 = arith.muli %c1_i32_59, %c128_i32_60 : i32
    %401 = vector.broadcast %400 : i32 to vector<1x128xi32>
    %402 = arith.addi %1, %401 : vector<1x128xi32>
    %403 = vector.broadcast %350 : vector<64x1xi32> to vector<64x128xi32>
    %404 = vector.broadcast %402 : vector<1x128xi32> to vector<64x128xi32>
    %405 = arith.cmpi eq, %403, %404 : vector<64x128xi32>
    %406 = vector.broadcast %351 : vector<64x1xi32> to vector<64x128xi32>
    %407 = vector.broadcast %402 : vector<1x128xi32> to vector<64x128xi32>
    %408 = arith.cmpi eq, %406, %407 : vector<64x128xi32>
    %409 = vector.broadcast %352 : vector<64x1xi32> to vector<64x128xi32>
    %410 = vector.broadcast %402 : vector<1x128xi32> to vector<64x128xi32>
    %411 = arith.cmpi eq, %409, %410 : vector<64x128xi32>
    %412 = vector.broadcast %353 : vector<64x1xi32> to vector<64x128xi32>
    %413 = vector.broadcast %402 : vector<1x128xi32> to vector<64x128xi32>
    %414 = arith.cmpi eq, %412, %413 : vector<64x128xi32>
    %415 = vector.broadcast %354 : vector<64x1xi32> to vector<64x128xi32>
    %416 = vector.broadcast %402 : vector<1x128xi32> to vector<64x128xi32>
    %417 = arith.cmpi eq, %415, %416 : vector<64x128xi32>
    %418 = vector.broadcast %355 : vector<64x1xi32> to vector<64x128xi32>
    %419 = vector.broadcast %402 : vector<1x128xi32> to vector<64x128xi32>
    %420 = arith.cmpi eq, %418, %419 : vector<64x128xi32>
    %421 = vector.broadcast %356 : vector<64x1xi32> to vector<64x128xi32>
    %422 = vector.broadcast %402 : vector<1x128xi32> to vector<64x128xi32>
    %423 = arith.cmpi eq, %421, %422 : vector<64x128xi32>
    %424 = vector.broadcast %357 : vector<64x1xi32> to vector<64x128xi32>
    %425 = vector.broadcast %402 : vector<1x128xi32> to vector<64x128xi32>
    %426 = arith.cmpi eq, %424, %425 : vector<64x128xi32>
    %427 = arith.ori %405, %408 : vector<64x128xi1>
    %428 = arith.ori %411, %414 : vector<64x128xi1>
    %429 = arith.ori %417, %420 : vector<64x128xi1>
    %430 = arith.ori %423, %426 : vector<64x128xi1>
    %431 = arith.ori %427, %428 : vector<64x128xi1>
    %432 = arith.ori %429, %430 : vector<64x128xi1>
    %433 = arith.ori %431, %432 : vector<64x128xi1>
    %434 = arith.index_cast %c1_i32_59 : i32 to index
    %c0_61 = arith.constant 0 : index
    %435 = vector.load %arg3[%434, %c0_61] : memref<8x128xf32, #tpu.memory_space<vmem>>, vector<1x128xf32>
    %cst_62 = arith.constant 0.000000e+00 : f32
    %436 = vector.shape_cast %435 : vector<1x128xf32> to vector<1x128xf32>
    %437 = vector.broadcast %436 : vector<1x128xf32> to vector<64x128xf32>
    %438 = vector.broadcast %cst_62 : f32 to vector<64x128xf32>
    %439 = arith.select %433, %437, %438 : vector<64x128xi1>, vector<64x128xf32>
    %440 = arith.addf %399, %439 : vector<64x128xf32>
    %c2_i32_63 = arith.constant 2 : i32
    %c128_i32_64 = arith.constant 128 : i32
    %441 = arith.muli %c2_i32_63, %c128_i32_64 : i32
    %442 = vector.broadcast %441 : i32 to vector<1x128xi32>
    %443 = arith.addi %1, %442 : vector<1x128xi32>
    %444 = vector.broadcast %350 : vector<64x1xi32> to vector<64x128xi32>
    %445 = vector.broadcast %443 : vector<1x128xi32> to vector<64x128xi32>
    %446 = arith.cmpi eq, %444, %445 : vector<64x128xi32>
    %447 = vector.broadcast %351 : vector<64x1xi32> to vector<64x128xi32>
    %448 = vector.broadcast %443 : vector<1x128xi32> to vector<64x128xi32>
    %449 = arith.cmpi eq, %447, %448 : vector<64x128xi32>
    %450 = vector.broadcast %352 : vector<64x1xi32> to vector<64x128xi32>
    %451 = vector.broadcast %443 : vector<1x128xi32> to vector<64x128xi32>
    %452 = arith.cmpi eq, %450, %451 : vector<64x128xi32>
    %453 = vector.broadcast %353 : vector<64x1xi32> to vector<64x128xi32>
    %454 = vector.broadcast %443 : vector<1x128xi32> to vector<64x128xi32>
    %455 = arith.cmpi eq, %453, %454 : vector<64x128xi32>
    %456 = vector.broadcast %354 : vector<64x1xi32> to vector<64x128xi32>
    %457 = vector.broadcast %443 : vector<1x128xi32> to vector<64x128xi32>
    %458 = arith.cmpi eq, %456, %457 : vector<64x128xi32>
    %459 = vector.broadcast %355 : vector<64x1xi32> to vector<64x128xi32>
    %460 = vector.broadcast %443 : vector<1x128xi32> to vector<64x128xi32>
    %461 = arith.cmpi eq, %459, %460 : vector<64x128xi32>
    %462 = vector.broadcast %356 : vector<64x1xi32> to vector<64x128xi32>
    %463 = vector.broadcast %443 : vector<1x128xi32> to vector<64x128xi32>
    %464 = arith.cmpi eq, %462, %463 : vector<64x128xi32>
    %465 = vector.broadcast %357 : vector<64x1xi32> to vector<64x128xi32>
    %466 = vector.broadcast %443 : vector<1x128xi32> to vector<64x128xi32>
    %467 = arith.cmpi eq, %465, %466 : vector<64x128xi32>
    %468 = arith.ori %446, %449 : vector<64x128xi1>
    %469 = arith.ori %452, %455 : vector<64x128xi1>
    %470 = arith.ori %458, %461 : vector<64x128xi1>
    %471 = arith.ori %464, %467 : vector<64x128xi1>
    %472 = arith.ori %468, %469 : vector<64x128xi1>
    %473 = arith.ori %470, %471 : vector<64x128xi1>
    %474 = arith.ori %472, %473 : vector<64x128xi1>
    %475 = arith.index_cast %c2_i32_63 : i32 to index
    %c0_65 = arith.constant 0 : index
    %476 = vector.load %arg3[%475, %c0_65] : memref<8x128xf32, #tpu.memory_space<vmem>>, vector<1x128xf32>
    %cst_66 = arith.constant 0.000000e+00 : f32
    %477 = vector.shape_cast %476 : vector<1x128xf32> to vector<1x128xf32>
    %478 = vector.broadcast %477 : vector<1x128xf32> to vector<64x128xf32>
    %479 = vector.broadcast %cst_66 : f32 to vector<64x128xf32>
    %480 = arith.select %474, %478, %479 : vector<64x128xi1>, vector<64x128xf32>
    %481 = arith.addf %440, %480 : vector<64x128xf32>
    %c3_i32_67 = arith.constant 3 : i32
    %c128_i32_68 = arith.constant 128 : i32
    %482 = arith.muli %c3_i32_67, %c128_i32_68 : i32
    %483 = vector.broadcast %482 : i32 to vector<1x128xi32>
    %484 = arith.addi %1, %483 : vector<1x128xi32>
    %485 = vector.broadcast %350 : vector<64x1xi32> to vector<64x128xi32>
    %486 = vector.broadcast %484 : vector<1x128xi32> to vector<64x128xi32>
    %487 = arith.cmpi eq, %485, %486 : vector<64x128xi32>
    %488 = vector.broadcast %351 : vector<64x1xi32> to vector<64x128xi32>
    %489 = vector.broadcast %484 : vector<1x128xi32> to vector<64x128xi32>
    %490 = arith.cmpi eq, %488, %489 : vector<64x128xi32>
    %491 = vector.broadcast %352 : vector<64x1xi32> to vector<64x128xi32>
    %492 = vector.broadcast %484 : vector<1x128xi32> to vector<64x128xi32>
    %493 = arith.cmpi eq, %491, %492 : vector<64x128xi32>
    %494 = vector.broadcast %353 : vector<64x1xi32> to vector<64x128xi32>
    %495 = vector.broadcast %484 : vector<1x128xi32> to vector<64x128xi32>
    %496 = arith.cmpi eq, %494, %495 : vector<64x128xi32>
    %497 = vector.broadcast %354 : vector<64x1xi32> to vector<64x128xi32>
    %498 = vector.broadcast %484 : vector<1x128xi32> to vector<64x128xi32>
    %499 = arith.cmpi eq, %497, %498 : vector<64x128xi32>
    %500 = vector.broadcast %355 : vector<64x1xi32> to vector<64x128xi32>
    %501 = vector.broadcast %484 : vector<1x128xi32> to vector<64x128xi32>
    %502 = arith.cmpi eq, %500, %501 : vector<64x128xi32>
    %503 = vector.broadcast %356 : vector<64x1xi32> to vector<64x128xi32>
    %504 = vector.broadcast %484 : vector<1x128xi32> to vector<64x128xi32>
    %505 = arith.cmpi eq, %503, %504 : vector<64x128xi32>
    %506 = vector.broadcast %357 : vector<64x1xi32> to vector<64x128xi32>
    %507 = vector.broadcast %484 : vector<1x128xi32> to vector<64x128xi32>
    %508 = arith.cmpi eq, %506, %507 : vector<64x128xi32>
    %509 = arith.ori %487, %490 : vector<64x128xi1>
    %510 = arith.ori %493, %496 : vector<64x128xi1>
    %511 = arith.ori %499, %502 : vector<64x128xi1>
    %512 = arith.ori %505, %508 : vector<64x128xi1>
    %513 = arith.ori %509, %510 : vector<64x128xi1>
    %514 = arith.ori %511, %512 : vector<64x128xi1>
    %515 = arith.ori %513, %514 : vector<64x128xi1>
    %516 = arith.index_cast %c3_i32_67 : i32 to index
    %c0_69 = arith.constant 0 : index
    %517 = vector.load %arg3[%516, %c0_69] : memref<8x128xf32, #tpu.memory_space<vmem>>, vector<1x128xf32>
    %cst_70 = arith.constant 0.000000e+00 : f32
    %518 = vector.shape_cast %517 : vector<1x128xf32> to vector<1x128xf32>
    %519 = vector.broadcast %518 : vector<1x128xf32> to vector<64x128xf32>
    %520 = vector.broadcast %cst_70 : f32 to vector<64x128xf32>
    %521 = arith.select %515, %519, %520 : vector<64x128xi1>, vector<64x128xf32>
    %522 = arith.addf %481, %521 : vector<64x128xf32>
    %c4_i32_71 = arith.constant 4 : i32
    %c128_i32_72 = arith.constant 128 : i32
    %523 = arith.muli %c4_i32_71, %c128_i32_72 : i32
    %524 = vector.broadcast %523 : i32 to vector<1x128xi32>
    %525 = arith.addi %1, %524 : vector<1x128xi32>
    %526 = vector.broadcast %350 : vector<64x1xi32> to vector<64x128xi32>
    %527 = vector.broadcast %525 : vector<1x128xi32> to vector<64x128xi32>
    %528 = arith.cmpi eq, %526, %527 : vector<64x128xi32>
    %529 = vector.broadcast %351 : vector<64x1xi32> to vector<64x128xi32>
    %530 = vector.broadcast %525 : vector<1x128xi32> to vector<64x128xi32>
    %531 = arith.cmpi eq, %529, %530 : vector<64x128xi32>
    %532 = vector.broadcast %352 : vector<64x1xi32> to vector<64x128xi32>
    %533 = vector.broadcast %525 : vector<1x128xi32> to vector<64x128xi32>
    %534 = arith.cmpi eq, %532, %533 : vector<64x128xi32>
    %535 = vector.broadcast %353 : vector<64x1xi32> to vector<64x128xi32>
    %536 = vector.broadcast %525 : vector<1x128xi32> to vector<64x128xi32>
    %537 = arith.cmpi eq, %535, %536 : vector<64x128xi32>
    %538 = vector.broadcast %354 : vector<64x1xi32> to vector<64x128xi32>
    %539 = vector.broadcast %525 : vector<1x128xi32> to vector<64x128xi32>
    %540 = arith.cmpi eq, %538, %539 : vector<64x128xi32>
    %541 = vector.broadcast %355 : vector<64x1xi32> to vector<64x128xi32>
    %542 = vector.broadcast %525 : vector<1x128xi32> to vector<64x128xi32>
    %543 = arith.cmpi eq, %541, %542 : vector<64x128xi32>
    %544 = vector.broadcast %356 : vector<64x1xi32> to vector<64x128xi32>
    %545 = vector.broadcast %525 : vector<1x128xi32> to vector<64x128xi32>
    %546 = arith.cmpi eq, %544, %545 : vector<64x128xi32>
    %547 = vector.broadcast %357 : vector<64x1xi32> to vector<64x128xi32>
    %548 = vector.broadcast %525 : vector<1x128xi32> to vector<64x128xi32>
    %549 = arith.cmpi eq, %547, %548 : vector<64x128xi32>
    %550 = arith.ori %528, %531 : vector<64x128xi1>
    %551 = arith.ori %534, %537 : vector<64x128xi1>
    %552 = arith.ori %540, %543 : vector<64x128xi1>
    %553 = arith.ori %546, %549 : vector<64x128xi1>
    %554 = arith.ori %550, %551 : vector<64x128xi1>
    %555 = arith.ori %552, %553 : vector<64x128xi1>
    %556 = arith.ori %554, %555 : vector<64x128xi1>
    %557 = arith.index_cast %c4_i32_71 : i32 to index
    %c0_73 = arith.constant 0 : index
    %558 = vector.load %arg3[%557, %c0_73] : memref<8x128xf32, #tpu.memory_space<vmem>>, vector<1x128xf32>
    %cst_74 = arith.constant 0.000000e+00 : f32
    %559 = vector.shape_cast %558 : vector<1x128xf32> to vector<1x128xf32>
    %560 = vector.broadcast %559 : vector<1x128xf32> to vector<64x128xf32>
    %561 = vector.broadcast %cst_74 : f32 to vector<64x128xf32>
    %562 = arith.select %556, %560, %561 : vector<64x128xi1>, vector<64x128xf32>
    %563 = arith.addf %522, %562 : vector<64x128xf32>
    %c5_i32_75 = arith.constant 5 : i32
    %c128_i32_76 = arith.constant 128 : i32
    %564 = arith.muli %c5_i32_75, %c128_i32_76 : i32
    %565 = vector.broadcast %564 : i32 to vector<1x128xi32>
    %566 = arith.addi %1, %565 : vector<1x128xi32>
    %567 = vector.broadcast %350 : vector<64x1xi32> to vector<64x128xi32>
    %568 = vector.broadcast %566 : vector<1x128xi32> to vector<64x128xi32>
    %569 = arith.cmpi eq, %567, %568 : vector<64x128xi32>
    %570 = vector.broadcast %351 : vector<64x1xi32> to vector<64x128xi32>
    %571 = vector.broadcast %566 : vector<1x128xi32> to vector<64x128xi32>
    %572 = arith.cmpi eq, %570, %571 : vector<64x128xi32>
    %573 = vector.broadcast %352 : vector<64x1xi32> to vector<64x128xi32>
    %574 = vector.broadcast %566 : vector<1x128xi32> to vector<64x128xi32>
    %575 = arith.cmpi eq, %573, %574 : vector<64x128xi32>
    %576 = vector.broadcast %353 : vector<64x1xi32> to vector<64x128xi32>
    %577 = vector.broadcast %566 : vector<1x128xi32> to vector<64x128xi32>
    %578 = arith.cmpi eq, %576, %577 : vector<64x128xi32>
    %579 = vector.broadcast %354 : vector<64x1xi32> to vector<64x128xi32>
    %580 = vector.broadcast %566 : vector<1x128xi32> to vector<64x128xi32>
    %581 = arith.cmpi eq, %579, %580 : vector<64x128xi32>
    %582 = vector.broadcast %355 : vector<64x1xi32> to vector<64x128xi32>
    %583 = vector.broadcast %566 : vector<1x128xi32> to vector<64x128xi32>
    %584 = arith.cmpi eq, %582, %583 : vector<64x128xi32>
    %585 = vector.broadcast %356 : vector<64x1xi32> to vector<64x128xi32>
    %586 = vector.broadcast %566 : vector<1x128xi32> to vector<64x128xi32>
    %587 = arith.cmpi eq, %585, %586 : vector<64x128xi32>
    %588 = vector.broadcast %357 : vector<64x1xi32> to vector<64x128xi32>
    %589 = vector.broadcast %566 : vector<1x128xi32> to vector<64x128xi32>
    %590 = arith.cmpi eq, %588, %589 : vector<64x128xi32>
    %591 = arith.ori %569, %572 : vector<64x128xi1>
    %592 = arith.ori %575, %578 : vector<64x128xi1>
    %593 = arith.ori %581, %584 : vector<64x128xi1>
    %594 = arith.ori %587, %590 : vector<64x128xi1>
    %595 = arith.ori %591, %592 : vector<64x128xi1>
    %596 = arith.ori %593, %594 : vector<64x128xi1>
    %597 = arith.ori %595, %596 : vector<64x128xi1>
    %598 = arith.index_cast %c5_i32_75 : i32 to index
    %c0_77 = arith.constant 0 : index
    %599 = vector.load %arg3[%598, %c0_77] : memref<8x128xf32, #tpu.memory_space<vmem>>, vector<1x128xf32>
    %cst_78 = arith.constant 0.000000e+00 : f32
    %600 = vector.shape_cast %599 : vector<1x128xf32> to vector<1x128xf32>
    %601 = vector.broadcast %600 : vector<1x128xf32> to vector<64x128xf32>
    %602 = vector.broadcast %cst_78 : f32 to vector<64x128xf32>
    %603 = arith.select %597, %601, %602 : vector<64x128xi1>, vector<64x128xf32>
    %604 = arith.addf %563, %603 : vector<64x128xf32>
    %c6_i32_79 = arith.constant 6 : i32
    %c128_i32_80 = arith.constant 128 : i32
    %605 = arith.muli %c6_i32_79, %c128_i32_80 : i32
    %606 = vector.broadcast %605 : i32 to vector<1x128xi32>
    %607 = arith.addi %1, %606 : vector<1x128xi32>
    %608 = vector.broadcast %350 : vector<64x1xi32> to vector<64x128xi32>
    %609 = vector.broadcast %607 : vector<1x128xi32> to vector<64x128xi32>
    %610 = arith.cmpi eq, %608, %609 : vector<64x128xi32>
    %611 = vector.broadcast %351 : vector<64x1xi32> to vector<64x128xi32>
    %612 = vector.broadcast %607 : vector<1x128xi32> to vector<64x128xi32>
    %613 = arith.cmpi eq, %611, %612 : vector<64x128xi32>
    %614 = vector.broadcast %352 : vector<64x1xi32> to vector<64x128xi32>
    %615 = vector.broadcast %607 : vector<1x128xi32> to vector<64x128xi32>
    %616 = arith.cmpi eq, %614, %615 : vector<64x128xi32>
    %617 = vector.broadcast %353 : vector<64x1xi32> to vector<64x128xi32>
    %618 = vector.broadcast %607 : vector<1x128xi32> to vector<64x128xi32>
    %619 = arith.cmpi eq, %617, %618 : vector<64x128xi32>
    %620 = vector.broadcast %354 : vector<64x1xi32> to vector<64x128xi32>
    %621 = vector.broadcast %607 : vector<1x128xi32> to vector<64x128xi32>
    %622 = arith.cmpi eq, %620, %621 : vector<64x128xi32>
    %623 = vector.broadcast %355 : vector<64x1xi32> to vector<64x128xi32>
    %624 = vector.broadcast %607 : vector<1x128xi32> to vector<64x128xi32>
    %625 = arith.cmpi eq, %623, %624 : vector<64x128xi32>
    %626 = vector.broadcast %356 : vector<64x1xi32> to vector<64x128xi32>
    %627 = vector.broadcast %607 : vector<1x128xi32> to vector<64x128xi32>
    %628 = arith.cmpi eq, %626, %627 : vector<64x128xi32>
    %629 = vector.broadcast %357 : vector<64x1xi32> to vector<64x128xi32>
    %630 = vector.broadcast %607 : vector<1x128xi32> to vector<64x128xi32>
    %631 = arith.cmpi eq, %629, %630 : vector<64x128xi32>
    %632 = arith.ori %610, %613 : vector<64x128xi1>
    %633 = arith.ori %616, %619 : vector<64x128xi1>
    %634 = arith.ori %622, %625 : vector<64x128xi1>
    %635 = arith.ori %628, %631 : vector<64x128xi1>
    %636 = arith.ori %632, %633 : vector<64x128xi1>
    %637 = arith.ori %634, %635 : vector<64x128xi1>
    %638 = arith.ori %636, %637 : vector<64x128xi1>
    %639 = arith.index_cast %c6_i32_79 : i32 to index
    %c0_81 = arith.constant 0 : index
    %640 = vector.load %arg3[%639, %c0_81] : memref<8x128xf32, #tpu.memory_space<vmem>>, vector<1x128xf32>
    %cst_82 = arith.constant 0.000000e+00 : f32
    %641 = vector.shape_cast %640 : vector<1x128xf32> to vector<1x128xf32>
    %642 = vector.broadcast %641 : vector<1x128xf32> to vector<64x128xf32>
    %643 = vector.broadcast %cst_82 : f32 to vector<64x128xf32>
    %644 = arith.select %638, %642, %643 : vector<64x128xi1>, vector<64x128xf32>
    %645 = arith.addf %604, %644 : vector<64x128xf32>
    %c7_i32_83 = arith.constant 7 : i32
    %c128_i32_84 = arith.constant 128 : i32
    %646 = arith.muli %c7_i32_83, %c128_i32_84 : i32
    %647 = vector.broadcast %646 : i32 to vector<1x128xi32>
    %648 = arith.addi %1, %647 : vector<1x128xi32>
    %649 = vector.broadcast %350 : vector<64x1xi32> to vector<64x128xi32>
    %650 = vector.broadcast %648 : vector<1x128xi32> to vector<64x128xi32>
    %651 = arith.cmpi eq, %649, %650 : vector<64x128xi32>
    %652 = vector.broadcast %351 : vector<64x1xi32> to vector<64x128xi32>
    %653 = vector.broadcast %648 : vector<1x128xi32> to vector<64x128xi32>
    %654 = arith.cmpi eq, %652, %653 : vector<64x128xi32>
    %655 = vector.broadcast %352 : vector<64x1xi32> to vector<64x128xi32>
    %656 = vector.broadcast %648 : vector<1x128xi32> to vector<64x128xi32>
    %657 = arith.cmpi eq, %655, %656 : vector<64x128xi32>
    %658 = vector.broadcast %353 : vector<64x1xi32> to vector<64x128xi32>
    %659 = vector.broadcast %648 : vector<1x128xi32> to vector<64x128xi32>
    %660 = arith.cmpi eq, %658, %659 : vector<64x128xi32>
    %661 = vector.broadcast %354 : vector<64x1xi32> to vector<64x128xi32>
    %662 = vector.broadcast %648 : vector<1x128xi32> to vector<64x128xi32>
    %663 = arith.cmpi eq, %661, %662 : vector<64x128xi32>
    %664 = vector.broadcast %355 : vector<64x1xi32> to vector<64x128xi32>
    %665 = vector.broadcast %648 : vector<1x128xi32> to vector<64x128xi32>
    %666 = arith.cmpi eq, %664, %665 : vector<64x128xi32>
    %667 = vector.broadcast %356 : vector<64x1xi32> to vector<64x128xi32>
    %668 = vector.broadcast %648 : vector<1x128xi32> to vector<64x128xi32>
    %669 = arith.cmpi eq, %667, %668 : vector<64x128xi32>
    %670 = vector.broadcast %357 : vector<64x1xi32> to vector<64x128xi32>
    %671 = vector.broadcast %648 : vector<1x128xi32> to vector<64x128xi32>
    %672 = arith.cmpi eq, %670, %671 : vector<64x128xi32>
    %673 = arith.ori %651, %654 : vector<64x128xi1>
    %674 = arith.ori %657, %660 : vector<64x128xi1>
    %675 = arith.ori %663, %666 : vector<64x128xi1>
    %676 = arith.ori %669, %672 : vector<64x128xi1>
    %677 = arith.ori %673, %674 : vector<64x128xi1>
    %678 = arith.ori %675, %676 : vector<64x128xi1>
    %679 = arith.ori %677, %678 : vector<64x128xi1>
    %680 = arith.index_cast %c7_i32_83 : i32 to index
    %c0_85 = arith.constant 0 : index
    %681 = vector.load %arg3[%680, %c0_85] : memref<8x128xf32, #tpu.memory_space<vmem>>, vector<1x128xf32>
    %cst_86 = arith.constant 0.000000e+00 : f32
    %682 = vector.shape_cast %681 : vector<1x128xf32> to vector<1x128xf32>
    %683 = vector.broadcast %682 : vector<1x128xf32> to vector<64x128xf32>
    %684 = vector.broadcast %cst_86 : f32 to vector<64x128xf32>
    %685 = arith.select %679, %683, %684 : vector<64x128xi1>, vector<64x128xf32>
    %686 = arith.addf %645, %685 : vector<64x128xf32>
    %c8_i32_87 = arith.constant 8 : i32
    %cst_88 = arith.constant dense<0.000000e+00> : vector<64xf32>
    %687 = vector.multi_reduction <add>, %686, %cst_88 [1] : vector<64x128xf32> to vector<64xf32>
    %688 = vector.shape_cast %687 : vector<64xf32> to vector<64x1xf32>
    %689 = vector.broadcast %0 : f32 to vector<64x1xf32>
    %690 = arith.addf %688, %689 : vector<64x1xf32>
    %cst_89 = arith.constant 0.000000e+00 : f32
    %691 = vector.broadcast %cst_89 : f32 to vector<64x1xf32>
    %692 = arith.cmpf ogt, %690, %691 : vector<64x1xf32>
    %693 = arith.extui %692 : vector<64x1xi1> to vector<64x1xi32>
    %c64_90 = arith.constant 64 : index
    %c0_91 = arith.constant 0 : index
    %694 = vector.load %arg2[%c64_90, %c0_91] : memref<128x1xi32, #tpu.memory_space<vmem>>, vector<64x1xi32>
    %695 = arith.cmpi eq, %693, %694 : vector<64x1xi32>
    %696 = arith.extui %695 : vector<64x1xi1> to vector<64x1xi32>
    %c64_92 = arith.constant 64 : index
    %c0_93 = arith.constant 0 : index
    %697 = vector.load %arg5[%c64_92, %c0_93] : memref<128x1xi32, #tpu.memory_space<vmem>>, vector<64x1xi32>
    tpu.vector_store %arg5[%c64_92, %c0_93], %696 {strides = array<i32>} : memref<128x1xi32, #tpu.memory_space<vmem>>, vector<64x1xi32>,
    return
  }
  func.func @transform_0(%arg0: i32) -> (i32, i32) {
    %c0_i32 = arith.constant 0 : i32
    %c0_i32_0 = arith.constant 0 : i32
    return %arg0, %c0_i32 : i32, i32
  }
  func.func @transform_1(%arg0: i32) -> (i32, i32) {
    %c0_i32 = arith.constant 0 : i32
    %c0_i32_0 = arith.constant 0 : i32
    return %arg0, %c0_i32 : i32, i32
  }
  func.func @transform_2(%arg0: i32) -> (i32, i32) {
    %c0_i32 = arith.constant 0 : i32
    %c0_i32_0 = arith.constant 0 : i32
    %c0_i32_1 = arith.constant 0 : i32
    return %c0_i32, %c0_i32_0 : i32, i32
  }
  func.func @transform_3(%arg0: i32) -> (i32, i32) {
    %c0_i32 = arith.constant 0 : i32
    %c0_i32_0 = arith.constant 0 : i32
    %c0_i32_1 = arith.constant 0 : i32
    return %c0_i32, %c0_i32_0 : i32, i32
  }
  func.func @transform_4(%arg0: i32) -> (i32, i32) {
    %c0_i32 = arith.constant 0 : i32
    %c0_i32_0 = arith.constant 0 : i32
    return %arg0, %c0_i32 : i32, i32
  }
}

</mosaic_0001>

<bundles_post_ra>
// kernel: tpu_custom_call.1
= control target key start
LH: loop header
LB: loop body
LE: loop exit
PB: predicated region body
PF: predicated region fallthrough
CT: control target
= control target key end

     0   :  { %s3241_s17 = smov 0   ;;  %s9101_s0 = inlined_call_operand.vmem [shape: s32[256,8], index: 0, kind: input, shape index: {}]   ;;  %s9102_s1 = inlined_call_operand.vmem [shape: s32[256,1], index: 1, kind: input, shape index: {}]   ;;  %s9103_s2 = inlined_call_operand.vmem [shape: f32[8,128], index: 2, kind: input, shape index: {}]   ;;  %s9104_s3 = inlined_call_operand.<no memory space> [shape: f32[1,1], index: 3, kind: input, shape index: {}]   ;;  %s9105_s4 = inlined_call_operand.vmem [shape: s32[256,1], index: 4, kind: output, shape index: {}]  }
   0x1   :  { %9 = sst [smem:[#allocation2]] %s9104_s3 }
   0x2 LB: > { %s3104_s18 = sadd.s32 4294967295, %s3203_s17   ;;  %p3108_p0 = scmp.ge.s32.totalorder %s3203_s17, 1  ;;  %s3203_s17 = sphi %s3241_s17, %s15_s17  }
   0x3   : > { %p175_p1 = scmp.lt.s32.totalorder %s3203_s17, 3 }
   0x5   : > { %p176_p2 = pnand %p3108_p0, %p175_p1 }
   0x7   : > { %179 = sbr.rel (%p176_p2) target bundleno = 1509 (0x5e5), region = 36 }
   0xe   : > { %s3109_s19 = sshll.u32 %s3104_s18, 4  ;;  %v9120_v0 = vmov 1   ;;  %v9110_v1 = vmov 0   ;;  %v9118_v8 = vmov 2   ;;  %v9116_v11 = vmov 3   ;;  %s224_s5 = sld [smem:[#allocation2]] }
   0xf   : > { %3150 = vset.pattern.permute.xlu0 %v9120_v0  ;;  %3149 = vset.pattern.permute.xlu1 %v9110_v1  ;;  %p207_p3 = scmp.lt.s32.totalorder %s3109_s19, 31  ;;  %v9114_v12 = vmov 4   ;;  %v9112_v13 = vmov 5   ;;  %v9108_v14 = vmov 6   ;;  %v9106_v15 = vmov 7  }
  0x10   : > { %v225_v62 = vlaneseq }
  0x11   : > { %s10472_s19 = smov (!%p207_p3, %s3109_s19), 31 }
  0x12   : > { %s3251_s3 = sshll.u32 %s10472_s19, 3 }
  0x13   : > { %s3257_s22 = scalar_lea.vmem %s9101_s0, %s3251_s3  ;;  %s6257_s8 = scalar_lea.vmem %s9102_s1, %s3251_s3 }
  0x14   : > { %v3260_v2 = vld [vmem:[%s3257_s22 + $0x10] sm:$0xff]  ;;  %v3263_v3 = vld [vmem:[%s3257_s22] sm:$0xff]  ;;  %v3268_v4 = vld [vmem:[%s3257_s22 + $0x18] sm:$0xff]  ;;  %s6309_s11 = scalar_lea.vmem %s9105_s4, %s3251_s3 }
  0x15   : > { %242 = vperm.xlu1 %3149, %v3260_v2   ;;  %268 = vperm.xlu0 %3150, %v3263_v3   ;;  %v3273_v5 = vld [vmem:[%s3257_s22 + $0x28] sm:$0xff]  ;;  %v3278_v6 = vld [vmem:[%s3257_s22 + $0x38] sm:$0xff]  ;;  %v3290_v9 = vld [vmem:[%s3257_s22 + $0x20] sm:$0xff] }
  0x16   : > { %v3283_v7 = vld [vmem:[%s3257_s22 + $0x8] sm:$0xff]  ;;  %v3295_v10 = vld [vmem:[%s3257_s22 + $0x30] sm:$0xff] }
  0x19   : > { %245 = vperm.xlu1 %3149, %v3268_v4   ;;  %277 = vperm.xlu0 %3150, %v3268_v4  }
  0x1d   : > { %251 = vperm.xlu1 %3149, %v3273_v5   ;;  %283 = vperm.xlu0 %3150, %v3273_v5  }
  0x21   : > { %257 = vperm.xlu1 %3149, %v3278_v6   ;;  %289 = vperm.xlu0 %3150, %v3278_v6  }
  0x25   : > { %3151 = vset.pattern.permute.xlu1 %v9120_v0  ;;  %3153 = vset.pattern.permute.xlu0 %v9118_v8 }
  0x26   : > { %271 = vperm.xlu1 %3151, %v3283_v7   ;;  %303 = vperm.xlu0 %3153, %v3283_v7  }
  0x2a   : > { %274 = vperm.xlu1 %3151, %v3260_v2   ;;  %312 = vperm.xlu0 %3153, %v3290_v9  }
  0x2e   : > { %280 = vperm.xlu1 %3151, %v3290_v9   ;;  %318 = vperm.xlu0 %3153, %v3295_v10  }
  0x32   : > { %286 = vperm.xlu1 %3151, %v3295_v10   ;;  %3154 = vset.pattern.permute.xlu0 %v9116_v11 }
  0x33   : > { %332 = vperm.xlu0 %3154, %v3263_v3  }
  0x36   : > { %3152 = vset.pattern.permute.xlu1 %v9118_v8 }
  0x37   : > { %300 = vperm.xlu1 %3152, %v3263_v3   ;;  %341 = vperm.xlu0 %3154, %v3268_v4  }
  0x3b   : > { %306 = vperm.xlu1 %3152, %v3260_v2   ;;  %347 = vperm.xlu0 %3154, %v3273_v5  }
  0x3f   : > { %309 = vperm.xlu1 %3152, %v3268_v4   ;;  %353 = vperm.xlu0 %3154, %v3278_v6  }
  0x43   : > { %315 = vperm.xlu1 %3152, %v3273_v5   ;;  %3157 = vset.pattern.permute.xlu0 %v9114_v12 }
  0x44   : > { %367 = vperm.xlu0 %3157, %v3283_v7  }
  0x47   : > { %321 = vperm.xlu1 %3152, %v3278_v6  }
  0x48   : > { %376 = vperm.xlu0 %3157, %v3290_v9  }
  0x4b   : > { %3155 = vset.pattern.permute.xlu1 %v9116_v11 }
  0x4c   : > { %335 = vperm.xlu1 %3155, %v3283_v7   ;;  %382 = vperm.xlu0 %3157, %v3295_v10  }
  0x50   : > { %338 = vperm.xlu1 %3155, %v3260_v2   ;;  %3158 = vset.pattern.permute.xlu0 %v9112_v13 }
  0x51   : > { %396 = vperm.xlu0 %3158, %v3263_v3  }
  0x54   : > { %344 = vperm.xlu1 %3155, %v3290_v9  }
  0x55   : > { %405 = vperm.xlu0 %3158, %v3268_v4  }
  0x58   : > { %350 = vperm.xlu1 %3155, %v3295_v10  }
  0x59   : > { %411 = vperm.xlu0 %3158, %v3273_v5  }
  0x5c   : > { %3156 = vset.pattern.permute.xlu1 %v9114_v12 }
  0x5d   : > { %364 = vperm.xlu1 %3156, %v3263_v3   ;;  %417 = vperm.xlu0 %3158, %v3278_v6  }
  0x61   : > { %370 = vperm.xlu1 %3156, %v3260_v2   ;;  %3161 = vset.pattern.permute.xlu0 %v9108_v14 }
  0x62   : > { %431 = vperm.xlu0 %3161, %v3283_v7  }
  0x65   : > { %373 = vperm.xlu1 %3156, %v3268_v4  }
  0x66   : > { %440 = vperm.xlu0 %3161, %v3290_v9  }
  0x69   : > { %379 = vperm.xlu1 %3156, %v3273_v5  }
  0x6a   : > { %446 = vperm.xlu0 %3161, %v3295_v10  }
  0x6d   : > { %385 = vperm.xlu1 %3156, %v3278_v6  }
  0x6e   : > { %3162 = vset.pattern.permute.xlu0 %v9106_v15 }
  0x6f   : > { %460 = vperm.xlu0 %3162, %v3263_v3  }
  0x71   : > { %3159 = vset.pattern.permute.xlu1 %v9112_v13  ;;  %v9300_v13 = vmov 0 }
  0x72   : > { %399 = vperm.xlu1 %3159, %v3283_v7  }
  0x73   : > { %469 = vperm.xlu0 %3162, %v3268_v4  }
  0x76   : > { %402 = vperm.xlu1 %3159, %v3260_v2  }
  0x77   : > { %475 = vperm.xlu0 %3162, %v3273_v5  }
  0x7a   : > { %408 = vperm.xlu1 %3159, %v3290_v9  }
  0x7b   : > { %481 = vperm.xlu0 %3162, %v3278_v6  }
  0x7e   : > { %414 = vperm.xlu1 %3159, %v3295_v10  }
  0x7f   : > { %3164 = vset.pattern.permute.xlu0 %v9110_v1 }
  0x80   : > { %236 = vperm.xlu0 %3164, %v3263_v3  }
  0x82   : > { %3160 = vset.pattern.permute.xlu1 %v9108_v14 }
  0x83   : > { %428 = vperm.xlu1 %3160, %v3263_v3   ;;  %v3458_v3 = vand.u32 127, %v225_v62 }
  0x84   : > { %239 = vperm.xlu0 %3164, %v3283_v7  }
  0x85   : > { %v3500_v14 = vadd.s32 256, %v3458_v3  ;;  %v3687_v62 = vadd.s32 768, %v3458_v3 }
  0x87   : > { %434 = vperm.xlu1 %3160, %v3260_v2  }
  0x88   : > { %248 = vperm.xlu0 %3164, %v3290_v9  }
  0x8b   : > { %437 = vperm.xlu1 %3160, %v3268_v4  }
  0x8c   : > { %254 = vperm.xlu0 %3164, %v3295_v10  }
  0x8f   : > { %443 = vperm.xlu1 %3160, %v3273_v5  }
  0x93   : > { %449 = vperm.xlu1 %3160, %v3278_v6   ;;  %v3465_v6 = vadd.s32 128, %v3458_v3 }
  0x94   : > { %v3356_v16 = vpop.permute.xlu1 %242  ;;  %v3358_v17 = vpop.permute.xlu0 %268 }
  0x95   : > { %9270 = vst [vmem:[#allocation3_spill] sm:$0xff] %v3356_v16  ;;  %vm291_vm12 = vcmp.eq.s32.totalorder %v3358_v17, %v3458_v3  ;;  %v4080_v16 = vld [vmem:[%s9103_s2 + $0x7] ss:$0 sm:$0xff] }
  0x97   : > { %3163 = vset.pattern.permute.xlu1 %v9106_v15  ;;  %v3584_v15 = vadd.s32 512, %v3458_v3 }
  0x98   : > { %v3361_v18 = vpop.permute.xlu1 %245  ;;  %463 = vperm.xlu1 %3163, %v3283_v7   ;;  %v3364_v19 = vpop.permute.xlu0 %277 }
  0x9c   : > { %v3366_v20 = vpop.permute.xlu1 %251  ;;  %466 = vperm.xlu1 %3163, %v3260_v2   ;;  %v3369_v21 = vpop.permute.xlu0 %283 }
  0xa0   : > { %v3371_v22 = vpop.permute.xlu1 %257  ;;  %472 = vperm.xlu1 %3163, %v3290_v9   ;;  %v3374_v23 = vpop.permute.xlu0 %289  ;;  %v3547_v9 = vadd.s32 384, %v3458_v3 }
  0xa4   : > { %478 = vperm.xlu1 %3163, %v3295_v10  }
  0xa5   : > { %v3377_v24 = vpop.permute.xlu1 %271  ;;  %v3379_v25 = vpop.permute.xlu0 %303 }
  0xa8   : > { %3165 = vset.pattern.permute.xlu1 %v9110_v1  ;;  %v9310_v1 = vmov 0 }
  0xa9   : > { %v3382_v26 = vpop.permute.xlu1 %274  ;;  %v3384_v27 = vpop.permute.xlu0 %312 }
  0xaa   : > { %9271 = vst [vmem:[#allocation4_spill] sm:$0xff] %v3382_v26  ;;  %9272 = vst [vmem:[#allocation5_spill] sm:$0xff] %v3384_v27  ;;  %v3984_v27 = vld [vmem:[%s9103_s2 + $0x6] ss:$0 sm:$0xff]  ;;  %v9483_v26 = vmov 0 }
  0xad   : > { %v3386_v28 = vpop.permute.xlu1 %280  ;;  %v3388_v29 = vpop.permute.xlu0 %318 }
  0xae   : > { %9273 = vst [vmem:[#allocation6_spill] sm:$0xff] %v3386_v28  ;;  %9274 = vst [vmem:[#allocation7_spill] sm:$0xff] %v3388_v29  ;;  %v3609_v29 = vld [vmem:[%s9103_s2] ss:$0 sm:$0xff]  ;;  %v3807_v28 = vld [vmem:[%s9103_s2 + $0x4] ss:$0 sm:$0xff] }
  0xb1   : > { %v3390_v30 = vpop.permute.xlu1 %286 }
  0xb2   : > { %9275 = vst [vmem:[#allocation8_spill] sm:$0xff] %v3390_v30  ;;  %v3392_v31 = vpop.permute.xlu0 %332 }
  0xb3   : > { %vm355_vm1 = vcmp.eq.s32.totalorder %v3392_v31, %v3458_v3  ;;  %vm593_vm4 = vcmp.eq.s32.totalorder %v3392_v31, %v3465_v6 }
  0xb6   : > { %v3394_v32 = vpop.permute.xlu1 %300  ;;  %v3396_v33 = vpop.permute.xlu0 %341 }
  0xb7   : > { %vm323_vm0 = vcmp.eq.s32.totalorder %v3394_v32, %v3458_v3  ;;  %vm585_vm3 = vcmp.eq.s32.totalorder %v3394_v32, %v3465_v6 }
  0xb8   : > { %vm3483_vm7 = vmor %vm323_vm0, %vm355_vm1  ;;  %vm727_vm0 = vcmp.eq.s32.totalorder %v3394_v32, %v3500_v14  ;;  %vm735_vm1 = vcmp.eq.s32.totalorder %v3392_v31, %v3500_v14 }
  0xb9   : > { %vm3495_vm10 = vmor %vm585_vm3, %vm593_vm4  ;;  %vm577_vm3 = vcmp.eq.s32.totalorder %v3358_v17, %v3465_v6 }
  0xba   : > { %v3398_v34 = vpop.permute.xlu1 %306  ;;  %v3400_v35 = vpop.permute.xlu0 %347 }
  0xbb   : > { %9276 = vst [vmem:[#allocation9_spill] sm:$0xff] %v3398_v34  ;;  %v9355_v34 = vmov 0 }
  0xbe   : > { %v3402_v36 = vpop.permute.xlu1 %309  ;;  %v3404_v37 = vpop.permute.xlu0 %353 }
  0xc2   : > { %v3406_v38 = vpop.permute.xlu1 %315 }
  0xc3   : > { %v3408_v39 = vpop.permute.xlu0 %367 }
  0xc6   : > { %v3410_v40 = vpop.permute.xlu1 %321 }
  0xc7   : > { %v3412_v41 = vpop.permute.xlu0 %376 }
  0xc8   : > { %9277 = vst [vmem:[#allocation10_spill] sm:$0xff] %v3412_v41  ;;  %v3668_v41 = vld [vmem:[%s9103_s2 + $0x2] ss:$0 sm:$0xff] }
  0xcb   : > { %v3414_v42 = vpop.permute.xlu1 %335  ;;  %v3416_v43 = vpop.permute.xlu0 %382 }
  0xcc   : > { %9278 = vst [vmem:[#allocation11_spill] sm:$0xff] %v3416_v43 }
  0xcf   : > { %v3418_v44 = vpop.permute.xlu1 %338 }
  0xd0   : > { %9279 = vst [vmem:[#allocation12_spill] sm:$0xff] %v3418_v44  ;;  %v3420_v45 = vpop.permute.xlu0 %396 }
  0xd1   : > { %vm419_vm6 = vcmp.eq.s32.totalorder %v3420_v45, %v3458_v3  ;;  %vm609_vm9 = vcmp.eq.s32.totalorder %v3420_v45, %v3465_v6 }
  0xd3   : > { %v3422_v46 = vpop.permute.xlu1 %344 }
  0xd4   : > { %9280 = vst [vmem:[#allocation13_spill] sm:$0xff] %v3422_v46  ;;  %v3424_v47 = vpop.permute.xlu0 %405 }
  0xd7   : > { %v3426_v48 = vpop.permute.xlu1 %350 }
  0xd8   : > { %9281 = vst [vmem:[#allocation14_spill] sm:$0xff] %v3426_v48  ;;  %v3428_v49 = vpop.permute.xlu0 %411  ;;  %v9390_v48 = vmov 0 }
  0xdc   : > { %v3430_v50 = vpop.permute.xlu1 %364  ;;  %v3432_v51 = vpop.permute.xlu0 %417 }
  0xdd   : > { %vm387_vm2 = vcmp.eq.s32.totalorder %v3430_v50, %v3458_v3  ;;  %vm601_vm5 = vcmp.eq.s32.totalorder %v3430_v50, %v3465_v6  ;;  %vm743_vm4 = vcmp.eq.s32.totalorder %v3430_v50, %v3500_v14 }
  0xde   : > { %vm3489_vm8 = vmor %vm387_vm2, %vm419_vm6 }
  0xdf   : > { %vm3508_vm14 = vmor %vm601_vm5, %vm609_vm9 }
  0xe0   : > { %v3434_v52 = vpop.permute.xlu1 %370 }
  0xe1   : > { %9282 = vst [vmem:[#allocation15_spill] sm:$0xff] %v3434_v52  ;;  %v3436_v53 = vpop.permute.xlu0 %431  ;;  %v9394_v52 = vmov 0 }
  0xe4   : > { %v3438_v54 = vpop.permute.xlu1 %373 }
  0xe5   : > { %v3440_v55 = vpop.permute.xlu0 %440 }
  0xe6   : > { %9283 = vst [vmem:[#allocation16_spill] sm:$0xff] %v3440_v55 }
  0xe8   : > { %v3442_v56 = vpop.permute.xlu1 %379 }
  0xe9   : > { %v3444_v57 = vpop.permute.xlu0 %446 }
  0xea   : > { %9284 = vst [vmem:[#allocation17_spill] sm:$0xff] %v3444_v57  ;;  %v3614_v57 = vld [vmem:[%s9103_s2 + $0x1] ss:$0 sm:$0xff] }
  0xec   : > { %v3446_v58 = vpop.permute.xlu1 %385 }
  0xee   : > { %v3448_v59 = vpop.permute.xlu0 %460 }
  0xef   : > { %vm483_vm6 = vcmp.eq.s32.totalorder %v3448_v59, %v3458_v3 }
  0xf1   : > { %v3450_v60 = vpop.permute.xlu1 %399 }
  0xf2   : > { %v3452_v61 = vpop.permute.xlu0 %469 }
  0xf5   : > { %v3454_v63 = vpop.permute.xlu1 %402 }
  0xf6   : > { %9285 = vst [vmem:[#allocation18_spill] sm:$0xff] %v3454_v63  ;;  %v3456_v2 = vpop.permute.xlu0 %475 }
  0xf9   : > { %v3460_v4 = vpop.permute.xlu1 %408 }
  0xfa   : > { %9286 = vst [vmem:[#allocation19_spill] sm:$0xff] %v3460_v4  ;;  %v3462_v5 = vpop.permute.xlu0 %481  ;;  %v3719_v4 = vld [vmem:[%s9103_s2 + $0x3] ss:$0 sm:$0xff] }
  0xfd   : > { %v3477_v7 = vpop.permute.xlu1 %414 }
  0xfe   : > { %9287 = vst [vmem:[#allocation20_spill] sm:$0xff] %v3477_v7  ;;  %v9360_v7 = vmov 0 }
  0xff   : > { %v3487_v10 = vpop.permute.xlu0 %236 }
 0x100   : > { %vm259_vm11 = vcmp.eq.s32.totalorder %v3487_v10, %v3458_v3  ;;  %vm569_vm13 = vcmp.eq.s32.totalorder %v3487_v10, %v3465_v6 }
 0x101   : > { %vm3512_vm15 = vmor %vm259_vm11, %vm291_vm12  ;;  %vm751_vm12 = vcmp.eq.s32.totalorder %v3420_v45, %v3500_v14 }
 0x102   : > { %v3520_v12 = vpop.permute.xlu1 %428  ;;  %vm523_vm2 = vmor %vm3512_vm15, %vm3483_vm7 }
 0x103   : > { %vm451_vm5 = vcmp.eq.s32.totalorder %v3520_v12, %v3458_v3  ;;  %vm3534_vm9 = vmor %vm569_vm13, %vm577_vm3  ;;  %vm617_vm7 = vcmp.eq.s32.totalorder %v3520_v12, %v3465_v6 }
 0x104   : > { %vm515_vm11 = vmor %vm451_vm5, %vm483_vm6  ;;  %vm877_vm6 = vcmp.eq.s32.totalorder %v3392_v31, %v3547_v9 }
 0x105   : > { %vm3542_vm15 = vmor %vm727_vm0, %vm735_vm1  ;;  %vm625_vm0 = vcmp.eq.s32.totalorder %v3448_v59, %v3465_v6  ;;  %vm869_vm1 = vcmp.eq.s32.totalorder %v3394_v32, %v3547_v9 }
 0x106   : > { %v9301_v13 = vsel %vm3542_vm15, 4294967295, %v9300_v13  ;;  %vm531_vm13 = vmor %vm3489_vm8, %vm515_vm11  ;;  %vm885_vm8 = vcmp.eq.s32.totalorder %v3430_v50, %v3547_v9  ;;  %v3860_v63 = vpop.permute.xlu1 %434 }
 0x107   : > { %vm3551_vm3 = vmor %vm743_vm4, %vm751_vm12  ;;  %vm711_vm4 = vcmp.eq.s32.totalorder %v3487_v10, %v3500_v14  ;;  %vm759_vm12 = vcmp.eq.s32.totalorder %v3520_v12, %v3500_v14  ;;  %9357 = vst [vmem:[#allocation21_spill] sm:$0xff] %v3860_v63  ;;  %v9436_v63 = vmov 0 }
 0x108   : > { %vm3555_vm5 = vmor %vm523_vm2, %vm531_vm13 }
 0x109   : > { %vm657_vm15 = vmor %vm617_vm7, %vm625_vm0  ;;  %vm893_vm7 = vcmp.eq.s32.totalorder %v3420_v45, %v3547_v9  ;;  %v552_v43 = vsel %vm3555_vm5, %v3609_v29, 0.0 }
 0x10a   : > { %vm665_vm2 = vmor %vm3534_vm9, %vm3495_vm10 }
 0x10b   : > { %vm673_vm11 = vmor %vm3508_vm14, %vm657_vm15  ;;  %vm719_vm14 = vcmp.eq.s32.totalorder %v3358_v17, %v3500_v14  ;;  %vm767_vm15 = vcmp.eq.s32.totalorder %v3448_v59, %v3500_v14 }
 0x10c   : > { %vm3579_vm13 = vmor %vm869_vm1, %vm877_vm6  ;;  %vm1011_vm1 = vcmp.eq.s32.totalorder %v3394_v32, %v3584_v15  ;;  %vm1019_vm6 = vcmp.eq.s32.totalorder %v3392_v31, %v3584_v15 }
 0x10d   : > { %vm3586_vm10 = vmor %vm665_vm2, %vm673_vm11  ;;  %vm1027_vm2 = vcmp.eq.s32.totalorder %v3430_v50, %v3584_v15 }
 0x10e   : > { %vm3592_vm9 = vmor %vm885_vm8, %vm893_vm7  ;;  %vm853_vm7 = vcmp.eq.s32.totalorder %v3487_v10, %v3547_v9  ;;  %v694_v8 = vsel %vm3586_vm10, %v3614_v57, 0.0 }
 0x10f   : > { %v9311_v1 = vsel %vm3592_vm9, 4294967295, %v9310_v1  ;;  %vm3598_vm0 = vmor %vm711_vm4, %vm719_vm14  ;;  %vm9314_vm4 = vnez %v9301_v13  ;;  %vm901_vm9 = vcmp.eq.s32.totalorder %v3520_v12, %v3547_v9  ;;  %v3635_v13 = vadd.s32 640, %v3458_v3 }
 0x110   : > { %vm799_vm8 = vmor %vm759_vm12, %vm767_vm15  ;;  %vm1035_vm12 = vcmp.eq.s32.totalorder %v3420_v45, %v3584_v15  ;;  %v702_v11 = vadd.f32 %v694_v8, %v552_v43  ;;  %v9344_v8 = vmov 0  ;;  %v9382_v43 = vmov 0 }
 0x111   : > { %vm807_vm11 = vmor %vm3598_vm0, %vm9314_vm4  ;;  %vm861_vm0 = vcmp.eq.s32.totalorder %v3358_v17, %v3547_v9  ;;  %vm1153_vm5 = vcmp.eq.s32.totalorder %v3394_v32, %v3635_v13  ;;  %vm1161_vm10 = vcmp.eq.s32.totalorder %v3392_v31, %v3635_v13 }
 0x112   : > { %vm815_vm14 = vmor %vm3551_vm3, %vm799_vm8 }
 0x113   : > { %vm3630_vm15 = vmor %vm1011_vm1, %vm1019_vm6  ;;  %vm909_vm6 = vcmp.eq.s32.totalorder %v3448_v59, %v3547_v9 }
 0x114   : > { %vm3643_vm3 = vmor %vm807_vm11, %vm815_vm14  ;;  %vm9323_vm14 = vnez %v9311_v1  ;;  %v9363_v1 = vmov 0 }
 0x115   : > { %vm3649_vm1 = vmor %vm1027_vm2, %vm1035_vm12  ;;  %vm1169_vm2 = vcmp.eq.s32.totalorder %v3430_v50, %v3635_v13  ;;  %vm1043_vm12 = vcmp.eq.s32.totalorder %v3520_v12, %v3584_v15  ;;  %v836_v0 = vsel %vm3643_vm3, %v3668_v41, 0.0 }
 0x116   : > { %vm3655_vm8 = vmor %vm853_vm7, %vm861_vm0  ;;  %vm995_vm7 = vcmp.eq.s32.totalorder %v3487_v10, %v3584_v15  ;;  %vm1177_vm0 = vcmp.eq.s32.totalorder %v3420_v45, %v3635_v13  ;;  %v844_v55 = vadd.f32 %v836_v0, %v702_v11  ;;  %v3741_v11 = vadd.s32 896, %v3458_v3 }
 0x117   : > { %vm941_vm4 = vmor %vm901_vm9, %vm909_vm6  ;;  %v9334_v0 = vmov 0 }
 0x118   : > { %vm949_vm11 = vmor %vm3655_vm8, %vm3579_vm13  ;;  %vm1003_vm8 = vcmp.eq.s32.totalorder %v3358_v17, %v3584_v15 }
 0x119   : > { %vm957_vm9 = vmor %vm9323_vm14, %vm941_vm4 }
 0x11a   : > { %vm3682_vm6 = vmor %vm1153_vm5, %vm1161_vm10  ;;  %vm326_vm10 = vcmp.eq.s32.totalorder %v3402_v36, %v3458_v3 }
 0x11b   : > { %vm3689_vm13 = vmor %vm949_vm11, %vm957_vm9  ;;  %vm1051_vm11 = vcmp.eq.s32.totalorder %v3448_v59, %v3584_v15  ;;  %vm1303_vm9 = vcmp.eq.s32.totalorder %v3392_v31, %v3687_v62 }
 0x11c   : > { %vm3695_vm4 = vmor %vm1169_vm2, %vm1177_vm0  ;;  %vm1295_vm2 = vcmp.eq.s32.totalorder %v3394_v32, %v3687_v62  ;;  %vm588_vm0 = vcmp.eq.s32.totalorder %v3402_v36, %v3465_v6  ;;  %v978_v30 = vsel %vm3689_vm13, %v3719_v4, 0.0  ;;  %vm9343_vm13 = vcmp.eq.s32.totalorder %v3361_v18, %v3458_v3 }
 0x11d   : > { %vm3708_vm14 = vmor %vm995_vm7, %vm1003_vm8  ;;  %vm1311_vm7 = vcmp.eq.s32.totalorder %v3430_v50, %v3687_v62  ;;  %vm358_vm8 = vcmp.eq.s32.totalorder %v3396_v33, %v3458_v3  ;;  %v986_v46 = vadd.f32 %v978_v30, %v844_v55  ;;  %v9349_v55 = vmov 0 }
 0x11e   : > { %vm3724_vm3 = vmor %vm1043_vm12, %vm1051_vm11 }
 0x11f   : > { %vm1091_vm5 = vmor %vm3708_vm14, %vm3630_vm15  ;;  %vm1145_vm14 = vcmp.eq.s32.totalorder %v3358_v17, %v3635_v13 }
 0x120   : > { %vm3746_vm11 = vmor %vm326_vm10, %vm358_vm8  ;;  %vm1319_vm10 = vcmp.eq.s32.totalorder %v3420_v45, %v3687_v62 }
 0x121   : > { %v9335_v0 = vsel %vm3746_vm11, 4294967295, %v9334_v0  ;;  %vm1099_vm15 = vmor %vm3649_vm1, %vm3724_vm3  ;;  %vm9351_vm11 = vcmp.eq.s32.totalorder %v3520_v12, %v3635_v13 }
 0x122   : > { %vm3768_vm8 = vmor %vm1295_vm2, %vm1303_vm9  ;;  %vm9342_vm9 = vcmp.eq.s32.totalorder %v3364_v19, %v3458_v3 }
 0x123   : > { %vm3777_vm3 = vmor %vm1091_vm5, %vm1099_vm15  ;;  %vm580_vm15 = vcmp.eq.s32.totalorder %v3364_v19, %v3465_v6 }
 0x124   : > { %vm3784_vm12 = vmor %vm1311_vm7, %vm1319_vm10  ;;  %vm596_vm7 = vcmp.eq.s32.totalorder %v3396_v33, %v3465_v6  ;;  %vm1193_vm10 = vcmp.eq.s32.totalorder %v3448_v59, %v3635_v13  ;;  %v1120_v44 = vsel %vm3777_vm3, %v3807_v28, 0.0  ;;  %vm9362_vm3 = vcmp.eq.s32.totalorder %v3402_v36, %v3500_v14 }
 0x125   : > { %vm3796_vm5 = vmor %vm9343_vm13, %vm9342_vm9  ;;  %vm9346_vm9 = vcmp.eq.s32.totalorder %v3487_v10, %v3635_v13 }
 0x126   : > { %v9345_v8 = vsel %vm3796_vm5, 4294967295, %v9344_v8  ;;  %vm3817_vm13 = vmor %vm9346_vm9, %vm1145_vm14  ;;  %vm9354_vm5 = vcmp.eq.s32.totalorder %v3361_v18, %v3465_v6  ;;  %vm738_vm9 = vcmp.eq.s32.totalorder %v3396_v33, %v3500_v14 }
 0x127   : > { %vm3826_vm1 = vmor %vm588_vm0, %vm596_vm7  ;;  %vm9359_vm7 = vcmp.eq.s32.totalorder %v3394_v32, %v3741_v11  ;;  %v3904_v32 = vld [vmem:[%s9103_s2 + $0x5] ss:$0 sm:$0xff] }
 0x128   : > { %v9350_v55 = vsel %vm3826_vm1, 4294967295, %v9349_v55  ;;  %vm3835_vm14 = vmor %vm9351_vm11, %vm1193_vm10  ;;  %vm1461_vm11 = vcmp.eq.s32.totalorder %v3420_v45, %v3741_v11  ;;  %vm9358_vm10 = vcmp.eq.s32.totalorder %v3392_v31, %v3741_v11  ;;  %v1128_v45 = vadd.f32 %v1120_v44, %v986_v46 }
 0x129   : > { %vm3850_vm2 = vmor %vm9354_vm5, %vm580_vm15  ;;  %v9369_v44 = vmov 0  ;;  %v9407_v46 = vmov 0 }
 0x12a   : > { %v9356_v34 = vsel %vm3850_vm2, 4294967295, %v9355_v34  ;;  %vm1241_vm5 = vmor %vm3695_vm4, %vm3835_vm14  ;;  %vm9374_vm14 = vcmp.eq.s32.totalorder %v3364_v19, %v3500_v14 }
 0x12b   : > { %vm3879_vm0 = vmor %vm9359_vm7, %vm9358_vm10  ;;  %vm9368_vm10 = vcmp.eq.s32.totalorder %v3430_v50, %v3741_v11  ;;  %v9376_v50 = vmov 0 }
 0x12c   : > { %v9361_v7 = vsel %vm3879_vm0, 4294967295, %v9360_v7  ;;  %vm3886_vm4 = vmor %vm9362_vm3, %vm738_vm9  ;;  %vm1287_vm9 = vcmp.eq.s32.totalorder %v3358_v17, %v3687_v62 }
 0x12d   : > { %v9364_v1 = vsel %vm3886_vm4, 4294967295, %v9363_v1  ;;  %vm9365_vm15 = vmor %vm3817_vm13, %vm3682_vm6  ;;  %vm390_vm6 = vcmp.eq.s32.totalorder %v3438_v54, %v3458_v3  ;;  %vm1335_vm13 = vcmp.eq.s32.totalorder %v3448_v59, %v3687_v62 }
 0x12e   : > { %vm3897_vm7 = vmor %vm9365_vm15, %vm1241_vm5  ;;  %vm9371_vm5 = vcmp.eq.s32.totalorder %v3487_v10, %v3687_v62 }
 0x12f   : > { %vm3911_vm3 = vmor %vm9368_vm10, %vm1461_vm11  ;;  %vm9375_vm11 = vcmp.eq.s32.totalorder %v3361_v18, %v3500_v14  ;;  %v1262_v30 = vsel %vm3897_vm7, %v3904_v32, 0.0 }
 0x130   : > { %v9370_v44 = vsel %vm3911_vm3, 4294967295, %v9369_v44  ;;  %vm3922_vm15 = vmor %vm9371_vm5, %vm1287_vm9  ;;  %vm880_vm9 = vcmp.eq.s32.totalorder %v3396_v33, %v3547_v9  ;;  %vm9378_vm5 = vcmp.eq.s32.totalorder %v3520_v12, %v3687_v62  ;;  %vm1014_vm3 = vcmp.eq.s32.totalorder %v3402_v36, %v3584_v15 }
 0x131   : > { %vm3932_vm10 = vmor %vm9375_vm11, %vm9374_vm14  ;;  %vm422_vm14 = vcmp.eq.s32.totalorder %v3424_v47, %v3458_v3  ;;  %vm9381_vm11 = vcmp.eq.s32.totalorder %v3402_v36, %v3547_v9  ;;  %v1270_v31 = vadd.f32 %v1262_v30, %v1128_v45  ;;  %v4006_v45 = vpop.permute.xlu1 %437  ;;  %v9400_v30 = vmov 0 }
 0x132   : > { %v9377_v50 = vsel %vm3932_vm10, 4294967295, %v9376_v50  ;;  %vm3945_vm0 = vmor %vm9378_vm5, %vm1335_vm13 }
 0x133   : > { %vm3954_vm4 = vmor %vm9381_vm11, %vm880_vm9  ;;  %vm9388_vm11 = vcmp.eq.s32.totalorder %v3364_v19, %v3547_v9  ;;  %vm9389_vm9 = vcmp.eq.s32.totalorder %v3361_v18, %v3547_v9  ;;  %vm9418_vm2 = vnez %v9377_v50  ;;  %v9467_v50 = vmov 0 }
 0x134   : > { %v9383_v43 = vsel %vm3954_vm4, 4294967295, %v9382_v43  ;;  %vm1375_vm13 = vmor %vm3922_vm15, %vm3768_vm8  ;;  %vm9387_vm15 = vnez %v9345_v8  ;;  %vm1022_vm8 = vcmp.eq.s32.totalorder %v3396_v33, %v3584_v15  ;;  %vm9399_vm4 = vcmp.eq.s32.totalorder %v3438_v54, %v3465_v6 }
 0x135   : > { %vm3969_vm10 = vmor %vm390_vm6, %vm422_vm14  ;;  %vm9386_vm6 = vnez %v9335_v0  ;;  %vm1429_vm14 = vcmp.eq.s32.totalorder %v3358_v17, %v3741_v11  ;;  %v9440_v0 = vmov 0  ;;  %v9444_v8 = vmov 0 }
 0x136   : > { %vm1383_vm7 = vmor %vm3784_vm12, %vm3945_vm0 }
 0x137   : > { %vm3998_vm12 = vmor %vm9389_vm9, %vm9388_vm11  ;;  %vm612_vm9 = vcmp.eq.s32.totalorder %v3424_v47, %v3465_v6 }
 0x138   : > { %v9391_v48 = vsel %vm3998_vm12, 4294967295, %v9390_v48  ;;  %vm4008_vm5 = vmor %vm1375_vm13, %vm1383_vm7  ;;  %vm1477_vm13 = vcmp.eq.s32.totalorder %v3448_v59, %v3741_v11  ;;  %vm9396_vm7 = vcmp.eq.s32.totalorder %v3487_v10, %v3741_v11 }
 0x139   : > { %vm4019_vm11 = vmor %vm1014_vm3, %vm1022_vm8  ;;  %v1404_v59 = vsel %vm4008_vm5, %v3984_v27, 0.0  ;;  %vm9406_vm8 = vcmp.eq.s32.totalorder %v3361_v18, %v3584_v15  ;;  %vm9410_vm5 = vcmp.eq.s32.totalorder %v3402_v36, %v3635_v13 }
 0x13a   : > { %v9395_v52 = vsel %vm4019_vm11, 4294967295, %v9394_v52  ;;  %vm4030_vm12 = vmor %vm9396_vm7, %vm1429_vm14  ;;  %vm9402_vm14 = vcmp.eq.s32.totalorder %v3520_v12, %v3741_v11  ;;  %v1412_v12 = vadd.f32 %v1404_v59, %v1270_v31  ;;  %v9411_v31 = vmov 0 }
 0x13b   : > { %vm4037_vm3 = vmor %vm9399_vm4, %vm612_vm9  ;;  %vm9405_vm9 = vcmp.eq.s32.totalorder %v3364_v19, %v3584_v15  ;;  %vm9409_vm4 = vnez %v9361_v7  ;;  %v9425_v59 = vmov 0 }
 0x13c   : > { %v9401_v30 = vsel %vm4037_vm3, 4294967295, %v9400_v30  ;;  %vm4049_vm7 = vmor %vm9402_vm14, %vm1477_vm13  ;;  %vm1164_vm14 = vcmp.eq.s32.totalorder %v3396_v33, %v3635_v13  ;;  %vm9423_vm3 = vcmp.eq.s32.totalorder %v4006_v45, %v3458_v3 }
 0x13d   : > { %vm4063_vm0 = vmor %vm9406_vm8, %vm9405_vm9  ;;  %vm754_vm9 = vcmp.eq.s32.totalorder %v3424_v47, %v3500_v14  ;;  %vm9414_vm8 = vcmp.eq.s32.totalorder %v3438_v54, %v3500_v14 }
 0x13e   : > { %v9408_v46 = vsel %vm4063_vm0, 4294967295, %v9407_v46  ;;  %vm1517_vm11 = vmor %vm4030_vm12, %vm9409_vm4  ;;  %vm9413_vm4 = vnez %v9370_v44  ;;  %vm9417_vm12 = vnez %v9364_v1  ;;  %v9421_v44 = vmov 0 }
 0x13f   : > { %vm4089_vm13 = vmor %vm9410_vm5, %vm1164_vm14 }
 0x140   : > { %v9412_v31 = vsel %vm4089_vm13, 4294967295, %v9411_v31  ;;  %vm1525_vm0 = vmor %vm9413_vm4, %vm4049_vm7  ;;  %vm486_vm13 = vcmp.eq.s32.totalorder %v3452_v61, %v3458_v3  ;;  %vm9419_vm7 = vcmp.eq.s32.totalorder %v3364_v19, %v3635_v13  ;;  %vm1306_vm4 = vcmp.eq.s32.totalorder %v3396_v33, %v3687_v62 }
 0x141   : > { %vm4102_vm1 = vmor %vm9414_vm8, %vm754_vm9  ;;  %vm9420_vm8 = vcmp.eq.s32.totalorder %v3361_v18, %v3635_v13 }
 0x142   : > { %vm1533_vm14 = vmor %vm1517_vm11, %vm1525_vm0  ;;  %vm1290_vm11 = vcmp.eq.s32.totalorder %v3364_v19, %v3687_v62  ;;  %vm9424_vm0 = vcmp.eq.s32.totalorder %v3402_v36, %v3687_v62 }
 0x143   : > { %vm4120_vm9 = vmor %vm9420_vm8, %vm9419_vm7  ;;  %v1546_v17 = vsel %vm1533_vm14, %v4080_v16, 0.0  ;;  %vm896_vm8 = vcmp.eq.s32.totalorder %v3424_v47, %v3547_v9 }
 0x144   : > { %v9422_v44 = vsel %vm4120_vm9, 4294967295, %v9421_v44  ;;  %vm518_vm5 = vmor %vm9423_vm3, %vm486_vm13  ;;  %v1554_v10 = vadd.f32 %v1546_v17, %v1412_v12  ;;  %vm9427_vm13 = vcmp.eq.s32.totalorder %v3438_v54, %v3547_v9  ;;  %v9474_v17 = vmov 0 }
 0x145   : > { %vm4141_vm9 = vmor %vm9424_vm0, %vm1306_vm4  ;;  %vm9435_vm0 = vcmp.eq.s32.totalorder %v3361_v18, %v3687_v62  ;;  %v9491_v12 = vmov 0 }
 0x146   : > { %v9426_v59 = vsel %vm4141_vm9, 4294967295, %v9425_v59  ;;  %vm534_vm3 = vmor %vm3969_vm10, %vm518_vm5  ;;  %vm628_vm10 = vcmp.eq.s32.totalorder %v3452_v61, %v3465_v6  ;;  %1562 = vadd.xlane.f32.xlu1 %v1554_v10 }
 0x147   : > { %vm4152_vm7 = vmor %vm9427_vm13, %vm896_vm8 }
 0x148   : > { %vm9430_vm4 = vmor %vm9387_vm15, %vm9386_vm6  ;;  %vm9439_vm6 = vcmp.eq.s32.totalorder %v3402_v36, %v3741_v11  ;;  %vm9447_vm15 = vnez %v9350_v55  ;;  %v9521_v55 = vmov 0 }
 0x149   : > { %vm4163_vm14 = vmor %vm9430_vm4, %vm534_vm3  ;;  %vm1448_vm3 = vcmp.eq.s32.totalorder %v3396_v33, %v3741_v11  ;;  %vm9438_vm4 = vcmp.eq.s32.totalorder %v4006_v45, %v3465_v6 }
 0x14a   : > { %vm4179_vm9 = vmor %vm9435_vm0, %vm1290_vm11  ;;  %vm1038_vm0 = vcmp.eq.s32.totalorder %v3424_v47, %v3584_v15  ;;  %v555_v33 = vsel %vm4163_vm14, %v3609_v29, 0.0  ;;  %vm9443_vm11 = vcmp.eq.s32.totalorder %v3438_v54, %v3584_v15  ;;  %vm770_vm14 = vcmp.eq.s32.totalorder %v3452_v61, %v3500_v14 }
 0x14b   : > { %v9437_v63 = vsel %vm4179_vm9, 4294967295, %v9436_v63  ;;  %vm660_vm13 = vmor %vm9438_vm4, %vm628_vm10  ;;  %vm9442_vm10 = vnez %v9401_v30  ;;  %v9471_v30 = vmov 0 }
 0x14c   : > { %vm4199_vm9 = vmor %vm9439_vm6, %vm1448_vm3  ;;  %vm9446_vm3 = vnez %v9356_v34  ;;  %vm9452_vm6 = vcmp.eq.s32.totalorder %v3361_v18, %v3741_v11  ;;  %v9453_v34 = vmov 0  ;;  %v9457_v18 = vmov 0 }
 0x14d   : > { %v9441_v0 = vsel %vm4199_vm9, 4294967295, %v9440_v0  ;;  %vm676_vm4 = vmor %vm9442_vm10, %vm660_vm13  ;;  %vm9449_vm13 = vnez %v9395_v52  ;;  %vm9450_vm10 = vnez %v9408_v46  ;;  %v9502_v52 = vmov 0 }
 0x14e   : > { %vm4213_vm5 = vmor %vm9443_vm11, %vm1038_vm0  ;;  %vm9451_vm0 = vcmp.eq.s32.totalorder %v3364_v19, %v3741_v11 }
 0x14f   : > { %v9445_v8 = vsel %vm4213_vm5, 4294967295, %v9444_v8  ;;  %vm9448_vm9 = vmor %vm9446_vm3, %vm9447_vm15  ;;  %vm9455_vm3 = vcmp.eq.s32.totalorder %v4006_v45, %v3500_v14  ;;  %vm912_vm15 = vcmp.eq.s32.totalorder %v3452_v61, %v3547_v9 }
 0x150   : > { %vm684_vm8 = vmor %vm9448_vm9, %vm676_vm4  ;;  %vm360_vm4 = vcmp.eq.s32.totalorder %v3400_v35, %v3458_v3  ;;  %vm9456_vm9 = vcmp.eq.s32.totalorder %v3406_v38, %v3458_v3 }
 0x151   : > { %vm4236_vm5 = vmor %vm9452_vm6, %vm9451_vm0  ;;  %v697_v36 = vsel %vm684_vm8, %v3614_v57, 0.0  ;;  %vm1180_vm0 = vcmp.eq.s32.totalorder %v3424_v47, %v3635_v13 }
 0x152   : > { %v9454_v34 = vsel %vm4236_vm5, 4294967295, %v9453_v34  ;;  %vm802_vm11 = vmor %vm9455_vm3, %vm770_vm14  ;;  %v705_v19 = vadd.f32 %v697_v36, %v555_v33  ;;  %vm9459_vm3 = vcmp.eq.s32.totalorder %v3438_v54, %v3635_v13  ;;  %v9505_v33 = vmov 0 }
 0x153   : > { %vm4257_vm5 = vmor %vm9456_vm9, %vm360_vm4  ;;  %vm9466_vm9 = vcmp.eq.s32.totalorder %v3366_v20, %v3458_v3  ;;  %v9517_v36 = vmov 0 }
 0x154   : > { %v9458_v18 = vsel %vm4257_vm5, 4294967295, %v9457_v18  ;;  %vm818_vm14 = vmor %vm4102_vm1, %vm802_vm11  ;;  %vm9464_vm11 = vnez %v9422_v44  ;;  %vm1054_vm1 = vcmp.eq.s32.totalorder %v3452_v61, %v3584_v15  ;;  %v9513_v44 = vmov 0 }
 0x155   : > { %vm4268_vm6 = vmor %vm9459_vm3, %vm1180_vm0  ;;  %vm9465_vm3 = vcmp.eq.s32.totalorder %v3369_v21, %v3458_v3 }
 0x156   : > { %vm9462_vm4 = vmor %vm9418_vm2, %vm9417_vm12  ;;  %vm9470_vm2 = vcmp.eq.s32.totalorder %v3406_v38, %v3465_v6  ;;  %vm9477_vm12 = vnez %v9383_v43 }
 0x157   : > { %vm826_vm8 = vmor %vm9462_vm4, %vm818_vm14  ;;  %vm598_vm14 = vcmp.eq.s32.totalorder %v3400_v35, %v3465_v6  ;;  %vm9469_vm4 = vcmp.eq.s32.totalorder %v4006_v45, %v3547_v9 }
 0x158   : > { %vm4291_vm5 = vmor %vm9466_vm9, %vm9465_vm3  ;;  %v839_v1 = vsel %vm826_vm8, %v3668_v41, 0.0  ;;  %vm1322_vm3 = vcmp.eq.s32.totalorder %v3424_v47, %v3687_v62 }
 0x159   : > { %v9468_v50 = vsel %vm4291_vm5, 4294967295, %v9467_v50  ;;  %vm944_vm0 = vmor %vm9469_vm4, %vm912_vm15  ;;  %v847_v7 = vadd.f32 %v839_v1, %v705_v19  ;;  %vm9473_vm4 = vcmp.eq.s32.totalorder %v3438_v54, %v3687_v62 }
 0x15a   : > { %vm4312_vm5 = vmor %vm9470_vm2, %vm598_vm14  ;;  %vm9476_vm14 = vnez %v9391_v48  ;;  %vm9482_vm2 = vcmp.eq.s32.totalorder %v3366_v20, %v3465_v6  ;;  %v9487_v48 = vmov 0 }
 0x15b   : > { %v9472_v30 = vsel %vm4312_vm5, 4294967295, %v9471_v30  ;;  %vm960_vm15 = vmor %vm4152_vm7, %vm944_vm0  ;;  %vm9479_vm7 = vnez %v9426_v59  ;;  %vm9480_vm0 = vnez %v9437_v63  ;;  %v9528_v63 = vmov 0 }
 0x15c   : > { %vm4323_vm9 = vmor %vm9473_vm4, %vm1322_vm3  ;;  %vm9481_vm4 = vcmp.eq.s32.totalorder %v3369_v21, %v3465_v6  ;;  %v9532_v59 = vmov 0 }
 0x15d   : > { %v9475_v17 = vsel %vm4323_vm9, 4294967295, %v9474_v17  ;;  %vm9478_vm5 = vmor %vm9476_vm14, %vm9477_vm12  ;;  %vm9485_vm14 = vcmp.eq.s32.totalorder %v4006_v45, %v3584_v15  ;;  %vm9489_vm12 = vnez %v9445_v8 }
 0x15e   : > { %vm968_vm8 = vmor %vm9478_vm5, %vm960_vm15  ;;  %vm740_vm15 = vcmp.eq.s32.totalorder %v3400_v35, %v3500_v14  ;;  %vm9486_vm5 = vcmp.eq.s32.totalorder %v3406_v38, %v3500_v14 }
 0x15f   : > { %vm4346_vm9 = vmor %vm9482_vm2, %vm9481_vm4  ;;  %v981_v43 = vsel %vm968_vm8, %v3719_v4, 0.0  ;;  %vm1464_vm4 = vcmp.eq.s32.totalorder %v3424_v47, %v3741_v11  ;;  %v9498_v47 = vmov 0 }
 0x160   : > { %v9484_v26 = vsel %vm4346_vm9, 4294967295, %v9483_v26  ;;  %vm1086_vm3 = vmor %vm9485_vm14, %vm1054_vm1  ;;  %v989_v10 = vadd.f32 %v981_v43, %v847_v7  ;;  %vm9490_vm14 = vcmp.eq.s32.totalorder %v3438_v54, %v3741_v11  ;;  %v9547_v7 = vmov 0 }
 0x161   : > { %vm4367_vm9 = vmor %vm9486_vm5, %vm740_vm15  ;;  %vm9497_vm5 = vcmp.eq.s32.totalorder %v3366_v20, %v3500_v14  ;;  %v9551_v43 = vmov 0 }
 0x162   : > { %v9488_v48 = vsel %vm4367_vm9, 4294967295, %v9487_v48  ;;  %vm1102_vm1 = vmor %vm9489_vm12, %vm1086_vm3  ;;  %vm1196_vm9 = vcmp.eq.s32.totalorder %v3452_v61, %v3635_v13  ;;  %vm9494_vm3 = vnez %v9441_v0  ;;  %vm9495_vm12 = vnez %v9454_v34 }
 0x163   : > { %vm4378_vm2 = vmor %vm9490_vm14, %vm1464_vm4  ;;  %vm9496_vm14 = vcmp.eq.s32.totalorder %v3369_v21, %v3500_v14  ;;  %v9543_v34 = vmov 0 }
 0x164   : > { %v9492_v12 = vsel %vm4378_vm2, 4294967295, %v9491_v12  ;;  %vm9493_vm15 = vmor %vm9450_vm10, %vm9449_vm13  ;;  %vm9501_vm13 = vcmp.eq.s32.totalorder %v3406_v38, %v3547_v9 }
 0x165   : > { %vm1110_vm8 = vmor %vm9493_vm15, %vm1102_vm1  ;;  %vm882_vm1 = vcmp.eq.s32.totalorder %v3400_v35, %v3547_v9  ;;  %vm9500_vm15 = vcmp.eq.s32.totalorder %v4006_v45, %v3635_v13 }
 0x166   : > { %vm4401_vm2 = vmor %vm9497_vm5, %vm9496_vm14  ;;  %v1123_v54 = vsel %vm1110_vm8, %v3807_v28, 0.0  ;;  %vm424_vm14 = vcmp.eq.s32.totalorder %v3428_v49, %v3458_v3 }
 0x167   : > { %v9499_v47 = vsel %vm4401_vm2, 4294967295, %v9498_v47  ;;  %vm1228_vm4 = vmor %vm9500_vm15, %vm1196_vm9  ;;  %v1131_v46 = vadd.f32 %v1123_v54, %v989_v10  ;;  %vm9504_vm15 = vcmp.eq.s32.totalorder %v3442_v56, %v3458_v3  ;;  %v9594_v54 = vmov 0 }
 0x168   : > { %vm4422_vm2 = vmor %vm9501_vm13, %vm882_vm1  ;;  %vm9507_vm1 = vnez %v9412_v31  ;;  %vm9512_vm13 = vcmp.eq.s32.totalorder %v3366_v20, %v3547_v9  ;;  %v4466_v31 = vpop.permute.xlu1 %443 }
 0x169   : > { %v9503_v52 = vsel %vm4422_vm2, 4294967295, %v9502_v52  ;;  %vm1244_vm9 = vmor %vm4268_vm6, %vm1228_vm4  ;;  %vm1338_vm2 = vcmp.eq.s32.totalorder %v3452_v61, %v3687_v62  ;;  %vm9509_vm6 = vnez %v9458_v18  ;;  %vm9510_vm4 = vnez %v9468_v50 }
 0x16a   : > { %vm4433_vm5 = vmor %vm9504_vm15, %vm424_vm14  ;;  %vm9511_vm15 = vcmp.eq.s32.totalorder %v3369_v21, %v3547_v9  ;;  %vm614_vm14 = vcmp.eq.s32.totalorder %v3428_v49, %v3465_v6  ;;  %v9560_v18 = vmov 0  ;;  %v9564_v50 = vmov 0 }
 0x16b   : > { %v9506_v33 = vsel %vm4433_vm5, 4294967295, %v9505_v33  ;;  %vm9508_vm10 = vmor %vm9464_vm11, %vm9507_vm1  ;;  %vm9515_vm1 = vcmp.eq.s32.totalorder %v4006_v45, %v3687_v62  ;;  %vm9516_vm11 = vcmp.eq.s32.totalorder %v3406_v38, %v3584_v15 }
 0x16c   : > { %vm1252_vm8 = vmor %vm9508_vm10, %vm1244_vm9  ;;  %vm1024_vm9 = vcmp.eq.s32.totalorder %v3400_v35, %v3584_v15 }
 0x16d   : > { %vm4456_vm5 = vmor %vm9512_vm13, %vm9511_vm15  ;;  %v1265_v8 = vsel %vm1252_vm8, %v3904_v32, 0.0 }
 0x16e   : > { %v9514_v44 = vsel %vm4456_vm5, 4294967295, %v9513_v44  ;;  %vm1370_vm13 = vmor %vm9515_vm1, %vm1338_vm2  ;;  %v1273_v19 = vadd.f32 %v1265_v8, %v1131_v46  ;;  %vm9519_vm5 = vnez %v9475_v17  ;;  %vm9520_vm1 = vcmp.eq.s32.totalorder %v3442_v56, %v3465_v6 }
 0x16f   : > { %vm4479_vm10 = vmor %vm9516_vm11, %vm1024_vm9  ;;  %vm9527_vm11 = vcmp.eq.s32.totalorder %v3366_v20, %v3584_v15  ;;  %v9610_v8 = vmov 0 }
 0x170   : > { %v9518_v36 = vsel %vm4479_vm10, 4294967295, %v9517_v36  ;;  %vm1386_vm2 = vmor %vm9519_vm5, %vm1370_vm13  ;;  %vm1480_vm10 = vcmp.eq.s32.totalorder %v3452_v61, %v3741_v11  ;;  %vm9524_vm5 = vnez %v9472_v30  ;;  %vm9525_vm13 = vnez %v9484_v26 }
 0x171   : > { %vm4490_vm15 = vmor %vm9520_vm1, %vm614_vm14  ;;  %vm9526_vm1 = vcmp.eq.s32.totalorder %v3369_v21, %v3584_v15  ;;  %v9583_v26 = vmov 0 }
 0x172   : > { %v9522_v55 = vsel %vm4490_vm15, 4294967295, %v9521_v55  ;;  %vm9523_vm9 = vmor %vm9480_vm0, %vm9479_vm7  ;;  %vm9531_vm7 = vcmp.eq.s32.totalorder %v3406_v38, %v3635_v13  ;;  %vm9534_vm0 = vnez %v9492_v12 }
 0x173   : > { %vm1394_vm8 = vmor %vm9523_vm9, %vm1386_vm2  ;;  %vm1166_vm2 = vcmp.eq.s32.totalorder %v3400_v35, %v3635_v13  ;;  %vm9530_vm9 = vcmp.eq.s32.totalorder %v4006_v45, %v3741_v11  ;;  %v9536_v45 = vmov 0 }
 0x174   : > { %vm4513_vm15 = vmor %vm9527_vm11, %vm9526_vm1  ;;  %v1407_v61 = vsel %vm1394_vm8, %v3984_v27, 0.0  ;;  %vm756_vm1 = vcmp.eq.s32.totalorder %v3428_v49, %v3500_v14 }
 0x175   : > { %v9529_v63 = vsel %vm4513_vm15, 4294967295, %v9528_v63  ;;  %vm1512_vm14 = vmor %vm9530_vm9, %vm1480_vm10  ;;  %v1415_v1 = vadd.f32 %v1407_v61, %v1273_v19  ;;  %vm9535_vm9 = vcmp.eq.s32.totalorder %v3442_v56, %v3500_v14  ;;  %v4872_v61 = vpop.permute.xlu1 %449 }
 0x176   : > { %vm4534_vm15 = vmor %vm9531_vm7, %vm1166_vm2  ;;  %vm9542_vm7 = vcmp.eq.s32.totalorder %v3366_v20, %v3635_v13 }
 0x177   : > { %v9533_v59 = vsel %vm4534_vm15, 4294967295, %v9532_v59  ;;  %vm1528_vm10 = vmor %vm9534_vm0, %vm1512_vm14  ;;  %vm488_vm15 = vcmp.eq.s32.totalorder %v3456_v2, %v3458_v3  ;;  %vm9539_vm14 = vnez %v9488_v48  ;;  %vm9540_vm0 = vnez %v9499_v47 }
 0x178   : > { %vm4545_vm11 = vmor %vm9535_vm9, %vm756_vm1  ;;  %vm9541_vm9 = vcmp.eq.s32.totalorder %v3369_v21, %v3635_v13  ;;  %v9590_v47 = vmov 0 }
 0x179   : > { %v9537_v45 = vsel %vm4545_vm11, 4294967295, %v9536_v45  ;;  %vm9538_vm2 = vmor %vm9495_vm12, %vm9494_vm3  ;;  %vm9546_vm3 = vcmp.eq.s32.totalorder %v3406_v38, %v3687_v62  ;;  %vm9549_vm12 = vnez %v9506_v33  ;;  %v9598_v33 = vmov 0 }
 0x17a   : > { %vm1536_vm8 = vmor %vm9538_vm2, %vm1528_vm10  ;;  %vm1308_vm10 = vcmp.eq.s32.totalorder %v3400_v35, %v3687_v62  ;;  %vm9545_vm2 = vcmp.eq.s32.totalorder %v4466_v31, %v3458_v3 }
 0x17b   : > { %vm4568_vm11 = vmor %vm9542_vm7, %vm9541_vm9  ;;  %v1549_v0 = vsel %vm1536_vm8, %v4080_v16, 0.0  ;;  %vm898_vm9 = vcmp.eq.s32.totalorder %v3428_v49, %v3547_v9 }
 0x17c   : > { %v9544_v34 = vsel %vm4568_vm11, 4294967295, %v9543_v34  ;;  %vm520_vm1 = vmor %vm9545_vm2, %vm488_vm15  ;;  %v1557_v17 = vadd.f32 %v1549_v0, %v1415_v1  ;;  %vm9550_vm2 = vcmp.eq.s32.totalorder %v3442_v56, %v3547_v9 }
 0x17d   : > { %vm4589_vm11 = vmor %vm9546_vm3, %vm1308_vm10  ;;  %vm9558_vm3 = vcmp.eq.s32.totalorder %v3369_v21, %v3687_v62 }
 0x17e   : > { %v9548_v7 = vsel %vm4589_vm11, 4294967295, %v9547_v7  ;;  %vm536_vm15 = vmor %vm9549_vm12, %vm520_vm1  ;;  %vm630_vm1 = vcmp.eq.s32.totalorder %v3456_v2, %v3465_v6  ;;  %vm9559_vm11 = vcmp.eq.s32.totalorder %v3366_v20, %v3687_v62  ;;  %1568 = vadd.xlane.f32.xlu1 %v1557_v17 }
 0x17f   : > { %vm4600_vm7 = vmor %vm9550_vm2, %vm898_vm9  ;;  %vm9557_vm9 = vnez %v9514_v44  ;;  %v9606_v44 = vmov 0 }
 0x180   : > { %v9552_v43 = vsel %vm4600_vm7, 4294967295, %v9551_v43  ;;  %vm9553_vm10 = vmor %vm9510_vm4, %vm9509_vm6  ;;  %vm9563_vm6 = vcmp.eq.s32.totalorder %v3406_v38, %v3741_v11  ;;  %v9575_v38 = vmov 0 }
 0x181   : > { %vm4611_vm8 = vmor %vm9553_vm10, %vm536_vm15  ;;  %vm1450_vm15 = vcmp.eq.s32.totalorder %v3400_v35, %v3741_v11  ;;  %vm9562_vm10 = vcmp.eq.s32.totalorder %v4466_v31, %v3465_v6 }
 0x182   : > { %vm4627_vm7 = vmor %vm9559_vm11, %vm9558_vm3  ;;  %vm1040_vm3 = vcmp.eq.s32.totalorder %v3428_v49, %v3584_v15  ;;  %v557_v35 = vsel %vm4611_vm8, %v3609_v29, 0.0  ;;  %vm9567_vm11 = vcmp.eq.s32.totalorder %v3442_v56, %v3584_v15  ;;  %vm772_vm8 = vcmp.eq.s32.totalorder %v3456_v2, %v3500_v14 }
 0x183   : > { %v9561_v18 = vsel %vm4627_vm7, 4294967295, %v9560_v18  ;;  %vm662_vm2 = vmor %vm9562_vm10, %vm630_vm1  ;;  %vm9566_vm1 = vnez %v9522_v55  ;;  %v9613_v55 = vmov 0 }
 0x184   : > { %vm4647_vm7 = vmor %vm9563_vm6, %vm1450_vm15  ;;  %vm9574_vm6 = vcmp.eq.s32.totalorder %v3366_v20, %v3741_v11  ;;  %v9579_v20 = vmov 0 }
 0x185   : > { %v9565_v50 = vsel %vm4647_vm7, 4294967295, %v9564_v50  ;;  %vm678_vm10 = vmor %vm9566_vm1, %vm662_vm2  ;;  %vm9571_vm2 = vnez %v9518_v36  ;;  %vm9572_vm1 = vnez %v9529_v63  ;;  %v9622_v63 = vmov 0 }
 0x186   : > { %vm4661_vm12 = vmor %vm9567_vm11, %vm1040_vm3  ;;  %vm9573_vm3 = vcmp.eq.s32.totalorder %v3369_v21, %v3741_v11 }
 0x187   : > { %vm9570_vm15 = vmor %vm9525_vm13, %vm9524_vm5  ;;  %vm9578_vm5 = vcmp.eq.s32.totalorder %v3410_v40, %v3458_v3  ;;  %vm9581_vm13 = vnez %v9537_v45  ;;  %v9629_v45 = vmov 0 }
 0x188   : > { %vm686_vm4 = vmor %vm9570_vm15, %vm678_vm10  ;;  %vm362_vm10 = vcmp.eq.s32.totalorder %v3404_v37, %v3458_v3  ;;  %vm9577_vm15 = vcmp.eq.s32.totalorder %v4466_v31, %v3500_v14 }
 0x189   : > { %vm4684_vm7 = vmor %vm9574_vm6, %vm9573_vm3  ;;  %v699_v30 = vsel %vm686_vm4, %v3614_v57, 0.0  ;;  %vm1182_vm3 = vcmp.eq.s32.totalorder %v3428_v49, %v3635_v13 }
 0x18a   : > { %v9576_v38 = vsel %vm4684_vm7, 4294967295, %v9575_v38  ;;  %vm804_vm11 = vmor %vm9577_vm15, %vm772_vm8  ;;  %v707_v21 = vadd.f32 %v699_v30, %v557_v35  ;;  %vm9582_vm15 = vcmp.eq.s32.totalorder %v3442_v56, %v3635_v13 }
 0x18b   : > { %vm4705_vm7 = vmor %vm9578_vm5, %vm362_vm10  ;;  %vm9589_vm5 = vcmp.eq.s32.totalorder %v3371_v22, %v3458_v3 }
 0x18c   : > { %v9580_v20 = vsel %vm4705_vm7, 4294967295, %v9579_v20  ;;  %vm820_vm8 = vmor %vm9581_vm13, %vm804_vm11  ;;  %vm914_vm7 = vcmp.eq.s32.totalorder %v3456_v2, %v3547_v9  ;;  %vm9587_vm13 = vnez %v9544_v34  ;;  %vm1056_vm11 = vcmp.eq.s32.totalorder %v3456_v2, %v3584_v15 }
 0x18d   : > { %vm4716_vm6 = vmor %vm9582_vm15, %vm1182_vm3  ;;  %vm9588_vm15 = vcmp.eq.s32.totalorder %v3374_v23, %v3458_v3 }
 0x18e   : > { %v9584_v26 = vsel %vm4716_vm6, 4294967295, %v9583_v26  ;;  %vm9585_vm10 = vmor %vm9540_vm0, %vm9539_vm14  ;;  %vm9593_vm14 = vcmp.eq.s32.totalorder %v3410_v40, %v3465_v6  ;;  %vm9596_vm0 = vnez %v9552_v43 }
 0x18f   : > { %vm828_vm4 = vmor %vm9585_vm10, %vm820_vm8  ;;  %vm600_vm8 = vcmp.eq.s32.totalorder %v3404_v37, %v3465_v6  ;;  %vm9592_vm10 = vcmp.eq.s32.totalorder %v4466_v31, %v3547_v9 }
 0x190   : > { %vm4739_vm6 = vmor %vm9589_vm5, %vm9588_vm15  ;;  %v841_v48 = vsel %vm828_vm4, %v3668_v41, 0.0  ;;  %vm1324_vm15 = vcmp.eq.s32.totalorder %v3428_v49, %v3687_v62 }
 0x191   : > { %v9591_v47 = vsel %vm4739_vm6, 4294967295, %v9590_v47  ;;  %vm946_vm3 = vmor %vm9592_vm10, %vm914_vm7  ;;  %v849_v46 = vadd.f32 %v841_v48, %v707_v21  ;;  %vm9597_vm10 = vcmp.eq.s32.totalorder %v3442_v56, %v3687_v62 }
 0x192   : > { %vm4760_vm6 = vmor %vm9593_vm14, %vm600_vm8  ;;  %vm9600_vm8 = vnez %v9503_v52  ;;  %vm9605_vm14 = vcmp.eq.s32.totalorder %v3371_v22, %v3465_v6 }
 0x193   : > { %v9595_v54 = vsel %vm4760_vm6, 4294967295, %v9594_v54  ;;  %vm962_vm7 = vmor %vm9596_vm0, %vm946_vm3  ;;  %vm394_vm3 = vcmp.eq.s32.totalorder %v3446_v58, %v3458_v3 }
 0x194   : > { %vm4771_vm5 = vmor %vm9597_vm10, %vm1324_vm15  ;;  %vm9604_vm10 = vcmp.eq.s32.totalorder %v3374_v23, %v3465_v6 }
 0x195   : > { %v9599_v33 = vsel %vm4771_vm5, 4294967295, %v9598_v33  ;;  %vm9601_vm6 = vmor %vm9557_vm9, %vm9600_vm8  ;;  %vm9608_vm8 = vcmp.eq.s32.totalorder %v4466_v31, %v3584_v15  ;;  %vm9609_vm9 = vcmp.eq.s32.totalorder %v3410_v40, %v3500_v14 }
 0x196   : > { %vm970_vm4 = vmor %vm9601_vm6, %vm962_vm7  ;;  %vm726_vm6 = vcmp.eq.s32.totalorder %v3374_v23, %v3500_v14  ;;  %vm742_vm7 = vcmp.eq.s32.totalorder %v3404_v37, %v3500_v14 }
 0x197   : > { %vm4794_vm5 = vmor %vm9605_vm14, %vm9604_vm10  ;;  %v983_v52 = vsel %vm970_vm4, %v3719_v4, 0.0  ;;  %vm1190_vm14 = vcmp.eq.s32.totalorder %v4466_v31, %v3635_v13  ;;  %vm1466_vm10 = vcmp.eq.s32.totalorder %v3428_v49, %v3741_v11  ;;  %v9619_v49 = vmov 0 }
 0x198   : > { %v9607_v44 = vsel %vm4794_vm5, 4294967295, %v9606_v44  ;;  %vm1088_vm15 = vmor %vm9608_vm8, %vm1056_vm11  ;;  %v991_v19 = vadd.f32 %v983_v52, %v849_v46  ;;  %vm9612_vm11 = vcmp.eq.s32.totalorder %v3442_v56, %v3741_v11  ;;  %v9679_v46 = vmov 0 }
 0x199   : > { %vm4815_vm5 = vmor %vm9609_vm9, %vm742_vm7 }
 0x19a   : > { %v9611_v8 = vsel %vm4815_vm5, 4294967295, %v9610_v8  ;;  %vm1104_vm4 = vmor %vm4661_vm12, %vm1088_vm15  ;;  %vm1198_vm5 = vcmp.eq.s32.totalorder %v3456_v2, %v3635_v13  ;;  %vm9616_vm12 = vnez %v9565_v50  ;;  %vm9617_vm15 = vnez %v9576_v38  ;;  %v9776_v38 = vld [vmem:[#allocation16_spill] sm:$0xff] }
 0x19b   : > { %vm4824_vm8 = vmor %vm9612_vm11, %vm1466_vm10  ;;  %vm9618_vm11 = vcmp.eq.s32.totalorder %v3371_v22, %v3500_v14 }
 0x19c   : > { %v9614_v55 = vsel %vm4824_vm8, 4294967295, %v9613_v55  ;;  %vm9615_vm9 = vmor %vm9572_vm1, %vm9571_vm2  ;;  %vm1332_vm2 = vcmp.eq.s32.totalorder %v4466_v31, %v3687_v62  ;;  %vm426_vm1 = vcmp.eq.s32.totalorder %v3432_v51, %v3458_v3 }
 0x19d   : > { %vm1112_vm7 = vmor %vm9615_vm9, %vm1104_vm4  ;;  %vm9621_vm4 = vnez %v9584_v26  ;;  %v9731_v26 = vmov 0 }
 0x19e   : > { %vm4844_vm8 = vmor %vm9618_vm11, %vm726_vm6  ;;  %v1125_v56 = vsel %vm1112_vm7, %v3807_v28, 0.0  ;;  %vm608_vm6 = vcmp.eq.s32.totalorder %v3446_v58, %v3465_v6  ;;  %vm1340_vm11 = vcmp.eq.s32.totalorder %v3456_v2, %v3687_v62 }
 0x19f   : > { %v9620_v49 = vsel %vm4844_vm8, 4294967295, %v9619_v49  ;;  %vm1230_vm0 = vmor %vm1190_vm14, %vm1198_vm5  ;;  %v1133_v36 = vadd.f32 %v1125_v56, %v991_v19  ;;  %vm9624_vm5 = vnez %v9533_v59  ;;  %v5243_v56 = vld [vmem:[%s9103_s2] ss:$0 sm:$0xff]  ;;  %v9795_v19 = vmov 1  }
 0x1a0   : > { %vm1246_vm9 = vmor %vm9621_vm4, %vm1230_vm0  ;;  %vm1474_vm4 = vcmp.eq.s32.totalorder %v4466_v31, %v3741_v11  ;;  %vm1482_vm0 = vcmp.eq.s32.totalorder %v3456_v2, %v3741_v11 }
 0x1a1   : > { %vm4855_vm10 = vmor %vm394_vm3, %vm426_vm1  ;;  %vm750_vm3 = vcmp.eq.s32.totalorder %v3446_v58, %v3500_v14 }
 0x1a2   : > { %v9623_v63 = vsel %vm4855_vm10, 4294967295, %v9622_v63  ;;  %vm9625_vm14 = vmor %vm9587_vm13, %vm9624_vm5  ;;  %vm616_vm13 = vcmp.eq.s32.totalorder %v3432_v51, %v3465_v6 }
 0x1a3   : > { %vm1254_vm7 = vmor %vm9625_vm14, %vm1246_vm9  ;;  %vm9628_vm9 = vnez %v9599_v33  ;;  %v9681_v33 = vmov 0 }
 0x1a4   : > { %v1267_v1 = vsel %vm1254_vm7, %v3904_v32, 0.0  ;;  %vm1372_vm1 = vmor %vm1332_vm2, %vm1340_vm11  ;;  %vm9631_vm7 = vnez %v9561_v18  ;;  %vm9632_vm2 = vnez %v9548_v7 }
 0x1a5   : > { %v1275_v59 = vadd.f32 %v1267_v1, %v1133_v36  ;;  %vm1388_vm5 = vmor %vm9628_vm9, %vm1372_vm1  ;;  %vm9635_vm1 = vnez %v9607_v44  ;;  %vm458_vm9 = vcmp.eq.s32.totalorder %v4872_v61, %v3458_v3  ;;  %v9839_v44 = vld [vmem:[#allocation17_spill] sm:$0xff] }
 0x1a6   : > { %vm4881_vm14 = vmor %vm608_vm6, %vm616_vm13 }
 0x1a7   : > { %v9630_v45 = vsel %vm4881_vm14, 4294967295, %v9629_v45  ;;  %vm9633_vm11 = vmor %vm9631_vm7, %vm9632_vm2  ;;  %vm758_vm14 = vcmp.eq.s32.totalorder %v3432_v51, %v3500_v14 }
 0x1a8   : > { %vm1396_vm8 = vmor %vm9633_vm11, %vm1388_vm5  ;;  %vm9636_vm5 = vnez %v9614_v55  ;;  %vm766_vm11 = vcmp.eq.s32.totalorder %v4872_v61, %v3500_v14  ;;  %v9796_v55 = vmov 0 }
 0x1a9   : > { %v1409_v31 = vsel %vm1396_vm8, %v3984_v27, 0.0  ;;  %vm1514_vm13 = vmor %vm1474_vm4, %vm1482_vm0  ;;  %vm490_vm4 = vcmp.eq.s32.totalorder %v3462_v5, %v3458_v3 }
 0x1aa   : > { %v1417_v34 = vadd.f32 %v1409_v31, %v1275_v59  ;;  %vm1530_vm7 = vmor %vm9636_vm5, %vm1514_vm13  ;;  %vm860_vm13 = vcmp.eq.s32.totalorder %v3371_v22, %v3547_v9  ;;  %v5283_v31 = vld [vmem:[%s9103_s2 + $0x2] ss:$0 sm:$0xff]  ;;  %v9850_v59 = vmov 0 }
 0x1ab   : > { %vm4905_vm2 = vmor %vm750_vm3, %vm758_vm14  ;;  %vm624_vm14 = vcmp.eq.s32.totalorder %v4872_v61, %v3465_v6 }
 0x1ac   : > { %vm9639_vm8 = vmor %vm9617_vm15, %vm9616_vm12  ;;  %vm868_vm12 = vcmp.eq.s32.totalorder %v3374_v23, %v3547_v9  ;;  %vm9642_vm15 = vnez %v9623_v63  ;;  %v5251_v63 = vld [vmem:[%s9103_s2 + $0x1] ss:$0 sm:$0xff] }
 0x1ad   : > { %vm1538_vm0 = vmor %vm9639_vm8, %vm1530_vm7  ;;  %vm9643_vm7 = vnez %v9591_v47  ;;  %vm9644_vm8 = vnez %v9580_v20  ;;  %v9670_v47 = vmov 0  ;;  %v9779_v20 = vld [vmem:[#allocation5_spill] sm:$0xff] }
 0x1ae   : > { %v1551_v0 = vsel %vm1538_vm0, %v4080_v16, 0.0  ;;  %vm522_vm3 = vmor %vm458_vm9, %vm490_vm4  ;;  %vm632_vm9 = vcmp.eq.s32.totalorder %v3462_v5, %v3465_v6 }
 0x1af   : > { %v1559_v7 = vadd.f32 %v1551_v0, %v1417_v34  ;;  %vm538_vm5 = vmor %vm9642_vm15, %vm522_vm3  ;;  %vm9648_vm3 = vnez %v9630_v45  ;;  %v5299_v0 = vld [vmem:[%s9103_s2 + $0x3] ss:$0 sm:$0xff] }
 0x1b0   : > { %vm9645_vm10 = vmor %vm9643_vm7, %vm9644_vm8 }
 0x1b1   : > { %vm546_vm0 = vmor %vm9645_vm10, %vm538_vm5  ;;  %1572 = vadd.xlane.f32.xlu1 %v1559_v7  ;;  %vm9649_vm10 = vnez %v9595_v54  ;;  %v9740_v54 = vmov 0 }
 0x1b2   : > { %vm664_vm4 = vmor %vm624_vm14, %vm632_vm9  ;;  %v559_v43 = vsel %vm546_vm0, %v3609_v29, 0.0  ;;  %vm774_vm14 = vcmp.eq.s32.totalorder %v3462_v5, %v3500_v14  ;;  %vm892_vm0 = vcmp.eq.s32.totalorder %v3446_v58, %v3547_v9  ;;  %vm9651_vm9 = vnez %v9620_v49 }
 0x1b3   : > { %vm4938_vm6 = vmor %vm860_vm13, %vm868_vm12  ;;  %vm876_vm12 = vcmp.eq.s32.totalorder %v3410_v40, %v3547_v9 }
 0x1b4   : > { %vm680_vm15 = vmor %vm9648_vm3, %vm664_vm4 }
 0x1b5   : > { %vm9650_vm5 = vmor %vm9635_vm1, %vm9649_vm10  ;;  %vm9652_vm1 = vnez %v9611_v8  ;;  %v5795_v8 = vld [vmem:[%s3257_s22 + $0x40] sm:$0xff] }
 0x1b6   : > { %vm688_vm7 = vmor %vm9650_vm5, %vm680_vm15  ;;  %vm884_vm15 = vcmp.eq.s32.totalorder %v3404_v37, %v3547_v9  ;;  %vm916_vm5 = vcmp.eq.s32.totalorder %v3462_v5, %v3547_v9 }
 0x1b7   : > { %v701_v10 = vsel %vm688_vm7, %v3614_v57, 0.0  ;;  %vm806_vm13 = vmor %vm766_vm11, %vm774_vm14  ;;  %vm908_vm11 = vcmp.eq.s32.totalorder %v4872_v61, %v3547_v9 }
 0x1b8   : > { %v709_v18 = vadd.f32 %v701_v10, %v559_v43  ;;  %vm822_vm8 = vmor %vm4905_vm2, %vm806_vm13  ;;  %vm900_vm2 = vcmp.eq.s32.totalorder %v3432_v51, %v3547_v9 }
 0x1b9   : > { %vm9653_vm4 = vmor %vm9651_vm9, %vm9652_vm1  ;;  %vm1010_vm9 = vcmp.eq.s32.totalorder %v3374_v23, %v3584_v15 }
 0x1ba   : > { %vm830_vm3 = vmor %vm9653_vm4, %vm822_vm8  ;;  %vm1002_vm8 = vcmp.eq.s32.totalorder %v3371_v22, %v3584_v15  ;;  %vm1018_vm4 = vcmp.eq.s32.totalorder %v3410_v40, %v3584_v15 }
 0x1bb   : > { %v843_v29 = vsel %vm830_vm3, %v3668_v41, 0.0  ;;  %vm932_vm10 = vmor %vm876_vm12, %vm884_vm15  ;;  %vm1034_vm3 = vcmp.eq.s32.totalorder %v3446_v58, %v3584_v15 }
 0x1bc   : > { %v851_v57 = vadd.f32 %v843_v29, %v709_v18  ;;  %vm940_vm7 = vmor %vm892_vm0, %vm900_vm2  ;;  %vm1026_vm0 = vcmp.eq.s32.totalorder %v3404_v37, %v3584_v15  ;;  %v5329_v29 = vld [vmem:[%s3257_s22 + $0x48] sm:$0xff]  ;;  %v5640_v18 = vld [vmem:[%s3257_s22 + $0x50] sm:$0xff] }
 0x1bd   : > { %vm948_vm14 = vmor %vm908_vm11, %vm916_vm5  ;;  %vm1042_vm11 = vcmp.eq.s32.totalorder %v3432_v51, %v3584_v15 }
 0x1be   : > { %vm956_vm13 = vmor %vm4938_vm6, %vm932_vm10  ;;  %vm1050_vm6 = vcmp.eq.s32.totalorder %v4872_v61, %v3584_v15  ;;  %vm1058_vm10 = vcmp.eq.s32.totalorder %v3462_v5, %v3584_v15 }
 0x1bf   : > { %vm964_vm1 = vmor %vm940_vm7, %vm948_vm14 }
 0x1c0   : > { %vm972_vm12 = vmor %vm956_vm13, %vm964_vm1  ;;  %vm1144_vm13 = vcmp.eq.s32.totalorder %v3371_v22, %v3635_v13  ;;  %vm1152_vm1 = vcmp.eq.s32.totalorder %v3374_v23, %v3635_v13 }
 0x1c1   : > { %v985_v41 = vsel %vm972_vm12, %v3719_v4, 0.0  ;;  %vm1066_vm15 = vmor %vm1002_vm8, %vm1010_vm9  ;;  %vm1160_vm8 = vcmp.eq.s32.totalorder %v3410_v40, %v3635_v13 }
 0x1c2   : > { %v993_v50 = vadd.f32 %v985_v41, %v851_v57  ;;  %vm1074_vm2 = vmor %vm1018_vm4, %vm1026_vm0  ;;  %vm1176_vm4 = vcmp.eq.s32.totalorder %v3446_v58, %v3635_v13  ;;  %vm1192_vm0 = vcmp.eq.s32.totalorder %v4872_v61, %v3635_v13  ;;  %v5334_v57 = vld [vmem:[%s9103_s2 + $0x4] ss:$0 sm:$0xff] }
 0x1c3   : > { %vm1082_vm5 = vmor %vm1034_vm3, %vm1042_vm11  ;;  %vm1168_vm3 = vcmp.eq.s32.totalorder %v3404_v37, %v3635_v13 }
 0x1c4   : > { %vm1090_vm7 = vmor %vm1050_vm6, %vm1058_vm10 }
 0x1c5   : > { %vm1098_vm14 = vmor %vm1066_vm15, %vm1074_vm2  ;;  %vm1184_vm15 = vcmp.eq.s32.totalorder %v3432_v51, %v3635_v13  ;;  %vm1200_vm2 = vcmp.eq.s32.totalorder %v3462_v5, %v3635_v13 }
 0x1c6   : > { %vm1106_vm12 = vmor %vm1082_vm5, %vm1090_vm7 }
 0x1c7   : > { %vm1114_vm9 = vmor %vm1098_vm14, %vm1106_vm12  ;;  %vm1286_vm14 = vcmp.eq.s32.totalorder %v3371_v22, %v3687_v62  ;;  %vm1294_vm12 = vcmp.eq.s32.totalorder %v3374_v23, %v3687_v62 }
 0x1c8   : > { %v1127_v4 = vsel %vm1114_vm9, %v3807_v28, 0.0  ;;  %vm1208_vm6 = vmor %vm1144_vm13, %vm1152_vm1  ;;  %vm1302_vm13 = vcmp.eq.s32.totalorder %v3410_v40, %v3687_v62 }
 0x1c9   : > { %v1135_v35 = vadd.f32 %v1127_v4, %v993_v50  ;;  %vm1216_vm11 = vmor %vm1160_vm8, %vm1168_vm3  ;;  %vm1318_vm8 = vcmp.eq.s32.totalorder %v3446_v58, %v3687_v62  ;;  %vm1334_vm3 = vcmp.eq.s32.totalorder %v4872_v61, %v3687_v62  ;;  %v5353_v4 = vld [vmem:[%s9103_s2 + $0x5] ss:$0 sm:$0xff] }
 0x1ca   : > { %vm1224_vm10 = vmor %vm1176_vm4, %vm1184_vm15  ;;  %vm1310_vm4 = vcmp.eq.s32.totalorder %v3404_v37, %v3687_v62 }
 0x1cb   : > { %vm1232_vm5 = vmor %vm1192_vm0, %vm1200_vm2 }
 0x1cc   : > { %vm1240_vm7 = vmor %vm1208_vm6, %vm1216_vm11  ;;  %vm1326_vm6 = vcmp.eq.s32.totalorder %v3432_v51, %v3687_v62  ;;  %vm1342_vm11 = vcmp.eq.s32.totalorder %v3462_v5, %v3687_v62 }
 0x1cd   : > { %vm1248_vm9 = vmor %vm1224_vm10, %vm1232_vm5 }
 0x1ce   : > { %vm1256_vm1 = vmor %vm1240_vm7, %vm1248_vm9  ;;  %vm1428_vm7 = vcmp.eq.s32.totalorder %v3371_v22, %v3741_v11  ;;  %vm1436_vm9 = vcmp.eq.s32.totalorder %v3374_v23, %v3741_v11  ;;  %v5043_v23 = vpop.permute.xlu0 %239 }
 0x1cf   : > { %v1269_v28 = vsel %vm1256_vm1, %v3904_v32, 0.0  ;;  %vm1350_vm0 = vmor %vm1286_vm14, %vm1294_vm12  ;;  %vm1444_vm14 = vcmp.eq.s32.totalorder %v3410_v40, %v3741_v11 }
 0x1d0   : > { %v1277_v12 = vadd.f32 %v1269_v28, %v1135_v35  ;;  %vm1358_vm15 = vmor %vm1302_vm13, %vm1310_vm4  ;;  %vm1460_vm13 = vcmp.eq.s32.totalorder %v3446_v58, %v3741_v11  ;;  %vm1476_vm4 = vcmp.eq.s32.totalorder %v4872_v61, %v3741_v11 }
 0x1d1   : > { %vm1366_vm2 = vmor %vm1318_vm8, %vm1326_vm6  ;;  %vm1452_vm8 = vcmp.eq.s32.totalorder %v3404_v37, %v3741_v11  ;;  %v5045_v37 = vpop.permute.xlu1 %463 }
 0x1d2   : > { %vm1374_vm10 = vmor %vm1334_vm3, %vm1342_vm11 }
 0x1d3   : > { %vm1382_vm5 = vmor %vm1350_vm0, %vm1358_vm15  ;;  %vm1468_vm0 = vcmp.eq.s32.totalorder %v3432_v51, %v3741_v11  ;;  %vm1484_vm15 = vcmp.eq.s32.totalorder %v3462_v5, %v3741_v11  ;;  %v9718_v51 = vld [vmem:[#allocation15_spill] sm:$0xff]  ;;  %v9719_v5 = vmov 0 }
 0x1d4   : > { %vm1390_vm1 = vmor %vm1366_vm2, %vm1374_vm10 }
 0x1d5   : > { %vm1398_vm12 = vmor %vm1382_vm5, %vm1390_vm1 }
 0x1d6   : > { %v1411_v32 = vsel %vm1398_vm12, %v3984_v27, 0.0  ;;  %vm1492_vm3 = vmor %vm1428_vm7, %vm1436_vm9  ;;  %vm260_vm7 = vcmp.eq.s32.totalorder %v5043_v23, %v3458_v3  ;;  %vm484_vm9 = vcmp.eq.s32.totalorder %v5045_v37, %v3458_v3  ;;  %vm356_vm12 = vcmp.eq.s32.totalorder %v3414_v42, %v3458_v3 }
 0x1d7   : > { %v1419_v22 = vadd.f32 %v1411_v32, %v1277_v12  ;;  %vm1500_vm6 = vmor %vm1444_vm14, %vm1452_vm8  ;;  %vm292_vm14 = vcmp.eq.s32.totalorder %v3377_v24, %v3458_v3  ;;  %vm452_vm8 = vcmp.eq.s32.totalorder %v3436_v53, %v3458_v3  ;;  %v9658_v27 = vmov 0  ;;  %v9709_v32 = vld [vmem:[#allocation3_spill] sm:$0xff] }
 0x1d8   : > { %vm1508_vm11 = vmor %vm1460_vm13, %vm1468_vm0  ;;  %vm420_vm13 = vcmp.eq.s32.totalorder %v3450_v60, %v3458_v3 }
 0x1d9   : > { %vm1516_vm2 = vmor %vm1476_vm4, %vm1484_vm15 }
 0x1da   : > { %vm1524_vm10 = vmor %vm1492_vm3, %vm1500_vm6  ;;  %vm324_vm3 = vcmp.eq.s32.totalorder %v3379_v25, %v3458_v3  ;;  %vm388_vm6 = vcmp.eq.s32.totalorder %v3408_v39, %v3458_v3 }
 0x1db   : > { %vm1532_vm5 = vmor %vm1508_vm11, %vm1516_vm2  ;;  %vm570_vm11 = vcmp.eq.s32.totalorder %v5043_v23, %v3465_v6 }
 0x1dc   : > { %vm1540_vm1 = vmor %vm1524_vm10, %vm1532_vm5  ;;  %vm594_vm10 = vcmp.eq.s32.totalorder %v3414_v42, %v3465_v6 }
 0x1dd   : > { %v1553_v40 = vsel %vm1540_vm1, %v4080_v16, 0.0  ;;  %vm5060_vm4 = vmor %vm260_vm7, %vm292_vm14  ;;  %vm578_vm1 = vcmp.eq.s32.totalorder %v3377_v24, %v3465_v6  ;;  %vm626_vm7 = vcmp.eq.s32.totalorder %v5045_v37, %v3465_v6  ;;  %vm586_vm14 = vcmp.eq.s32.totalorder %v3379_v25, %v3465_v6 }
 0x1de   : > { %v1561_v58 = vadd.f32 %v1553_v40, %v1419_v22  ;;  %vm5066_vm0 = vmor %vm452_vm8, %vm484_vm9  ;;  %vm618_vm8 = vcmp.eq.s32.totalorder %v3436_v53, %v3465_v6  ;;  %v9710_v22 = vld [vmem:[#allocation12_spill] sm:$0xff]  ;;  %v9715_v40 = vld [vmem:[#allocation9_spill] sm:$0xff] }
 0x1df   : > { %vm5072_vm15 = vmor %vm324_vm3, %vm356_vm12  ;;  %vm610_vm12 = vcmp.eq.s32.totalorder %v3450_v60, %v3465_v6 }
 0x1e0   : > { %1576 = vadd.xlane.f32.xlu1 %v1561_v58  ;;  %v9659_v27 = vsel %vm5072_vm15, 4294967295, %v9658_v27  ;;  %vm5078_vm2 = vmor %vm388_vm6, %vm420_vm13  ;;  %vm602_vm6 = vcmp.eq.s32.totalorder %v3408_v39, %v3465_v6  ;;  %v5707_v58 = vld [vmem:[%s3257_s22 + $0x70] sm:$0xff] }
 0x1e1   : > { %vm5100_vm13 = vmor %vm570_vm11, %vm578_vm1  ;;  %vm712_vm11 = vcmp.eq.s32.totalorder %v5043_v23, %v3500_v14  ;;  %vm736_vm1 = vcmp.eq.s32.totalorder %v3414_v42, %v3500_v14 }
 0x1e2   : > { %vm5106_vm3 = vmor %vm586_vm14, %vm594_vm10  ;;  %vm720_vm14 = vcmp.eq.s32.totalorder %v3377_v24, %v3500_v14 }
 0x1e3   : > { %vm5112_vm9 = vmor %vm618_vm8, %vm626_vm7  ;;  %vm728_vm8 = vcmp.eq.s32.totalorder %v3379_v25, %v3500_v14 }
 0x1e4   : > { %vm5116_vm5 = vmor %vm602_vm6, %vm610_vm12  ;;  %vm768_vm12 = vcmp.eq.s32.totalorder %v5045_v37, %v3500_v14  ;;  %vm760_vm6 = vcmp.eq.s32.totalorder %v3436_v53, %v3500_v14 }
 0x1e5   : > { %vm666_vm10 = vmor %vm5100_vm13, %vm5106_vm3  ;;  %vm752_vm13 = vcmp.eq.s32.totalorder %v3450_v60, %v3500_v14 }
 0x1e6   : > { %vm674_vm7 = vmor %vm5116_vm5, %vm5112_vm9  ;;  %vm744_vm9 = vcmp.eq.s32.totalorder %v3408_v39, %v3500_v14 }
 0x1e7   : > { %vm5140_vm3 = vmor %vm712_vm11, %vm720_vm14  ;;  %vm9677_vm14 = vnez %v9659_v27  ;;  %v9775_v27 = vld [vmem:[#allocation19_spill] sm:$0xff] }
 0x1e8   : > { %v9671_v47 = vsel %vm5140_vm3, 4294967295, %v9670_v47  ;;  %vm5146_vm5 = vmor %vm728_vm8, %vm736_vm1 }
 0x1e9   : > { %vm5152_vm15 = vmor %vm760_vm6, %vm768_vm12  ;;  %vm878_vm6 = vcmp.eq.s32.totalorder %v3414_v42, %v3547_v9 }
 0x1ea   : > { %vm9676_vm11 = vmor %vm5078_vm2, %vm5066_vm0  ;;  %vm854_vm0 = vcmp.eq.s32.totalorder %v5043_v23, %v3547_v9  ;;  %vm9685_vm2 = vnez %v9671_v47 }
 0x1eb   : > { %vm9678_vm1 = vmor %vm5060_vm4, %vm9677_vm14  ;;  %vm902_vm14 = vcmp.eq.s32.totalorder %v3436_v53, %v3547_v9 }
 0x1ec   : > { %vm5166_vm8 = vmor %vm9678_vm1, %vm9676_vm11  ;;  %vm886_vm1 = vcmp.eq.s32.totalorder %v3408_v39, %v3547_v9 }
 0x1ed   : > { %v9680_v46 = vsel %vm5166_vm8, 4294967295, %v9679_v46  ;;  %vm5170_vm3 = vmor %vm666_vm10, %vm674_vm7  ;;  %vm862_vm7 = vcmp.eq.s32.totalorder %v3377_v24, %v3547_v9  ;;  %vm1020_vm8 = vcmp.eq.s32.totalorder %v3414_v42, %v3584_v15 }
 0x1ee   : > { %v9682_v33 = vsel %vm5170_vm3, 4294967295, %v9681_v33  ;;  %vm5174_vm12 = vmor %vm744_vm9, %vm752_vm13  ;;  %vm910_vm13 = vcmp.eq.s32.totalorder %v5045_v37, %v3547_v9  ;;  %vm870_vm9 = vcmp.eq.s32.totalorder %v3379_v25, %v3547_v9 }
 0x1ef   : > { %vm808_vm4 = vmor %vm9685_vm2, %vm5146_vm5  ;;  %vm894_vm5 = vcmp.eq.s32.totalorder %v3450_v60, %v3547_v9 }
 0x1f0   : > { %vm816_vm10 = vmor %vm5174_vm12, %vm5152_vm15 }
 0x1f1   : > { %vm5198_vm11 = vmor %vm854_vm0, %vm862_vm7  ;;  %vm996_vm0 = vcmp.eq.s32.totalorder %v5043_v23, %v3584_v15  ;;  %1648 = vperm.xlu1 %3165, %v5329_v29  }
 0x1f2   : > { %vm5204_vm15 = vmor %vm870_vm9, %vm878_vm6 }
 0x1f3   : > { %vm942_vm12 = vmor %vm902_vm14, %vm910_vm13  ;;  %vm1004_vm13 = vcmp.eq.s32.totalorder %v3377_v24, %v3584_v15 }
 0x1f4   : > { %vm5210_vm2 = vmor %vm808_vm4, %vm816_vm10  ;;  %vm1036_vm4 = vcmp.eq.s32.totalorder %v3450_v60, %v3584_v15  ;;  %vm1012_vm10 = vcmp.eq.s32.totalorder %v3379_v25, %v3584_v15 }
 0x1f5   : > { %vm934_vm3 = vmor %vm886_vm1, %vm894_vm5  ;;  %vm9697_vm1 = vnez %v9682_v33  ;;  %v837_v34 = vsel %vm5210_vm2, %v5283_v31, 0.0  ;;  %1651 = vperm.xlu1 %3165, %v5640_v18   ;;  %v9789_v33 = vmov 0 }
 0x1f6   : > { %vm958_vm7 = vmor %vm934_vm3, %vm942_vm12  ;;  %vm1052_vm3 = vcmp.eq.s32.totalorder %v5045_v37, %v3584_v15  ;;  %v695_v61 = vsel %vm9697_vm1, %v5251_v63, 0.0  ;;  %vm1146_vm1 = vcmp.eq.s32.totalorder %v3377_v24, %v3635_v13 }
 0x1f7   : > { %vm950_vm6 = vmor %vm5198_vm11, %vm5204_vm15  ;;  %vm1028_vm11 = vcmp.eq.s32.totalorder %v3408_v39, %v3584_v15  ;;  %vm9696_vm15 = vnez %v9680_v46  ;;  %v9742_v46 = vmov 0 }
 0x1f8   : > { %vm5230_vm9 = vmor %vm996_vm0, %vm1004_vm13  ;;  %v553_v36 = vsel %vm9696_vm15, %v5243_v56, 0.0 }
 0x1f9   : > { %vm5234_vm5 = vmor %vm950_vm6, %vm958_vm7  ;;  %vm1138_vm6 = vcmp.eq.s32.totalorder %v5043_v23, %v3635_v13  ;;  %v703_v1 = vadd.f32 %v695_v61, %v553_v36 }
 0x1fa   : > { %vm1068_vm14 = vmor %vm1012_vm10, %vm1020_vm8  ;;  %vm1044_vm8 = vcmp.eq.s32.totalorder %v3436_v53, %v3584_v15  ;;  %vm1162_vm10 = vcmp.eq.s32.totalorder %v3414_v42, %v3635_v13  ;;  %v979_v7 = vsel %vm5234_vm5, %v5299_v0, 0.0  ;;  %vm1336_vm5 = vcmp.eq.s32.totalorder %v5045_v37, %v3687_v62 }
 0x1fb   : > { %vm1076_vm12 = vmor %vm1028_vm11, %vm1036_vm4  ;;  %vm1178_vm4 = vcmp.eq.s32.totalorder %v3450_v60, %v3635_v13  ;;  %v845_v2 = vadd.f32 %v837_v34, %v703_v1  ;;  %v9809_v1 = vmov 0 }
 0x1fc   : > { %vm1084_vm0 = vmor %vm1044_vm8, %vm1052_vm3  ;;  %vm1154_vm3 = vcmp.eq.s32.totalorder %v3379_v25, %v3635_v13 }
 0x1fd   : > { %vm1092_vm7 = vmor %vm5230_vm9, %vm1068_vm14  ;;  %vm1194_vm9 = vcmp.eq.s32.totalorder %v5045_v37, %v3635_v13  ;;  %vm1170_vm14 = vcmp.eq.s32.totalorder %v3408_v39, %v3635_v13  ;;  %v987_v17 = vadd.f32 %v979_v7, %v845_v2 }
 0x1fe   : > { %vm1100_vm13 = vmor %vm1076_vm12, %vm1084_vm0  ;;  %vm1186_vm12 = vcmp.eq.s32.totalorder %v3436_v53, %v3635_v13 }
 0x1ff   : > { %vm5264_vm15 = vmor %vm1092_vm7, %vm1100_vm13  ;;  %vm1280_vm13 = vcmp.eq.s32.totalorder %v5043_v23, %v3687_v62 }
 0x200   : > { %vm5276_vm11 = vmor %vm1138_vm6, %vm1146_vm1  ;;  %v1121_v41 = vsel %vm5264_vm15, %v5334_v57, 0.0  ;;  %vm1446_vm15 = vcmp.eq.s32.totalorder %v3414_v42, %v3741_v11 }
 0x201   : > { %vm1210_vm8 = vmor %vm1154_vm3, %vm1162_vm10  ;;  %vm1304_vm10 = vcmp.eq.s32.totalorder %v3414_v42, %v3687_v62  ;;  %vm1320_vm3 = vcmp.eq.s32.totalorder %v3450_v60, %v3687_v62  ;;  %v1129_v50 = vadd.f32 %v1121_v41, %v987_v17 }
 0x202   : > { %vm1218_vm0 = vmor %vm1170_vm14, %vm1178_vm4  ;;  %vm1288_vm4 = vcmp.eq.s32.totalorder %v3377_v24, %v3687_v62  ;;  %vm1312_vm14 = vcmp.eq.s32.totalorder %v3408_v39, %v3687_v62 }
 0x203   : > { %vm1226_vm7 = vmor %vm1186_vm12, %vm1194_vm9  ;;  %vm1296_vm9 = vcmp.eq.s32.totalorder %v3379_v25, %v3687_v62  ;;  %vm1328_vm12 = vcmp.eq.s32.totalorder %v3436_v53, %v3687_v62 }
 0x204   : > { %vm1234_vm6 = vmor %vm5276_vm11, %vm1210_vm8 }
 0x205   : > { %vm1242_vm2 = vmor %vm1218_vm0, %vm1226_vm7 }
 0x206   : > { %vm5306_vm1 = vmor %vm1234_vm6, %vm1242_vm2 }
 0x207   : > { %vm5318_vm11 = vmor %vm1280_vm13, %vm1288_vm4  ;;  %vm1422_vm13 = vcmp.eq.s32.totalorder %v5043_v23, %v3741_v11  ;;  %v1263_v35 = vsel %vm5306_vm1, %v5353_v4, 0.0  ;;  %vm1430_vm4 = vcmp.eq.s32.totalorder %v3377_v24, %v3741_v11  ;;  %vm1470_vm1 = vcmp.eq.s32.totalorder %v3436_v53, %v3741_v11  ;;  %v5373_v24 = vld [vmem:[%s9103_s2 + $0x6] ss:$0 sm:$0xff]  ;;  %v9708_v53 = vld [vmem:[#allocation4_spill] sm:$0xff] }
 0x208   : > { %vm5324_vm8 = vmor %vm1296_vm9, %vm1304_vm10  ;;  %v1271_v28 = vadd.f32 %v1263_v35, %v1129_v50  ;;  %vm1438_vm9 = vcmp.eq.s32.totalorder %v3379_v25, %v3741_v11  ;;  %v9711_v23 = vld [vmem:[#allocation18_spill] sm:$0xff] }
 0x209   : > { %vm1360_vm0 = vmor %vm1312_vm14, %vm1320_vm3  ;;  %vm1462_vm3 = vcmp.eq.s32.totalorder %v3450_v60, %v3741_v11  ;;  %vm1454_vm14 = vcmp.eq.s32.totalorder %v3408_v39, %v3741_v11  ;;  %v5376_v60 = vpop.permute.xlu1 %466  ;;  %v5649_v35 = vld [vmem:[%s3257_s22 + $0x58] sm:$0xff] }
 0x20a   : > { %vm1368_vm7 = vmor %vm1328_vm12, %vm1336_vm5  ;;  %vm1478_vm5 = vcmp.eq.s32.totalorder %v5045_v37, %v3741_v11  ;;  %v9712_v37 = vld [vmem:[#allocation21_spill] sm:$0xff]  ;;  %1654 = vperm.xlu1 %3165, %v5649_v35  }
 0x20b   : > { %vm1376_vm6 = vmor %vm5318_vm11, %vm5324_vm8 }
 0x20c   : > { %vm1384_vm2 = vmor %vm1360_vm0, %vm1368_vm7 }
 0x20d   : > { %vm1392_vm10 = vmor %vm1376_vm6, %vm1384_vm2  ;;  %vm293_vm2 = vcmp.eq.s32.totalorder %v9708_v53, %v3458_v3 }
 0x20e   : > { %vm1486_vm11 = vmor %vm1422_vm13, %vm1430_vm4  ;;  %v1405_v42 = vsel %vm1392_vm10, %v5373_v24, 0.0  ;;  %vm261_vm10 = vcmp.eq.s32.totalorder %v9709_v32, %v3458_v3  ;;  %vm357_vm4 = vcmp.eq.s32.totalorder %v9710_v22, %v3458_v3 }
 0x20f   : > { %vm1494_vm8 = vmor %vm1438_vm9, %vm1446_vm15  ;;  %v1413_v25 = vadd.f32 %v1405_v42, %v1271_v28  ;;  %vm485_vm15 = vcmp.eq.s32.totalorder %v5376_v60, %v3458_v3  ;;  %vm453_vm9 = vcmp.eq.s32.totalorder %v9712_v37, %v3458_v3  ;;  %v9830_v42 = vmov 2  }
 0x210   : > { %vm1502_vm12 = vmor %vm1454_vm14, %vm1462_vm3  ;;  %vm421_vm3 = vcmp.eq.s32.totalorder %v9711_v23, %v3458_v3 }
 0x211   : > { %vm1510_vm0 = vmor %vm1470_vm1, %vm1478_vm5 }
 0x212   : > { %vm1518_vm7 = vmor %vm1486_vm11, %vm1494_vm8  ;;  %vm325_vm11 = vcmp.eq.s32.totalorder %v9715_v40, %v3458_v3  ;;  %vm389_vm8 = vcmp.eq.s32.totalorder %v9718_v51, %v3458_v3 }
 0x213   : > { %vm1526_vm6 = vmor %vm1502_vm12, %vm1510_vm0  ;;  %vm579_vm12 = vcmp.eq.s32.totalorder %v9708_v53, %v3465_v6 }
 0x214   : > { %vm1534_vm13 = vmor %vm1518_vm7, %vm1526_vm6  ;;  %vm595_vm7 = vcmp.eq.s32.totalorder %v9710_v22, %v3465_v6 }
 0x215   : > { %v1547_v39 = vsel %vm1534_vm13, %v4080_v16, 0.0  ;;  %vm5391_vm5 = vmor %vm261_vm10, %vm293_vm2  ;;  %vm571_vm13 = vcmp.eq.s32.totalorder %v9709_v32, %v3465_v6  ;;  %vm627_vm2 = vcmp.eq.s32.totalorder %v5376_v60, %v3465_v6  ;;  %vm587_vm10 = vcmp.eq.s32.totalorder %v9715_v40, %v3465_v6 }
 0x216   : > { %v1555_v12 = vadd.f32 %v1547_v39, %v1413_v25  ;;  %vm5397_vm14 = vmor %vm453_vm9, %vm485_vm15  ;;  %vm619_vm9 = vcmp.eq.s32.totalorder %v9712_v37, %v3465_v6 }
 0x217   : > { %vm5403_vm1 = vmor %vm325_vm11, %vm357_vm4  ;;  %vm611_vm4 = vcmp.eq.s32.totalorder %v9711_v23, %v3465_v6 }
 0x218   : > { %1564 = vadd.xlane.f32.xlu0 %v1555_v12  ;;  %v9720_v5 = vsel %vm5403_vm1, 4294967295, %v9719_v5  ;;  %vm5409_vm0 = vmor %vm389_vm8, %vm421_vm3  ;;  %vm603_vm8 = vcmp.eq.s32.totalorder %v9718_v51, %v3465_v6  ;;  %v5680_v12 = vld [vmem:[%s3257_s22 + $0x60] sm:$0xff] }
 0x219   : > { %vm5431_vm3 = vmor %vm571_vm13, %vm579_vm12  ;;  %vm721_vm12 = vcmp.eq.s32.totalorder %v9708_v53, %v3500_v14  ;;  %vm737_vm13 = vcmp.eq.s32.totalorder %v9710_v22, %v3500_v14  ;;  %1657 = vperm.xlu1 %3165, %v5680_v12  }
 0x21a   : > { %vm5437_vm11 = vmor %vm587_vm10, %vm595_vm7  ;;  %vm713_vm10 = vcmp.eq.s32.totalorder %v9709_v32, %v3500_v14 }
 0x21b   : > { %vm5443_vm15 = vmor %vm619_vm9, %vm627_vm2  ;;  %vm729_vm9 = vcmp.eq.s32.totalorder %v9715_v40, %v3500_v14 }
 0x21c   : > { %vm5447_vm6 = vmor %vm603_vm8, %vm611_vm4  ;;  %vm769_vm4 = vcmp.eq.s32.totalorder %v5376_v60, %v3500_v14  ;;  %vm761_vm8 = vcmp.eq.s32.totalorder %v9712_v37, %v3500_v14 }
 0x21d   : > { %vm667_vm7 = vmor %vm5431_vm3, %vm5437_vm11  ;;  %vm753_vm3 = vcmp.eq.s32.totalorder %v9711_v23, %v3500_v14 }
 0x21e   : > { %vm675_vm2 = vmor %vm5447_vm6, %vm5443_vm15  ;;  %vm745_vm15 = vcmp.eq.s32.totalorder %v9718_v51, %v3500_v14 }
 0x21f   : > { %vm5471_vm11 = vmor %vm713_vm10, %vm721_vm12  ;;  %vm9738_vm10 = vnez %v9720_v5  ;;  %v9774_v5 = vld [vmem:[#allocation13_spill] sm:$0xff] }
 0x220   : > { %v9732_v26 = vsel %vm5471_vm11, 4294967295, %v9731_v26  ;;  %vm5477_vm6 = vmor %vm729_vm9, %vm737_vm13 }
 0x221   : > { %vm5483_vm1 = vmor %vm761_vm8, %vm769_vm4  ;;  %vm879_vm8 = vcmp.eq.s32.totalorder %v9710_v22, %v3547_v9 }
 0x222   : > { %vm9737_vm12 = vmor %vm5409_vm0, %vm5397_vm14  ;;  %vm863_vm14 = vcmp.eq.s32.totalorder %v9708_v53, %v3547_v9  ;;  %vm9746_vm0 = vnez %v9732_v26  ;;  %v9782_v26 = vld [vmem:[#allocation10_spill] sm:$0xff] }
 0x223   : > { %vm9739_vm13 = vmor %vm5391_vm5, %vm9738_vm10  ;;  %vm903_vm10 = vcmp.eq.s32.totalorder %v9712_v37, %v3547_v9 }
 0x224   : > { %vm5497_vm9 = vmor %vm9739_vm13, %vm9737_vm12  ;;  %vm887_vm13 = vcmp.eq.s32.totalorder %v9718_v51, %v3547_v9 }
 0x225   : > { %v9741_v54 = vsel %vm5497_vm9, 4294967295, %v9740_v54  ;;  %vm5501_vm11 = vmor %vm667_vm7, %vm675_vm2  ;;  %vm855_vm2 = vcmp.eq.s32.totalorder %v9709_v32, %v3547_v9  ;;  %vm1021_vm9 = vcmp.eq.s32.totalorder %v9710_v22, %v3584_v15 }
 0x226   : > { %v9743_v46 = vsel %vm5501_vm11, 4294967295, %v9742_v46  ;;  %vm5505_vm4 = vmor %vm745_vm15, %vm753_vm3  ;;  %vm911_vm3 = vcmp.eq.s32.totalorder %v5376_v60, %v3547_v9  ;;  %vm871_vm15 = vcmp.eq.s32.totalorder %v9715_v40, %v3547_v9 }
 0x227   : > { %vm809_vm5 = vmor %vm9746_vm0, %vm5477_vm6  ;;  %vm895_vm6 = vcmp.eq.s32.totalorder %v9711_v23, %v3547_v9 }
 0x228   : > { %vm817_vm7 = vmor %vm5505_vm4, %vm5483_vm1 }
 0x229   : > { %vm5529_vm12 = vmor %vm855_vm2, %vm863_vm14  ;;  %vm1005_vm14 = vcmp.eq.s32.totalorder %v9708_v53, %v3584_v15 }
 0x22a   : > { %vm5535_vm1 = vmor %vm871_vm15, %vm879_vm8 }
 0x22b   : > { %vm943_vm4 = vmor %vm903_vm10, %vm911_vm3  ;;  %vm997_vm3 = vcmp.eq.s32.totalorder %v9709_v32, %v3584_v15 }
 0x22c   : > { %vm5541_vm0 = vmor %vm809_vm5, %vm817_vm7  ;;  %vm1037_vm5 = vcmp.eq.s32.totalorder %v9711_v23, %v3584_v15  ;;  %vm1013_vm7 = vcmp.eq.s32.totalorder %v9715_v40, %v3584_v15 }
 0x22d   : > { %vm935_vm11 = vmor %vm887_vm13, %vm895_vm6  ;;  %vm9758_vm13 = vnez %v9743_v46  ;;  %v838_v45 = vsel %vm5541_vm0, %v5283_v31, 0.0  ;;  %v9787_v46 = vmov 0 }
 0x22e   : > { %vm959_vm2 = vmor %vm935_vm11, %vm943_vm4  ;;  %vm1053_vm11 = vcmp.eq.s32.totalorder %v5376_v60, %v3584_v15  ;;  %v696_v36 = vsel %vm9758_vm13, %v5251_v63, 0.0  ;;  %vm1045_vm4 = vcmp.eq.s32.totalorder %v9712_v37, %v3584_v15  ;;  %vm1139_vm13 = vcmp.eq.s32.totalorder %v9709_v32, %v3635_v13 }
 0x22f   : > { %vm951_vm8 = vmor %vm5529_vm12, %vm5535_vm1  ;;  %vm1029_vm12 = vcmp.eq.s32.totalorder %v9718_v51, %v3584_v15  ;;  %vm9757_vm1 = vnez %v9741_v54  ;;  %v5755_v54 = vld [vmem:[%s3257_s22 + $0x78] sm:$0xff] }
 0x230   : > { %vm5561_vm15 = vmor %vm997_vm3, %vm1005_vm14  ;;  %v554_v49 = vsel %vm9757_vm1, %v5243_v56, 0.0  ;;  %vm1147_vm3 = vcmp.eq.s32.totalorder %v9708_v53, %v3635_v13 }
 0x231   : > { %vm5565_vm6 = vmor %vm951_vm8, %vm959_vm2  ;;  %v704_v61 = vadd.f32 %v696_v36, %v554_v49  ;;  %v9800_v36 = vmov 0 }
 0x232   : > { %vm1069_vm10 = vmor %vm1013_vm7, %vm1021_vm9  ;;  %vm1163_vm7 = vcmp.eq.s32.totalorder %v9710_v22, %v3635_v13  ;;  %v980_v2 = vsel %vm5565_vm6, %v5299_v0, 0.0  ;;  %vm1337_vm6 = vcmp.eq.s32.totalorder %v5376_v60, %v3687_v62 }
 0x233   : > { %vm1077_vm14 = vmor %vm1029_vm12, %vm1037_vm5  ;;  %vm1179_vm5 = vcmp.eq.s32.totalorder %v9711_v23, %v3635_v13  ;;  %v846_v34 = vadd.f32 %v838_v45, %v704_v61  ;;  %v9852_v45 = vmov 0 }
 0x234   : > { %vm1085_vm2 = vmor %vm1045_vm4, %vm1053_vm11  ;;  %vm1155_vm11 = vcmp.eq.s32.totalorder %v9715_v40, %v3635_v13 }
 0x235   : > { %vm1093_vm8 = vmor %vm5561_vm15, %vm1069_vm10  ;;  %vm1195_vm15 = vcmp.eq.s32.totalorder %v5376_v60, %v3635_v13  ;;  %vm1171_vm10 = vcmp.eq.s32.totalorder %v9718_v51, %v3635_v13  ;;  %v988_v7 = vadd.f32 %v980_v2, %v846_v34  ;;  %v1606_v2 = vld [vmem:[%s6257_s8 + $0x18] sm:$0xff] }
 0x236   : > { %vm1101_vm9 = vmor %vm1077_vm14, %vm1085_vm2  ;;  %vm1187_vm14 = vcmp.eq.s32.totalorder %v9712_v37, %v3635_v13 }
 0x237   : > { %vm5585_vm1 = vmor %vm1093_vm8, %vm1101_vm9  ;;  %vm1289_vm9 = vcmp.eq.s32.totalorder %v9708_v53, %v3687_v62 }
 0x238   : > { %vm5597_vm12 = vmor %vm1139_vm13, %vm1147_vm3  ;;  %v1122_v41 = vsel %vm5585_vm1, %v5334_v57, 0.0 }
 0x239   : > { %vm1211_vm4 = vmor %vm1155_vm11, %vm1163_vm7  ;;  %vm1305_vm7 = vcmp.eq.s32.totalorder %v9710_v22, %v3687_v62  ;;  %vm1321_vm11 = vcmp.eq.s32.totalorder %v9711_v23, %v3687_v62  ;;  %v1130_v50 = vadd.f32 %v1122_v41, %v988_v7  ;;  %v9858_v7 = vmov 0 }
 0x23a   : > { %vm1219_vm2 = vmor %vm1171_vm10, %vm1179_vm5  ;;  %vm1281_vm5 = vcmp.eq.s32.totalorder %v9709_v32, %v3687_v62  ;;  %vm1313_vm10 = vcmp.eq.s32.totalorder %v9718_v51, %v3687_v62 }
 0x23b   : > { %vm1227_vm8 = vmor %vm1187_vm14, %vm1195_vm15  ;;  %vm1297_vm15 = vcmp.eq.s32.totalorder %v9715_v40, %v3687_v62  ;;  %vm1329_vm14 = vcmp.eq.s32.totalorder %v9712_v37, %v3687_v62 }
 0x23c   : > { %vm1235_vm3 = vmor %vm5597_vm12, %vm1211_vm4 }
 0x23d   : > { %vm1243_vm0 = vmor %vm1219_vm2, %vm1227_vm8 }
 0x23e   : > { %vm5617_vm13 = vmor %vm1235_vm3, %vm1243_vm0  ;;  %vm1447_vm0 = vcmp.eq.s32.totalorder %v9710_v22, %v3741_v11  ;;  %v5695_v22 = vpop.permute.xlu0 %248 }
 0x23f   : > { %vm5629_vm12 = vmor %vm1281_vm5, %vm1289_vm9  ;;  %vm1431_vm9 = vcmp.eq.s32.totalorder %v9708_v53, %v3741_v11  ;;  %v1264_v28 = vsel %vm5617_vm13, %v5353_v4, 0.0  ;;  %vm1423_vm5 = vcmp.eq.s32.totalorder %v9709_v32, %v3741_v11  ;;  %vm1479_vm13 = vcmp.eq.s32.totalorder %v5376_v60, %v3741_v11  ;;  %v5693_v32 = vld [vmem:[%s3257_s22 + $0x68] sm:$0xff] }
 0x240   : > { %vm5635_vm4 = vmor %vm1297_vm15, %vm1305_vm7  ;;  %v1272_v25 = vadd.f32 %v1264_v28, %v1130_v50  ;;  %vm1439_vm15 = vcmp.eq.s32.totalorder %v9715_v40, %v3741_v11  ;;  %1660 = vperm.xlu1 %3165, %v5693_v32  }
 0x241   : > { %vm1361_vm2 = vmor %vm1313_vm10, %vm1321_vm11  ;;  %vm1463_vm11 = vcmp.eq.s32.totalorder %v9711_v23, %v3741_v11  ;;  %v5697_v23 = vpop.permute.xlu1 %472 }
 0x242   : > { %vm1369_vm8 = vmor %vm1329_vm14, %vm1337_vm6 }
 0x243   : > { %vm1377_vm3 = vmor %vm5629_vm12, %vm5635_vm4  ;;  %vm1455_vm12 = vcmp.eq.s32.totalorder %v9718_v51, %v3741_v11  ;;  %vm1471_vm4 = vcmp.eq.s32.totalorder %v9712_v37, %v3741_v11  ;;  %v5702_v37 = vld [vmem:[%s9103_s2 + $0x7] ss:$0 sm:$0xff]  ;;  %v9773_v51 = vld [vmem:[#allocation6_spill] sm:$0xff] }
 0x244   : > { %vm1385_vm1 = vmor %vm1361_vm2, %vm1369_vm8  ;;  %1663 = vperm.xlu1 %3165, %v5707_v58  }
 0x245   : > { %vm5662_vm7 = vmor %vm1377_vm3, %vm1385_vm1  ;;  %vm263_vm1 = vcmp.eq.s32.totalorder %v5695_v22, %v3458_v3 }
 0x246   : > { %vm5675_vm6 = vmor %vm1423_vm5, %vm1431_vm9  ;;  %v1406_v53 = vsel %vm5662_vm7, %v5373_v24, 0.0  ;;  %vm295_vm7 = vcmp.eq.s32.totalorder %v9773_v51, %v3458_v3  ;;  %vm359_vm5 = vcmp.eq.s32.totalorder %v9774_v5, %v3458_v3 }
 0x247   : > { %vm1495_vm10 = vmor %vm1439_vm15, %vm1447_vm0  ;;  %v1414_v60 = vadd.f32 %v1406_v53, %v1272_v25  ;;  %vm487_vm0 = vcmp.eq.s32.totalorder %v5697_v23, %v3458_v3  ;;  %vm455_vm15 = vcmp.eq.s32.totalorder %v9776_v38, %v3458_v3 }
 0x248   : > { %vm1503_vm14 = vmor %vm1455_vm12, %vm1463_vm11  ;;  %vm423_vm11 = vcmp.eq.s32.totalorder %v9775_v27, %v3458_v3  ;;  %1666 = vperm.xlu1 %3165, %v5755_v54  }
 0x249   : > { %vm1511_vm2 = vmor %vm1471_vm4, %vm1479_vm13 }
 0x24a   : > { %vm1519_vm8 = vmor %vm5675_vm6, %vm1495_vm10  ;;  %vm327_vm6 = vcmp.eq.s32.totalorder %v9779_v20, %v3458_v3  ;;  %vm391_vm10 = vcmp.eq.s32.totalorder %v9782_v26, %v3458_v3 }
 0x24b   : > { %vm1527_vm3 = vmor %vm1503_vm14, %vm1511_vm2  ;;  %vm573_vm14 = vcmp.eq.s32.totalorder %v5695_v22, %v3465_v6 }
 0x24c   : > { %vm1535_vm9 = vmor %vm1519_vm8, %vm1527_vm3  ;;  %vm597_vm8 = vcmp.eq.s32.totalorder %v9774_v5, %v3465_v6  ;;  %3166 = vset.pattern.permute.xlu1 %v9795_v19 }
 0x24d   : > { %v1548_v16 = vsel %vm1535_vm9, %v5702_v37, 0.0  ;;  %vm5722_vm13 = vmor %vm263_vm1, %vm295_vm7  ;;  %vm581_vm9 = vcmp.eq.s32.totalorder %v9773_v51, %v3465_v6  ;;  %vm629_vm1 = vcmp.eq.s32.totalorder %v5697_v23, %v3465_v6  ;;  %vm589_vm7 = vcmp.eq.s32.totalorder %v9779_v20, %v3465_v6  ;;  %1677 = vperm.xlu1 %3166, %v5795_v8  }
 0x24e   : > { %v1556_v40 = vadd.f32 %v1548_v16, %v1414_v60  ;;  %vm5728_vm12 = vmor %vm455_vm15, %vm487_vm0  ;;  %vm621_vm15 = vcmp.eq.s32.totalorder %v9776_v38, %v3465_v6 }
 0x24f   : > { %vm5734_vm4 = vmor %vm327_vm6, %vm359_vm5  ;;  %vm613_vm5 = vcmp.eq.s32.totalorder %v9775_v27, %v3465_v6 }
 0x250   : > { %1566 = vadd.xlane.f32.xlu0 %v1556_v40  ;;  %vm5740_vm2 = vmor %vm391_vm10, %vm423_vm11  ;;  %vm605_vm10 = vcmp.eq.s32.totalorder %v9782_v26, %v3465_v6 }
 0x251   : > { %vm5765_vm11 = vmor %vm573_vm14, %vm581_vm9  ;;  %vm715_vm9 = vcmp.eq.s32.totalorder %v5695_v22, %v3500_v14  ;;  %1683 = vperm.xlu1 %3166, %v5640_v18  }
 0x252   : > { %v9788_v46 = vsel %vm5765_vm11, 4294967295, %v9787_v46  ;;  %vm5772_vm6 = vmor %vm589_vm7, %vm597_vm8  ;;  %vm739_vm7 = vcmp.eq.s32.totalorder %v9774_v5, %v3500_v14  ;;  %vm755_vm8 = vcmp.eq.s32.totalorder %v9775_v27, %v3500_v14 }
 0x253   : > { %v9790_v33 = vsel %vm5772_vm6, 4294967295, %v9789_v33  ;;  %vm5778_vm0 = vmor %vm621_vm15, %vm629_vm1  ;;  %vm771_vm15 = vcmp.eq.s32.totalorder %v5697_v23, %v3500_v14  ;;  %vm747_vm6 = vcmp.eq.s32.totalorder %v9782_v26, %v3500_v14 }
 0x254   : > { %vm5782_vm14 = vmor %vm605_vm10, %vm613_vm5  ;;  %vm723_vm5 = vcmp.eq.s32.totalorder %v9773_v51, %v3500_v14  ;;  %vm731_vm10 = vcmp.eq.s32.totalorder %v9779_v20, %v3500_v14 }
 0x255   : > { %vm677_vm1 = vmor %vm5782_vm14, %vm5778_vm0  ;;  %vm763_vm0 = vcmp.eq.s32.totalorder %v9776_v38, %v3500_v14  ;;  %1686 = vperm.xlu1 %3166, %v5649_v35  }
 0x256   : > { %vm5811_vm3 = vmor %vm715_vm9, %vm723_vm5 }
 0x257   : > { %v9797_v55 = vsel %vm5811_vm3, 4294967295, %v9796_v55  ;;  %vm5817_vm14 = vmor %vm731_vm10, %vm739_vm7  ;;  %vm9806_vm10 = vnez %v9788_v46  ;;  %v9837_v46 = vld [vmem:[#allocation14_spill] sm:$0xff] }
 0x258   : > { %vm5823_vm11 = vmor %vm763_vm0, %vm771_vm15  ;;  %vm9807_vm15 = vnez %v9790_v33  ;;  %v9838_v33 = vld [vmem:[#allocation20_spill] sm:$0xff] }
 0x259   : > { %v9801_v36 = vsel %vm5823_vm11, 4294967295, %v9800_v36  ;;  %vm9802_vm9 = vmor %vm5740_vm2, %vm5728_vm12  ;;  %vm9813_vm12 = vnez %v9797_v55  ;;  %vm881_vm2 = vcmp.eq.s32.totalorder %v9774_v5, %v3547_v9  ;;  %1692 = vperm.xlu1 %3166, %v5693_v32   ;;  %v9842_v55 = vld [vmem:[#allocation7_spill] sm:$0xff] }
 0x25a   : > { %vm9803_vm7 = vmor %vm5722_vm13, %vm5734_vm4  ;;  %vm857_vm13 = vcmp.eq.s32.totalorder %v5695_v22, %v3547_v9 }
 0x25b   : > { %vm5837_vm5 = vmor %vm9803_vm7, %vm9802_vm9  ;;  %vm913_vm9 = vcmp.eq.s32.totalorder %v5697_v23, %v3547_v9  ;;  %vm873_vm7 = vcmp.eq.s32.totalorder %v9779_v20, %v3547_v9 }
 0x25c   : > { %vm9808_vm0 = vmor %vm9806_vm10, %vm9807_vm15  ;;  %vm905_vm15 = vcmp.eq.s32.totalorder %v9776_v38, %v3547_v9  ;;  %v556_v43 = vsel %vm5837_vm5, %v5243_v56, 0.0  ;;  %vm1165_vm5 = vcmp.eq.s32.totalorder %v9774_v5, %v3635_v13 }
 0x25d   : > { %vm5846_vm11 = vmor %vm9808_vm0, %vm677_vm1  ;;  %vm9814_vm1 = vnez %v9801_v36  ;;  %vm889_vm0 = vcmp.eq.s32.totalorder %v9782_v26, %v3547_v9  ;;  %1698 = vperm.xlu1 %3166, %v5755_v54   ;;  %v9845_v36 = vld [vmem:[#allocation11_spill] sm:$0xff] }
 0x25e   : > { %v9810_v1 = vsel %vm5846_vm11, 4294967295, %v9809_v1  ;;  %vm5850_vm3 = vmor %vm747_vm6, %vm755_vm8  ;;  %vm865_vm8 = vcmp.eq.s32.totalorder %v9773_v51, %v3547_v9 }
 0x25f   : > { %vm811_vm4 = vmor %vm9813_vm12, %vm5817_vm14  ;;  %vm897_vm14 = vcmp.eq.s32.totalorder %v9775_v27, %v3547_v9 }
 0x260   : > { %vm819_vm6 = vmor %vm5850_vm3, %vm9814_vm1 }
 0x261   : > { %vm5875_vm10 = vmor %vm857_vm13, %vm865_vm8  ;;  %vm999_vm8 = vcmp.eq.s32.totalorder %v5695_v22, %v3584_v15  ;;  %3169 = vset.pattern.permute.xlu1 %v9830_v42 }
 0x262   : > { %vm5881_vm3 = vmor %vm873_vm7, %vm881_vm2  ;;  %vm1023_vm2 = vcmp.eq.s32.totalorder %v9774_v5, %v3584_v15  ;;  %1712 = vperm.xlu1 %3169, %v5329_v29  }
 0x263   : > { %vm945_vm12 = vmor %vm905_vm15, %vm913_vm9  ;;  %vm1007_vm9 = vcmp.eq.s32.totalorder %v9773_v51, %v3584_v15 }
 0x264   : > { %vm5888_vm1 = vmor %vm811_vm4, %vm819_vm6  ;;  %vm1039_vm4 = vcmp.eq.s32.totalorder %v9775_v27, %v3584_v15  ;;  %vm1015_vm6 = vcmp.eq.s32.totalorder %v9779_v20, %v3584_v15 }
 0x265   : > { %vm937_vm13 = vmor %vm889_vm0, %vm897_vm14  ;;  %vm1055_vm14 = vcmp.eq.s32.totalorder %v5697_v23, %v3584_v15  ;;  %v840_v25 = vsel %vm5888_vm1, %v5283_v31, 0.0 }
 0x266   : > { %vm961_vm11 = vmor %vm937_vm13, %vm945_vm12  ;;  %vm9825_vm12 = vnez %v9810_v1  ;;  %vm1047_vm13 = vcmp.eq.s32.totalorder %v9776_v38, %v3584_v15  ;;  %1715 = vperm.xlu1 %3169, %v5640_v18  }
 0x267   : > { %vm953_vm7 = vmor %vm5875_vm10, %vm5881_vm3  ;;  %vm1031_vm10 = vcmp.eq.s32.totalorder %v9782_v26, %v3584_v15  ;;  %v698_v10 = vsel %vm9825_vm12, %v5251_v63, 0.0  ;;  %vm1173_vm12 = vcmp.eq.s32.totalorder %v9782_v26, %v3635_v13 }
 0x268   : > { %vm5909_vm15 = vmor %vm999_vm8, %vm1007_vm9  ;;  %v706_v41 = vadd.f32 %v698_v10, %v556_v43  ;;  %v9862_v43 = vmov 4   ;;  %v9863_v10 = vmov 0 }
 0x269   : > { %vm5913_vm0 = vmor %vm953_vm7, %vm961_vm11 }
 0x26a   : > { %vm1071_vm3 = vmor %vm1015_vm6, %vm1023_vm2  ;;  %vm1141_vm2 = vcmp.eq.s32.totalorder %v5695_v22, %v3635_v13  ;;  %v848_v39 = vadd.f32 %v840_v25, %v706_v41  ;;  %v982_v53 = vsel %vm5913_vm0, %v5299_v0, 0.0  ;;  %vm1299_vm0 = vcmp.eq.s32.totalorder %v9779_v20, %v3687_v62  ;;  %1721 = vperm.xlu1 %3169, %v5680_v12  }
 0x26b   : > { %vm1079_vm8 = vmor %vm1031_vm10, %vm1039_vm4  ;;  %vm1149_vm4 = vcmp.eq.s32.totalorder %v9773_v51, %v3635_v13  ;;  %vm1197_vm10 = vcmp.eq.s32.totalorder %v5697_v23, %v3635_v13 }
 0x26c   : > { %vm1087_vm11 = vmor %vm1047_vm13, %vm1055_vm14  ;;  %vm1181_vm14 = vcmp.eq.s32.totalorder %v9775_v27, %v3635_v13  ;;  %v990_v60 = vadd.f32 %v982_v53, %v848_v39  ;;  %v1608_v39 = vld [vmem:[%s6257_s8 + $0x28] sm:$0xff] }
 0x26d   : > { %vm1095_vm7 = vmor %vm5909_vm15, %vm1071_vm3  ;;  %vm1157_vm15 = vcmp.eq.s32.totalorder %v9779_v20, %v3635_v13 }
 0x26e   : > { %vm1103_vm9 = vmor %vm1079_vm8, %vm1087_vm11  ;;  %vm1189_vm8 = vcmp.eq.s32.totalorder %v9776_v38, %v3635_v13  ;;  %1727 = vperm.xlu1 %3169, %v5707_v58  }
 0x26f   : > { %vm5934_vm6 = vmor %vm1095_vm7, %vm1103_vm9  ;;  %vm1283_vm9 = vcmp.eq.s32.totalorder %v5695_v22, %v3687_v62 }
 0x270   : > { %vm5946_vm3 = vmor %vm1141_vm2, %vm1149_vm4  ;;  %v1124_v30 = vsel %vm5934_vm6, %v5334_v57, 0.0 }
 0x271   : > { %vm1213_vm13 = vmor %vm1157_vm15, %vm1165_vm5  ;;  %vm1307_vm5 = vcmp.eq.s32.totalorder %v9774_v5, %v3687_v62  ;;  %vm1323_vm15 = vcmp.eq.s32.totalorder %v9775_v27, %v3687_v62  ;;  %v1132_v21 = vadd.f32 %v1124_v30, %v990_v60 }
 0x272   : > { %vm1221_vm11 = vmor %vm1173_vm12, %vm1181_vm14  ;;  %vm1291_vm14 = vcmp.eq.s32.totalorder %v9773_v51, %v3687_v62  ;;  %vm1315_vm12 = vcmp.eq.s32.totalorder %v9782_v26, %v3687_v62 }
 0x273   : > { %vm1229_vm7 = vmor %vm1189_vm8, %vm1197_vm10  ;;  %vm1339_vm10 = vcmp.eq.s32.totalorder %v5697_v23, %v3687_v62  ;;  %vm1331_vm8 = vcmp.eq.s32.totalorder %v9776_v38, %v3687_v62 }
 0x274   : > { %vm1237_vm2 = vmor %vm5946_vm3, %vm1213_vm13 }
 0x275   : > { %vm1245_vm1 = vmor %vm1221_vm11, %vm1229_vm7 }
 0x276   : > { %vm5969_vm4 = vmor %vm1237_vm2, %vm1245_vm1 }
 0x277   : > { %vm5981_vm3 = vmor %vm1283_vm9, %vm1291_vm14  ;;  %vm1425_vm9 = vcmp.eq.s32.totalorder %v5695_v22, %v3741_v11  ;;  %v1266_v47 = vsel %vm5969_vm4, %v5353_v4, 0.0  ;;  %vm1433_vm14 = vcmp.eq.s32.totalorder %v9773_v51, %v3741_v11  ;;  %vm1457_vm4 = vcmp.eq.s32.totalorder %v9782_v26, %v3741_v11 }
 0x278   : > { %vm1355_vm13 = vmor %vm1299_vm0, %vm1307_vm5  ;;  %vm1449_vm5 = vcmp.eq.s32.totalorder %v9774_v5, %v3741_v11  ;;  %v1274_v48 = vadd.f32 %v1266_v47, %v1132_v21  ;;  %vm1441_vm0 = vcmp.eq.s32.totalorder %v9779_v20, %v3741_v11  ;;  %v9835_v51 = vmov 3  }
 0x279   : > { %vm1363_vm11 = vmor %vm1315_vm12, %vm1323_vm15  ;;  %vm1465_vm15 = vcmp.eq.s32.totalorder %v9775_v27, %v3741_v11  ;;  %3170 = vset.pattern.permute.xlu1 %v9835_v51  ;;  %v6020_v27 = vpop.permute.xlu1 %478 }
 0x27a   : > { %vm1371_vm7 = vmor %vm1331_vm8, %vm1339_vm10  ;;  %vm1481_vm10 = vcmp.eq.s32.totalorder %v5697_v23, %v3741_v11  ;;  %1741 = vperm.xlu1 %3170, %v5795_v8   ;;  %v6018_v23 = vpop.permute.xlu0 %254 }
 0x27b   : > { %vm1379_vm2 = vmor %vm5981_vm3, %vm1355_vm13  ;;  %vm1473_vm13 = vcmp.eq.s32.totalorder %v9776_v38, %v3741_v11  ;;  %v9836_v38 = vld [vmem:[#allocation8_spill] sm:$0xff] }
 0x27c   : > { %vm1387_vm1 = vmor %vm1363_vm11, %vm1371_vm7 }
 0x27d   : > { %vm1395_vm6 = vmor %vm1379_vm2, %vm1387_vm1  ;;  %vm265_vm1 = vcmp.eq.s32.totalorder %v6018_v23, %v3458_v3  ;;  %v1563_v47 = vpop.xlane.xlu1 %1562 }
 0x27e   : > { %vm1489_vm3 = vmor %vm1425_vm9, %vm1433_vm14  ;;  %v1408_v22 = vsel %vm1395_vm6, %v5373_v24, 0.0  ;;  %1747 = vperm.xlu1 %3170, %v5640_v18   ;;  %vm297_vm6 = vcmp.eq.s32.totalorder %v9836_v38, %v3458_v3  ;;  %vm361_vm14 = vcmp.eq.s32.totalorder %v9837_v46, %v3458_v3 }
 0x27f   : > { %vm1497_vm12 = vmor %vm1441_vm0, %vm1449_vm5  ;;  %v1416_v5 = vadd.f32 %v1408_v22, %v1274_v48  ;;  %vm489_vm5 = vcmp.eq.s32.totalorder %v6020_v27, %v3458_v3  ;;  %vm457_vm0 = vcmp.eq.s32.totalorder %v9839_v44, %v3458_v3  ;;  %v9895_v22 = vmov 5   ;;  %v1610_v48 = vld [vmem:[%s6257_s8 + $0x38] sm:$0xff] }
 0x280   : > { %vm1505_vm8 = vmor %vm1457_vm4, %vm1465_vm15  ;;  %vm425_vm15 = vcmp.eq.s32.totalorder %v9838_v33, %v3458_v3 }
 0x281   : > { %vm1513_vm11 = vmor %vm1473_vm13, %vm1481_vm10  ;;  %v1569_v52 = vpop.xlane.xlu1 %1568 }
 0x282   : > { %vm1521_vm7 = vmor %vm1489_vm3, %vm1497_vm12  ;;  %1750 = vperm.xlu1 %3170, %v5649_v35   ;;  %vm329_vm3 = vcmp.eq.s32.totalorder %v9842_v55, %v3458_v3  ;;  %vm393_vm12 = vcmp.eq.s32.totalorder %v9845_v36, %v3458_v3 }
 0x283   : > { %vm1529_vm2 = vmor %vm1505_vm8, %vm1513_vm11  ;;  %vm575_vm8 = vcmp.eq.s32.totalorder %v6018_v23, %v3465_v6 }
 0x284   : > { %vm1537_vm9 = vmor %vm1521_vm7, %vm1529_vm2  ;;  %vm599_vm7 = vcmp.eq.s32.totalorder %v9837_v46, %v3465_v6 }
 0x285   : > { %v1550_v20 = vsel %vm1537_vm9, %v5702_v37, 0.0  ;;  %vm6036_vm10 = vmor %vm265_vm1, %vm297_vm6  ;;  %vm583_vm9 = vcmp.eq.s32.totalorder %v9836_v38, %v3465_v6  ;;  %vm631_vm1 = vcmp.eq.s32.totalorder %v6020_v27, %v3465_v6  ;;  %vm591_vm6 = vcmp.eq.s32.totalorder %v9842_v55, %v3465_v6  ;;  %v1573_v41 = vpop.xlane.xlu1 %1572 }
 0x286   : > { %v1558_v26 = vadd.f32 %v1550_v20, %v1416_v5  ;;  %vm6043_vm4 = vmor %vm457_vm0, %vm489_vm5  ;;  %1756 = vperm.xlu1 %3170, %v5693_v32   ;;  %vm623_vm0 = vcmp.eq.s32.totalorder %v9839_v44, %v3465_v6 }
 0x287   : > { %vm6049_vm13 = vmor %vm329_vm3, %vm361_vm14  ;;  %vm615_vm14 = vcmp.eq.s32.totalorder %v9838_v33, %v3465_v6 }
 0x288   : > { %1570 = vadd.xlane.f32.xlu0 %v1558_v26  ;;  %vm6055_vm11 = vmor %vm393_vm12, %vm425_vm15  ;;  %vm607_vm12 = vcmp.eq.s32.totalorder %v9845_v36, %v3465_v6  ;;  %v1603_v26 = vld [vmem:[%s6257_s8] sm:$0xff] }
 0x289   : > { %vm6078_vm15 = vmor %vm575_vm8, %vm583_vm9  ;;  %vm717_vm8 = vcmp.eq.s32.totalorder %v6018_v23, %v3500_v14  ;;  %vm741_vm9 = vcmp.eq.s32.totalorder %v9837_v46, %v3500_v14  ;;  %v1577_v40 = vpop.xlane.xlu1 %1576 }
 0x28a   : > { %v9851_v59 = vsel %vm6078_vm15, 4294967295, %v9850_v59  ;;  %vm6084_vm3 = vmor %vm591_vm6, %vm599_vm7  ;;  %1762 = vperm.xlu1 %3170, %v5755_v54   ;;  %vm725_vm6 = vcmp.eq.s32.totalorder %v9836_v38, %v3500_v14 }
 0x28b   : > { %v9853_v45 = vsel %vm6084_vm3, 4294967295, %v9852_v45  ;;  %vm6090_vm5 = vmor %vm623_vm0, %vm631_vm1  ;;  %vm733_vm0 = vcmp.eq.s32.totalorder %v9842_v55, %v3500_v14  ;;  %vm765_vm3 = vcmp.eq.s32.totalorder %v9839_v44, %v3500_v14 }
 0x28c   : > { %vm6094_vm2 = vmor %vm607_vm12, %vm615_vm14  ;;  %vm773_vm14 = vcmp.eq.s32.totalorder %v6020_v27, %v3500_v14  ;;  %vm757_vm12 = vcmp.eq.s32.totalorder %v9838_v33, %v3500_v14 }
 0x28d   : > { %vm679_vm1 = vmor %vm6094_vm2, %vm6090_vm5  ;;  %vm749_vm5 = vcmp.eq.s32.totalorder %v9845_v36, %v3500_v14 }
 0x28e   : > { %vm6119_vm7 = vmor %vm717_vm8, %vm725_vm6  ;;  %3173 = vset.pattern.permute.xlu1 %v9862_v43 }
 0x28f   : > { %v9859_v7 = vsel %vm6119_vm7, 4294967295, %v9858_v7  ;;  %vm6125_vm2 = vmor %vm733_vm0, %vm741_vm9  ;;  %1776 = vperm.xlu1 %3173, %v5329_v29  }
 0x290   : > { %vm6132_vm15 = vmor %vm765_vm3, %vm773_vm14  ;;  %vm9869_vm3 = vnez %v9851_v59  ;;  %vm9870_vm14 = vnez %v9853_v45  ;;  %v9902_v45 = vmov 0  }
 0x291   : > { %v9864_v10 = vsel %vm6132_vm15, 4294967295, %v9863_v10  ;;  %vm9865_vm8 = vmor %vm6055_vm11, %vm6043_vm4  ;;  %vm9876_vm4 = vnez %v9859_v7  ;;  %vm883_vm11 = vcmp.eq.s32.totalorder %v9837_v46, %v3547_v9  ;;  %v6490_v7 = vpop.permute.xlu1 %1648 }
 0x292   : > { %vm9866_vm9 = vmor %vm6036_vm10, %vm6049_vm13  ;;  %vm859_vm10 = vcmp.eq.s32.totalorder %v6018_v23, %v3547_v9 }
 0x293   : > { %vm6147_vm6 = vmor %vm9866_vm9, %vm9865_vm8  ;;  %vm875_vm9 = vcmp.eq.s32.totalorder %v9842_v55, %v3547_v9  ;;  %1779 = vperm.xlu1 %3173, %v5640_v18  }
 0x294   : > { %vm9871_vm0 = vmor %vm9869_vm3, %vm9870_vm14  ;;  %v558_v30 = vsel %vm6147_vm6, %v5243_v56, 0.0  ;;  %vm1143_vm6 = vcmp.eq.s32.totalorder %v6018_v23, %v3635_v13 }
 0x295   : > { %vm6156_vm15 = vmor %vm9871_vm0, %vm679_vm1  ;;  %vm9877_vm1 = vnez %v9864_v10  ;;  %vm891_vm0 = vcmp.eq.s32.totalorder %v9845_v36, %v3547_v9 }
 0x296   : > { %vm6160_vm7 = vmor %vm749_vm5, %vm757_vm12  ;;  %vm867_vm12 = vcmp.eq.s32.totalorder %v9836_v38, %v3547_v9  ;;  %vm915_vm5 = vcmp.eq.s32.totalorder %v6020_v27, %v3547_v9  ;;  %v700_v21 = vsel %vm6156_vm15, %v5251_v63, 0.0  ;;  %v6261_v63 = vstv %s224_s5 }
 0x297   : > { %vm813_vm13 = vmor %vm9876_vm4, %vm6125_vm2  ;;  %vm899_vm2 = vcmp.eq.s32.totalorder %v9838_v33, %v3547_v9  ;;  %1785 = vperm.xlu1 %3173, %v5680_v12   ;;  %v708_v56 = vadd.f32 %v700_v21, %v558_v30  ;;  %9892 = vst [vmem:[#allocation4_spill] sm:$0xff] %v6261_v63  ;;  %v1579_v5 = vadd.f32 %v6261_v63, %v1563_v47 }
 0x298   : > { %vm821_vm8 = vmor %vm6160_vm7, %vm9877_vm1  ;;  %vm907_vm7 = vcmp.eq.s32.totalorder %v9839_v44, %v3547_v9  ;;  %v1582_v1 = vadd.f32 %v6261_v63, %v1569_v52  ;;  %v1584_v50 = vadd.f32 %v6261_v63, %v1573_v41  ;;  %v1586_v47 = vadd.f32 %v6261_v63, %v1577_v40  ;;  %v1609_v40 = vld [vmem:[%s6257_s8 + $0x30] sm:$0xff] }
 0x299   : > { %vm6184_vm3 = vmor %vm859_vm10, %vm867_vm12  ;;  %vm1001_vm12 = vcmp.eq.s32.totalorder %v6018_v23, %v3584_v15 }
 0x29a   : > { %vm6191_vm14 = vmor %vm875_vm9, %vm883_vm11  ;;  %vm1025_vm9 = vcmp.eq.s32.totalorder %v9837_v46, %v3584_v15 }
 0x29b   : > { %vm6197_vm4 = vmor %vm907_vm7, %vm915_vm5  ;;  %vm1041_vm5 = vcmp.eq.s32.totalorder %v9838_v33, %v3584_v15  ;;  %vm1057_vm7 = vcmp.eq.s32.totalorder %v6020_v27, %v3584_v15  ;;  %1791 = vperm.xlu1 %3173, %v5707_v58  }
 0x29c   : > { %vm6201_vm10 = vmor %vm813_vm13, %vm821_vm8  ;;  %vm1009_vm8 = vcmp.eq.s32.totalorder %v9836_v38, %v3584_v15 }
 0x29d   : > { %vm939_vm1 = vmor %vm891_vm0, %vm899_vm2  ;;  %vm1017_vm2 = vcmp.eq.s32.totalorder %v9842_v55, %v3584_v15  ;;  %v842_v49 = vsel %vm6201_vm10, %v5283_v31, 0.0  ;;  %v9920_v31 = vmov 7  }
 0x29e   : > { %vm963_vm11 = vmor %vm939_vm1, %vm6197_vm4  ;;  %vm1049_vm1 = vcmp.eq.s32.totalorder %v9839_v44, %v3584_v15  ;;  %v850_v59 = vadd.f32 %v842_v49, %v708_v56 }
 0x29f   : > { %vm955_vm13 = vmor %vm6184_vm3, %vm6191_vm14  ;;  %vm1033_vm3 = vcmp.eq.s32.totalorder %v9845_v36, %v3584_v15  ;;  %3174 = vset.pattern.permute.xlu1 %v9895_v22 }
 0x2a0   : > { %vm6224_vm0 = vmor %vm1001_vm12, %vm1009_vm8  ;;  %1805 = vperm.xlu1 %3174, %v5795_v8  }
 0x2a1   : > { %vm6228_vm4 = vmor %vm955_vm13, %vm963_vm11  ;;  %vm1167_vm13 = vcmp.eq.s32.totalorder %v9837_v46, %v3635_v13 }
 0x2a2   : > { %vm6234_vm14 = vmor %vm1017_vm2, %vm1025_vm9  ;;  %vm1183_vm2 = vcmp.eq.s32.totalorder %v9838_v33, %v3635_v13  ;;  %v984_v29 = vsel %vm6228_vm4, %v5299_v0, 0.0  ;;  %vm1293_vm4 = vcmp.eq.s32.totalorder %v9836_v38, %v3687_v62 }
 0x2a3   : > { %vm1081_vm12 = vmor %vm1033_vm3, %vm1041_vm5  ;;  %vm1151_vm5 = vcmp.eq.s32.totalorder %v9836_v38, %v3635_v13  ;;  %v992_v28 = vadd.f32 %v984_v29, %v850_v59  ;;  %v1607_v29 = vld [vmem:[%s6257_s8 + $0x20] sm:$0xff] }
 0x2a4   : > { %vm1089_vm11 = vmor %vm1049_vm1, %vm1057_vm7  ;;  %vm1159_vm7 = vcmp.eq.s32.totalorder %v9842_v55, %v3635_v13  ;;  %1811 = vperm.xlu1 %3174, %v5640_v18  }
 0x2a5   : > { %vm1097_vm9 = vmor %vm6224_vm0, %vm6234_vm14  ;;  %vm1199_vm0 = vcmp.eq.s32.totalorder %v6020_v27, %v3635_v13  ;;  %vm1175_vm14 = vcmp.eq.s32.totalorder %v9845_v36, %v3635_v13  ;;  %v1565_v52 = vpop.xlane.xlu0 %1564 }
 0x2a6   : > { %vm1105_vm15 = vmor %vm1081_vm12, %vm1089_vm11  ;;  %vm1587_vm12 = vcmp.gt.f32.partialorder %v1579_v5, 0.0  ;;  %vm1191_vm11 = vcmp.eq.s32.totalorder %v9839_v44, %v3635_v13 }
 0x2a7   : > { %vm6263_vm8 = vmor %vm1097_vm9, %vm1105_vm15  ;;  %vm9185_vm9 = vcmask 7168   ;;  %v1595_v34 = vsel %vm1587_vm12, 1, %v9902_v45  ;;  %vm1301_vm12 = vcmp.eq.s32.totalorder %v9842_v55, %v3687_v62 }
 0x2a8   : > { %vm6277_vm3 = vmor %vm1143_vm6, %vm1151_vm5  ;;  %vm1611_vm15 = vcmp.eq.s32.totalorder %v1595_v34, %v1603_v26  ;;  %1814 = vperm.xlu1 %3174, %v5649_v35   ;;  %v1126_v30 = vsel %vm6263_vm8, %v5334_v57, 0.0 }
 0x2a9   : > { %vm6291_vm1 = vmor %vm1159_vm7, %vm1167_vm13  ;;  %vm1590_vm13 = vcmp.gt.f32.partialorder %v1582_v1, 0.0  ;;  %v1619_v17 = vsel %vm1611_vm15, 1, %v9902_v45  ;;  %vm1317_vm15 = vcmp.eq.s32.totalorder %v9845_v36, %v3687_v62  ;;  %v1134_v56 = vadd.f32 %v1126_v30, %v992_v28 }
 0x2aa   : > { %vm6301_vm10 = vmor %vm1175_vm14, %vm1183_vm2  ;;  %vm1285_vm2 = vcmp.eq.s32.totalorder %v6018_v23, %v3687_v62  ;;  %v1598_v10 = vsel %vm1590_vm13, 1, %v9902_v45  ;;  %1628 = vst.msk [vmem:[%s6309_s11] sm:$0xff] %vm9185_vm9, %v1619_v17 }
 0x2ab   : > { %vm6316_vm6 = vmor %vm1191_vm11, %vm1199_vm0  ;;  %vm1309_vm0 = vcmp.eq.s32.totalorder %v9837_v46, %v3687_v62  ;;  %vm1341_vm11 = vcmp.eq.s32.totalorder %v6020_v27, %v3687_v62 }
 0x2ac   : > { %vm1239_vm5 = vmor %vm6277_vm3, %vm6291_vm1  ;;  %vm1614_vm3 = vcmp.eq.s32.totalorder %v1598_v10, %v1606_v2  ;;  %vm1325_vm1 = vcmp.eq.s32.totalorder %v9838_v33, %v3687_v62  ;;  %1820 = vperm.xlu1 %3174, %v5693_v32   ;;  %v1605_v2 = vld [vmem:[%s6257_s8 + $0x10] sm:$0xff] }
 0x2ad   : > { %vm1247_vm7 = vmor %vm6301_vm10, %vm6316_vm6  ;;  %v1622_v0 = vsel %vm1614_vm3, 1, %v9902_v45  ;;  %vm1592_vm6 = vcmp.gt.f32.partialorder %v1584_v50, 0.0  ;;  %vm1427_vm3 = vcmp.eq.s32.totalorder %v6018_v23, %v3741_v11  ;;  %v1580_v23 = vadd.f32 %v6261_v63, %v1565_v52 }
 0x2ae   : > { %vm6341_vm14 = vmor %vm1239_vm5, %vm1247_vm7  ;;  %1631 = vst.msk [vmem:[%s6309_s11 + $0x18] sm:$0xff] %vm9185_vm9, %v1622_v0  ;;  %v1600_v16 = vsel %vm1592_vm6, 1, %v9902_v45  ;;  %vm1333_vm5 = vcmp.eq.s32.totalorder %v9839_v44, %v3687_v62  ;;  %vm1467_vm6 = vcmp.eq.s32.totalorder %v9838_v33, %v3741_v11 }
 0x2af   : > { %vm6358_vm10 = vmor %vm1285_vm2, %vm1293_vm4  ;;  %vm1616_vm7 = vcmp.eq.s32.totalorder %v1600_v16, %v1608_v39  ;;  %vm1594_vm4 = vcmp.gt.f32.partialorder %v1586_v47, 0.0  ;;  %v1268_v20 = vsel %vm6341_vm14, %v5353_v4, 0.0  ;;  %vm1483_vm14 = vcmp.eq.s32.totalorder %v6020_v27, %v3741_v11  ;;  %v1604_v27 = vld [vmem:[%s6257_s8 + $0x8] sm:$0xff] }
 0x2b0   : > { %vm6369_vm13 = vmor %vm1301_vm12, %vm1309_vm0  ;;  %v1624_v57 = vsel %vm1616_vm7, 1, %v9902_v45  ;;  %vm1451_vm12 = vcmp.eq.s32.totalorder %v9837_v46, %v3741_v11  ;;  %v1602_v5 = vsel %vm1594_vm4, 1, %v9902_v45  ;;  %v1276_v49 = vadd.f32 %v1268_v20, %v1134_v56  ;;  %1826 = vperm.xlu1 %3174, %v5755_v54  }
 0x2b1   : > { %vm6383_vm2 = vmor %vm1317_vm15, %vm1325_vm1  ;;  %1633 = vst.msk [vmem:[%s6309_s11 + $0x28] sm:$0xff] %vm9185_vm9, %v1624_v57  ;;  %vm1618_vm15 = vcmp.eq.s32.totalorder %v1602_v5, %v1610_v48  ;;  %vm1588_vm4 = vcmp.gt.f32.partialorder %v1580_v23, 0.0 }
 0x2b2   : > { %vm1373_vm0 = vmor %vm1333_vm5, %vm1341_vm11 }
 0x2b3   : > { %vm1381_vm8 = vmor %vm6358_vm10, %vm6369_vm13  ;;  %vm1435_vm10 = vcmp.eq.s32.totalorder %v9836_v38, %v3741_v11  ;;  %vm1443_vm13 = vcmp.eq.s32.totalorder %v9842_v55, %v3741_v11  ;;  %v1626_v38 = vsel %vm1618_vm15, 1, %v9902_v45 }
 0x2b4   : > { %vm1389_vm1 = vmor %vm6383_vm2, %vm1373_vm0  ;;  %vm1459_vm2 = vcmp.eq.s32.totalorder %v9845_v36, %v3741_v11  ;;  %1635 = vst.msk [vmem:[%s6309_s11 + $0x38] sm:$0xff] %vm9185_vm9, %v1626_v38  ;;  %vm1475_vm0 = vcmp.eq.s32.totalorder %v9839_v44, %v3741_v11  ;;  %v1596_v44 = vsel %vm1588_vm4, 1, %v9902_v45  ;;  %v9919_v36 = vmov 6  }
 0x2b5   : > { %vm6410_vm11 = vmor %vm1381_vm8, %vm1389_vm1  ;;  %3177 = vset.pattern.permute.xlu1 %v9919_v36 }
 0x2b6   : > { %vm6425_vm5 = vmor %vm1427_vm3, %vm1435_vm10  ;;  %v1410_v46 = vsel %vm6410_vm11, %v5373_v24, 0.0  ;;  %vm1612_vm10 = vcmp.eq.s32.totalorder %v1596_v44, %v1604_v27  ;;  %v6458_v24 = vld [vmem:[%s3257_s22 + $0x48] sm:$0xff] }
 0x2b7   : > { %vm6435_vm7 = vmor %vm1443_vm13, %vm1451_vm12  ;;  %v1418_v55 = vadd.f32 %v1410_v46, %v1276_v49  ;;  %v1620_v61 = vsel %vm1612_vm10, 1, %v9902_v45  ;;  %1840 = vperm.xlu1 %3177, %v6458_v24  }
 0x2b8   : > { %vm1507_vm8 = vmor %vm1459_vm2, %vm1467_vm6  ;;  %1629 = vst.msk [vmem:[%s6309_s11 + $0x8] sm:$0xff] %vm9185_vm9, %v1620_v61 }
 0x2b9   : > { %vm1515_vm3 = vmor %vm1475_vm0, %vm1483_vm14 }
 0x2ba   : > { %vm1523_vm1 = vmor %vm6425_vm5, %vm6435_vm7 }
 0x2bb   : > { %vm1531_vm12 = vmor %vm1507_vm8, %vm1515_vm3  ;;  %1843 = vperm.xlu1 %3177, %v5640_v18   ;;  %vm2542_vm8 = vcmp.eq.s32.totalorder %v6490_v7, %v3635_v13 }
 0x2bc   : > { %vm1539_vm6 = vmor %vm1523_vm1, %vm1531_vm12  ;;  %vm2683_vm12 = vcmp.eq.s32.totalorder %v6490_v7, %v3687_v62 }
 0x2bd   : > { %v1552_v1 = vsel %vm1539_vm6, %v5702_v37, 0.0 }
 0x2be   : > { %v1560_v59 = vadd.f32 %v1552_v1, %v1418_v55  ;;  %v9945_v1 = vmov 0 }
 0x2bf   : > { %1849 = vperm.xlu1 %3177, %v5680_v12  }
 0x2c0   : > { %1574 = vadd.xlane.f32.xlu0 %v1560_v59  ;;  %v9949_v59 = vmov 0 }
 0x2c3   : > { %1855 = vperm.xlu1 %3177, %v5707_v58  }
 0x2c7   : > { %3178 = vset.pattern.permute.xlu1 %v9920_v31 }
 0x2c8   : > { %1869 = vperm.xlu1 %3178, %v5795_v8  }
 0x2cc   : > { %1875 = vperm.xlu1 %3178, %v5640_v18  }
 0x2d0   : > { %1878 = vperm.xlu1 %3178, %v5649_v35  }
 0x2d4   : > { %1884 = vperm.xlu1 %3178, %v5693_v32  }
 0x2d6   : > { %1645 = vperm.xlu0 %3164, %v5795_v8  }
 0x2d8   : > { %1890 = vperm.xlu1 %3178, %v5755_v54  }
 0x2da   : > { %3167 = vset.pattern.permute.xlu0 %v9795_v19 }
 0x2db   : > { %1680 = vperm.xlu0 %3167, %v6458_v24  }
 0x2dd   : > { %v1567_v37 = vpop.xlane.xlu0 %1566 }
 0x2de   : > { %v1581_v34 = vadd.f32 %v6261_v63, %v1567_v37  ;;  %v9953_v37 = vmov 0 }
 0x2df   : > { %1689 = vperm.xlu0 %3167, %v5680_v12  }
 0x2e0   : > { %vm1589_vm11 = vcmp.gt.f32.partialorder %v1581_v34, 0.0 }
 0x2e1   : > { %v1597_v18 = vsel %vm1589_vm11, 1, %v9902_v45 }
 0x2e2   : > { %vm1613_vm15 = vcmp.eq.s32.totalorder %v1597_v18, %v1605_v2  ;;  %v9956_v18 = vmov 0 }
 0x2e3   : > { %1695 = vperm.xlu0 %3167, %v5707_v58   ;;  %v1621_v19 = vsel %vm1613_vm15, 1, %v9902_v45  ;;  %vm2824_vm15 = vcmp.eq.s32.totalorder %v6490_v7, %v3741_v11 }
 0x2e4   : > { %1630 = vst.msk [vmem:[%s6309_s11 + $0x10] sm:$0xff] %vm9185_vm9, %v1621_v19  ;;  %v9958_v19 = vmov 0 }
 0x2e7   : > { %3168 = vset.pattern.permute.xlu0 %v9830_v42  ;;  %v6494_v42 = vpop.permute.xlu1 %1651 }
 0x2e8   : > { %1709 = vperm.xlu0 %3168, %v5795_v8   ;;  %9921 = vst [vmem:[#allocation3_spill] sm:$0xff] %v6494_v42  ;;  %v10029_v42 = vmov 0 }
 0x2eb   : > { %v6498_v17 = vpop.permute.xlu1 %1654 }
 0x2ec   : > { %1718 = vperm.xlu0 %3168, %v5649_v35   ;;  %9922 = vst [vmem:[#allocation12_spill] sm:$0xff] %v6498_v17 }
 0x2f0   : > { %1724 = vperm.xlu0 %3168, %v5693_v32  }
 0x2f4   : > { %1730 = vperm.xlu0 %3168, %v5755_v54  }
 0x2f8   : > { %3171 = vset.pattern.permute.xlu0 %v9835_v51  ;;  %v6502_v51 = vpop.permute.xlu1 %1657 }
 0x2f9   : > { %1744 = vperm.xlu0 %3171, %v6458_v24  }
 0x2fc   : > { %v6505_v10 = vpop.permute.xlu1 %1660 }
 0x2fd   : > { %1753 = vperm.xlu0 %3171, %v5680_v12   ;;  %9923 = vst [vmem:[#allocation18_spill] sm:$0xff] %v6505_v10 }
 0x300   : > { %v6512_v28 = vpop.permute.xlu1 %1663 }
 0x301   : > { %1759 = vperm.xlu0 %3171, %v5707_v58  }
 0x305   : > { %3172 = vset.pattern.permute.xlu0 %v9862_v43 }
 0x306   : > { %1773 = vperm.xlu0 %3172, %v5795_v8  }
 0x30a   : > { %1782 = vperm.xlu0 %3172, %v5649_v35  }
 0x30e   : > { %1788 = vperm.xlu0 %3172, %v5693_v32  }
 0x312   : > { %1794 = vperm.xlu0 %3172, %v5755_v54  }
 0x315   : > { %v1571_v41 = vpop.xlane.xlu0 %1570 }
 0x316   : > { %3175 = vset.pattern.permute.xlu0 %v9895_v22  ;;  %v1583_v43 = vadd.f32 %v6261_v63, %v1571_v41  ;;  %v6519_v22 = vpop.permute.xlu1 %1666  ;;  %v9960_v41 = vmov 0 }
 0x317   : > { %1808 = vperm.xlu0 %3175, %v6458_v24   ;;  %9924 = vst [vmem:[#allocation21_spill] sm:$0xff] %v6519_v22 }
 0x318   : > { %vm1591_vm13 = vcmp.gt.f32.partialorder %v1583_v43, 0.0  ;;  %v9962_v43 = vmov 0 }
 0x319   : > { %v1599_v50 = vsel %vm1591_vm13, 1, %v9902_v45  ;;  %vm1672_vm13 = vcmp.eq.s32.totalorder %v6502_v51, %v3458_v3 }
 0x31a   : > { %vm1615_vm14 = vcmp.eq.s32.totalorder %v1599_v50, %v1607_v29  ;;  %v6523_v0 = vpop.permute.xlu1 %1677  ;;  %v9965_v50 = vmov 0 }
 0x31b   : > { %1817 = vperm.xlu0 %3175, %v5680_v12   ;;  %v1623_v25 = vsel %vm1615_vm14, 1, %v9902_v45  ;;  %9925 = vst [vmem:[#allocation9_spill] sm:$0xff] %v6523_v0  ;;  %v7102_v0 = vld [vmem:[%s9103_s2] ss:$0 sm:$0xff] }
 0x31c   : > { %1632 = vst.msk [vmem:[%s6309_s11 + $0x20] sm:$0xff] %vm9185_vm9, %v1623_v25  ;;  %v9967_v25 = vmov 0 }
 0x31e   : > { %v6527_v39 = vpop.permute.xlu1 %1683 }
 0x31f   : > { %1823 = vperm.xlu0 %3175, %v5707_v58   ;;  %9926 = vst [vmem:[#allocation15_spill] sm:$0xff] %v6527_v39  ;;  %v10032_v39 = vmov 0 }
 0x322   : > { %v6530_v53 = vpop.permute.xlu1 %1686 }
 0x323   : > { %3176 = vset.pattern.permute.xlu0 %v9919_v36  ;;  %9927 = vst [vmem:[#allocation6_spill] sm:$0xff] %v6530_v53  ;;  %v9943_v36 = vmov 0  ;;  %v10008_v53 = vmov 0 }
 0x324   : > { %1837 = vperm.xlu0 %3176, %v5795_v8  }
 0x326   : > { %v6534_v60 = vpop.permute.xlu1 %1692 }
 0x327   : > { %9928 = vst [vmem:[#allocation13_spill] sm:$0xff] %v6534_v60 }
 0x328   : > { %1846 = vperm.xlu0 %3176, %v5649_v35  }
 0x32a   : > { %v6538_v35 = vpop.permute.xlu1 %1698 }
 0x32b   : > { %9929 = vst [vmem:[#allocation19_spill] sm:$0xff] %v6538_v35 }
 0x32c   : > { %1852 = vperm.xlu0 %3176, %v5693_v32  }
 0x32e   : > { %v6540_v32 = vpop.permute.xlu1 %1712 }
 0x330   : > { %1858 = vperm.xlu0 %3176, %v5755_v54  }
 0x332   : > { %v6542_v8 = vpop.permute.xlu1 %1715 }
 0x333   : > { %9930 = vst [vmem:[#allocation16_spill] sm:$0xff] %v6542_v8  ;;  %v10017_v8 = vmov 0 }
 0x334   : > { %3179 = vset.pattern.permute.xlu0 %v9920_v31  ;;  %v9951_v31 = vmov 0 }
 0x335   : > { %1872 = vperm.xlu0 %3179, %v6458_v24   ;;  %v9947_v24 = vmov 0 }
 0x336   : > { %v6546_v30 = vpop.permute.xlu1 %1721 }
 0x339   : > { %1881 = vperm.xlu0 %3179, %v5680_v12  }
 0x33a   : > { %v6554_v47 = vpop.permute.xlu1 %1727 }
 0x33b   : > { %9932 = vst [vmem:[#allocation10_spill] sm:$0xff] %v6554_v47 }
 0x33d   : > { %1887 = vperm.xlu0 %3179, %v5707_v58  }
 0x33e   : > { %v6558_v57 = vpop.permute.xlu1 %1741 }
 0x33f   : > { %9933 = vst [vmem:[#allocation8_spill] sm:$0xff] %v6558_v57  ;;  %v10043_v57 = vmov 0 }
 0x342   : > { %v6562_v5 = vpop.permute.xlu1 %1747 }
 0x343   : > { %9934 = vst [vmem:[#allocation14_spill] sm:$0xff] %v6562_v5  ;;  %v10027_v5 = vmov 0 }
 0x346   : > { %v6568_v52 = vpop.permute.xlu1 %1750 }
 0x347   : > { %9936 = vst [vmem:[#allocation17_spill] sm:$0xff] %v6568_v52  ;;  %v9999_v52 = vmov 0 }
 0x34a   : > { %v6572_v4 = vpop.permute.xlu1 %1756 }
 0x34b   : > { %9938 = vst [vmem:[#allocation11_spill] sm:$0xff] %v6572_v4  ;;  %v9986_v4 = vmov 0 }
 0x34d   : > { %v1575_v54 = vpop.xlane.xlu0 %1574 }
 0x34e   : > { %v1585_v16 = vadd.f32 %v6261_v63, %v1575_v54  ;;  %v6578_v23 = vpop.permute.xlu1 %1762 }
 0x34f   : > { %9941 = vst [vmem:[#allocation24_spill] sm:$0xff] %v6578_v23  ;;  %v9978_v23 = vmov 0 }
 0x350   : > { %vm1593_vm5 = vcmp.gt.f32.partialorder %v1585_v16, 0.0  ;;  %v9969_v16 = vmov 0 }
 0x351   : > { %v1601_v21 = vsel %vm1593_vm5, 1, %v9902_v45  ;;  %vm1981_vm5 = vcmp.eq.s32.totalorder %v6502_v51, %v3465_v6 }
 0x352   : > { %vm1617_vm2 = vcmp.eq.s32.totalorder %v1601_v21, %v1609_v40  ;;  %v6582_v46 = vpop.permute.xlu1 %1776  ;;  %v9971_v40 = vmov 0 }
 0x353   : > { %v1625_v12 = vsel %vm1617_vm2, 1, %v9902_v45  ;;  %vm2558_vm2 = vcmp.eq.s32.totalorder %v6540_v32, %v3635_v13 }
 0x354   : > { %1634 = vst.msk [vmem:[%s6309_s11 + $0x30] sm:$0xff] %vm9185_vm9, %v1625_v12  ;;  %v9974_v12 = vmov 0 }
 0x355   : > { %v6552_v58 = vpop.permute.xlu0 %1645 }
 0x356   : > { %9931 = vst [vmem:[#allocation5_spill] sm:$0xff] %v6552_v58  ;;  %v6596_v44 = vpop.permute.xlu1 %1779  ;;  %v10058_v58 = vmov 0 }
 0x357   : > { %9942 = vst [vmem:[#allocation25_spill] sm:$0xff] %v6596_v44 }
 0x35a   : > { %v6556_v56 = vpop.permute.xlu0 %1680  ;;  %v6656_v2 = vpop.permute.xlu1 %1785 }
 0x35b   : > { %vm2550_vm7 = vcmp.eq.s32.totalorder %v6556_v56, %v3635_v13  ;;  %vm2691_vm0 = vcmp.eq.s32.totalorder %v6556_v56, %v3687_v62  ;;  %vm2832_vm3 = vcmp.eq.s32.totalorder %v6556_v56, %v3741_v11 }
 0x35c   : > { %vm6598_vm1 = vmor %vm2542_vm8, %vm2550_vm7 }
 0x35d   : > { %v9944_v36 = vsel %vm6598_vm1, 4294967295, %v9943_v36  ;;  %vm6610_vm11 = vmor %vm2683_vm12, %vm2691_vm0  ;;  %vm1997_vm1 = vcmp.eq.s32.totalorder %v6546_v30, %v3465_v6 }
 0x35e   : > { %v6560_v48 = vpop.permute.xlu0 %1689  ;;  %v9946_v1 = vsel %vm6610_vm11, 4294967295, %v9945_v1  ;;  %vm6618_vm14 = vmor %vm2824_vm15, %vm2832_vm3  ;;  %vm2699_vm15 = vcmp.eq.s32.totalorder %v6540_v32, %v3687_v62  ;;  %v6720_v54 = vpop.permute.xlu1 %1791 }
 0x35f   : > { %vm1704_vm4 = vcmp.eq.s32.totalorder %v6560_v48, %v3458_v3  ;;  %vm1989_vm10 = vcmp.eq.s32.totalorder %v6560_v48, %v3465_v6  ;;  %v9948_v24 = vsel %vm6618_vm14, 4294967295, %v9947_v24  ;;  %vm2130_vm8 = vcmp.eq.s32.totalorder %v6560_v48, %v3500_v14 }
 0x360   : > { %vm6628_vm0 = vmor %vm1672_vm13, %vm1704_vm4  ;;  %vm2122_vm13 = vcmp.eq.s32.totalorder %v6502_v51, %v3500_v14  ;;  %vm1736_vm4 = vcmp.eq.s32.totalorder %v6546_v30, %v3458_v3  ;;  %vm1738_vm14 = vcmp.eq.s32.totalorder %v6554_v47, %v3458_v3 }
 0x361   : > { %v9950_v59 = vsel %vm6628_vm0, 4294967295, %v9949_v59  ;;  %vm6638_vm12 = vmor %vm1981_vm5, %vm1989_vm10  ;;  %vm2271_vm10 = vcmp.eq.s32.totalorder %v6560_v48, %v3547_v9 }
 0x362   : > { %v6564_v20 = vpop.permute.xlu0 %1695  ;;  %v9954_v37 = vsel %vm6638_vm12, 4294967295, %v9953_v37  ;;  %v6772_v35 = vpop.permute.xlu1 %1805 }
 0x363   : > { %9981 = vst [vmem:[#allocation30_spill] sm:$0xff] %v6772_v35 }
 0x366   : > { %v6806_v10 = vpop.permute.xlu1 %1811 }
 0x367   : > { %v6566_v26 = vpop.permute.xlu0 %1709  ;;  %9988 = vst [vmem:[#allocation31_spill] sm:$0xff] %v6806_v10  ;;  %v10021_v10 = vmov 0 }
 0x368   : > { %9935 = vst [vmem:[#allocation20_spill] sm:$0xff] %v6566_v26 }
 0x36a   : > { %v6810_v45 = vpop.permute.xlu1 %1814 }
 0x36b   : > { %v6570_v49 = vpop.permute.xlu0 %1718  ;;  %9989 = vst [vmem:[#allocation32_spill] sm:$0xff] %v6810_v45  ;;  %v9992_v45 = vmov 0 }
 0x36c   : > { %9937 = vst [vmem:[#allocation7_spill] sm:$0xff] %v6570_v49  ;;  %v10002_v49 = vmov 0 }
 0x36f   : > { %v6574_v38 = vpop.permute.xlu0 %1724 }
 0x370   : > { %9939 = vst [vmem:[#allocation22_spill] sm:$0xff] %v6574_v38 }
 0x373   : > { %v6576_v33 = vpop.permute.xlu0 %1730 }
 0x374   : > { %9940 = vst [vmem:[#allocation23_spill] sm:$0xff] %v6576_v33  ;;  %v9976_v33 = vmov 0 }
 0x378   : > { %v6580_v27 = vpop.permute.xlu0 %1744 }
 0x379   : > { %vm2566_vm6 = vcmp.eq.s32.totalorder %v6580_v27, %v3635_v13  ;;  %vm2707_vm7 = vcmp.eq.s32.totalorder %v6580_v27, %v3687_v62 }
 0x37a   : > { %vm6634_vm3 = vmor %vm2558_vm2, %vm2566_vm6  ;;  %vm2848_vm6 = vcmp.eq.s32.totalorder %v6580_v27, %v3741_v11 }
 0x37b   : > { %v9952_v31 = vsel %vm6634_vm3, 4294967295, %v9951_v31  ;;  %vm6658_vm5 = vmor %vm2699_vm15, %vm2707_vm7  ;;  %vm2840_vm3 = vcmp.eq.s32.totalorder %v6540_v32, %v3741_v11  ;;  %vm2263_vm7 = vcmp.eq.s32.totalorder %v6502_v51, %v3547_v9 }
 0x37c   : > { %v6584_v55 = vpop.permute.xlu0 %1753  ;;  %v9957_v18 = vsel %vm6658_vm5, 4294967295, %v9956_v18  ;;  %vm6662_vm2 = vmor %vm2122_vm13, %vm2130_vm8  ;;  %vm2412_vm8 = vcmp.eq.s32.totalorder %v6560_v48, %v3584_v15 }
 0x37d   : > { %v9959_v19 = vsel %vm6662_vm2, 4294967295, %v9958_v19  ;;  %vm1768_vm9 = vcmp.eq.s32.totalorder %v6584_v55, %v3458_v3  ;;  %vm6678_vm15 = vmor %vm2840_vm3, %vm2848_vm6  ;;  %vm2005_vm5 = vcmp.eq.s32.totalorder %v6584_v55, %v3465_v6  ;;  %vm2404_vm6 = vcmp.eq.s32.totalorder %v6502_v51, %v3584_v15 }
 0x37e   : > { %v9961_v41 = vsel %vm6678_vm15, 4294967295, %v9960_v41  ;;  %vm6682_vm13 = vmor %vm2263_vm7, %vm2271_vm10  ;;  %vm2553_vm10 = vcmp.eq.s32.totalorder %v6560_v48, %v3635_v13  ;;  %vm2146_vm15 = vcmp.eq.s32.totalorder %v6584_v55, %v3500_v14  ;;  %vm2428_vm12 = vcmp.eq.s32.totalorder %v6584_v55, %v3584_v15 }
 0x37f   : > { %v9963_v43 = vsel %vm6682_vm13, 4294967295, %v9962_v43  ;;  %vm6700_vm7 = vmor %vm1736_vm4, %vm1768_vm9  ;;  %vm2545_vm9 = vcmp.eq.s32.totalorder %v6502_v51, %v3635_v13  ;;  %vm2694_vm4 = vcmp.eq.s32.totalorder %v6560_v48, %v3687_v62 }
 0x380   : > { %v6606_v61 = vpop.permute.xlu0 %1759  ;;  %v9966_v50 = vsel %vm6700_vm7, 4294967295, %v9965_v50  ;;  %vm6704_vm11 = vmor %vm2404_vm6, %vm2412_vm8  ;;  %vm2138_vm7 = vcmp.eq.s32.totalorder %v6546_v30, %v3500_v14 }
 0x381   : > { %v9968_v25 = vsel %vm6704_vm11, 4294967295, %v9967_v25  ;;  %vm6722_vm8 = vmor %vm1997_vm1, %vm2005_vm5  ;;  %vm2287_vm1 = vcmp.eq.s32.totalorder %v6584_v55, %v3547_v9  ;;  %vm2686_vm5 = vcmp.eq.s32.totalorder %v6502_v51, %v3687_v62  ;;  %vm2002_vm11 = vcmp.eq.s32.totalorder %v6580_v27, %v3465_v6 }
 0x382   : > { %v9970_v16 = vsel %vm6722_vm8, 4294967295, %v9969_v16  ;;  %vm6726_vm6 = vmor %vm2545_vm9, %vm2553_vm10  ;;  %vm2279_vm8 = vcmp.eq.s32.totalorder %v6546_v30, %v3547_v9 }
 0x383   : > { %v9972_v40 = vsel %vm6726_vm6, 4294967295, %v9971_v40  ;;  %vm6742_vm10 = vmor %vm2138_vm7, %vm2146_vm15  ;;  %vm2420_vm7 = vcmp.eq.s32.totalorder %v6546_v30, %v3584_v15  ;;  %vm2710_vm15 = vcmp.eq.s32.totalorder %v6584_v55, %v3687_v62  ;;  %vm1983_vm6 = vcmp.eq.s32.totalorder %v6512_v28, %v3465_v6 }
 0x384   : > { %v9975_v12 = vsel %vm6742_vm10, 4294967295, %v9974_v12  ;;  %vm6746_vm9 = vmor %vm2686_vm5, %vm2694_vm4  ;;  %vm2569_vm4 = vcmp.eq.s32.totalorder %v6584_v55, %v3635_v13 }
 0x385   : > { %v6642_v34 = vpop.permute.xlu0 %1773  ;;  %v9977_v33 = vsel %vm6746_vm9, 4294967295, %v9976_v33  ;;  %vm6758_vm0 = vmor %vm2279_vm8, %vm2287_vm1  ;;  %vm2561_vm1 = vcmp.eq.s32.totalorder %v6546_v30, %v3635_v13  ;;  %vm1674_vm9 = vcmp.eq.s32.totalorder %v6512_v28, %v3458_v3 }
 0x386   : > { %9955 = vst [vmem:[#allocation26_spill] sm:$0xff] %v6642_v34  ;;  %v9979_v23 = vsel %vm6758_vm0, 4294967295, %v9978_v23  ;;  %vm6774_vm5 = vmor %vm2420_vm7, %vm2428_vm12  ;;  %vm2702_vm7 = vcmp.eq.s32.totalorder %v6546_v30, %v3687_v62  ;;  %vm1765_vm12 = vcmp.eq.s32.totalorder %v6580_v27, %v3458_v3  ;;  %v10039_v34 = vmov 0 }
 0x387   : > { %vm6786_vm3 = vmor %vm2561_vm1, %vm2569_vm4  ;;  %vm2835_vm1 = vcmp.eq.s32.totalorder %v6560_v48, %v3741_v11  ;;  %v6830_v48 = vpop.permute.xlu1 %1820  ;;  %vm1669_vm4 = vcmp.eq.s32.totalorder %v6490_v7, %v3458_v3 }
 0x388   : > { %vm6798_vm8 = vmor %vm2702_vm7, %vm2710_vm15  ;;  %vm1706_vm15 = vcmp.eq.s32.totalorder %v6564_v20, %v3458_v3  ;;  %9991 = vst [vmem:[#allocation34_spill] sm:$0xff] %v6830_v48  ;;  %v9997_v48 = vmov 0 }
 0x389   : > { %v6690_v29 = vpop.permute.xlu0 %1782  ;;  %v9987_v4 = vsel %vm6798_vm8, 4294967295, %v9986_v4  ;;  %vm2827_vm8 = vcmp.eq.s32.totalorder %v6502_v51, %v3741_v11  ;;  %vm6846_vm0 = vmor %vm1674_vm9, %vm1706_vm15  ;;  %v9994_v51 = vmov 0  ;;  %vm2843_vm9 = vcmp.eq.s32.totalorder %v6546_v30, %v3741_v11 }
 0x38a   : > { %9964 = vst [vmem:[#allocation27_spill] sm:$0xff] %v6690_v29  ;;  %vm6834_vm7 = vmor %vm2827_vm8, %vm2835_vm1  ;;  %v9995_v51 = vsel %vm6846_vm0, 4294967295, %v9994_v51  ;;  %vm9996_vm1 = vcmp.eq.s32.totalorder %v6556_v56, %v3458_v3  ;;  %vm10001_vm15 = vcmp.eq.s32.totalorder %v6564_v20, %v3465_v6  ;;  %v10006_v30 = vmov 0 }
 0x38b   : > { %v9993_v45 = vsel %vm6834_vm7, 4294967295, %v9992_v45  ;;  %vm6868_vm10 = vmor %vm1983_vm6, %vm10001_vm15  ;;  %vm1978_vm6 = vcmp.eq.s32.totalorder %v6490_v7, %v3465_v6  ;;  %v6920_v44 = vpop.permute.xlu1 %1826  ;;  %vm10047_vm0 = vcmp.eq.s32.totalorder %v6582_v46, %v3465_v6 }
 0x38c   : > { %v10003_v49 = vsel %vm6868_vm10, 4294967295, %v10002_v49  ;;  %10015 = vst [vmem:[#allocation36_spill] sm:$0xff] %v6920_v44 }
 0x38d   : > { %v6730_v21 = vpop.permute.xlu0 %1788 }
 0x38e   : > { %9973 = vst [vmem:[#allocation28_spill] sm:$0xff] %v6730_v21  ;;  %v9982_v21 = vmov 0 }
 0x38f   : > { %v9983_v21 = vsel %vm6774_vm5, 4294967295, %v9982_v21  ;;  %vm1733_vm5 = vcmp.eq.s32.totalorder %v6540_v32, %v3458_v3 }
 0x390   : > { %vm6859_vm13 = vmor %vm1733_vm5, %vm1765_vm12  ;;  %vm10005_vm12 = vcmp.eq.s32.totalorder %v6584_v55, %v3741_v11  ;;  %vm2124_vm5 = vcmp.eq.s32.totalorder %v6512_v28, %v3500_v14  ;;  %v10011_v55 = vmov 0 }
 0x391   : > { %v6762_v22 = vpop.permute.xlu0 %1794  ;;  %v10000_v52 = vsel %vm6859_vm13, 4294967295, %v9999_v52  ;;  %vm6883_vm8 = vmor %vm2843_vm9, %vm10005_vm12  ;;  %vm10010_vm9 = vcmp.eq.s32.totalorder %v6556_v56, %v3465_v6 }
 0x392   : > { %9980 = vst [vmem:[#allocation29_spill] sm:$0xff] %v6762_v22  ;;  %v9984_v22 = vmov 0  ;;  %v10007_v30 = vsel %vm6883_vm8, 4294967295, %v10006_v30  ;;  %vm6902_vm12 = vmor %vm1978_vm6, %vm10010_vm9  ;;  %vm2135_vm9 = vcmp.eq.s32.totalorder %v6540_v32, %v3500_v14  ;;  %vm10020_vm8 = vcmp.eq.s32.totalorder %v6580_v27, %v3500_v14 }
 0x393   : > { %v9985_v22 = vsel %vm6786_vm3, 4294967295, %v9984_v22  ;;  %vm6855_vm3 = vmor %vm1669_vm4, %vm9996_vm1  ;;  %vm2132_vm4 = vcmp.eq.s32.totalorder %v6564_v20, %v3500_v14  ;;  %vm1994_vm1 = vcmp.eq.s32.totalorder %v6540_v32, %v3465_v6  ;;  %v10012_v55 = vsel %vm6902_vm12, 4294967295, %v10011_v55 }
 0x394   : > { %v9998_v48 = vsel %vm6855_vm3, 4294967295, %v9997_v48  ;;  %vm6889_vm15 = vmor %vm1994_vm1, %vm2002_vm11  ;;  %vm2284_vm11 = vcmp.eq.s32.totalorder %v6580_v27, %v3547_v9  ;;  %vm10023_vm1 = vcmp.eq.s32.totalorder %v6556_v56, %v3500_v14 }
 0x395   : > { %v10009_v53 = vsel %vm6889_vm15, 4294967295, %v10008_v53  ;;  %vm6912_vm2 = vmor %vm2124_vm5, %vm2132_vm4  ;;  %vm10016_vm4 = vcmp.eq.s32.totalorder %v6606_v61, %v3458_v3  ;;  %vm2119_vm15 = vcmp.eq.s32.totalorder %v6490_v7, %v3500_v14 }
 0x396   : > { %v6796_v38 = vpop.permute.xlu0 %1808  ;;  %vm6929_vm5 = vmor %vm1738_vm14, %vm10016_vm4  ;;  %vm2265_vm14 = vcmp.eq.s32.totalorder %v6512_v28, %v3547_v9  ;;  %vm1999_vm4 = vcmp.eq.s32.totalorder %v6554_v47, %v3465_v6 }
 0x397   : > { %v10018_v8 = vsel %vm6929_vm5, 4294967295, %v10017_v8  ;;  %vm6944_vm7 = vmor %vm2135_vm9, %vm10020_vm8  ;;  %vm2276_vm8 = vcmp.eq.s32.totalorder %v6540_v32, %v3547_v9  ;;  %vm10035_vm9 = vcmp.eq.s32.totalorder %v6582_v46, %v3458_v3  ;;  %vm10051_vm5 = vnez %v10012_v55 }
 0x398   : > { %v10022_v10 = vsel %vm6944_vm7, 4294967295, %v10021_v10  ;;  %vm6955_vm6 = vmor %vm2119_vm15, %vm10023_vm1  ;;  %vm10026_vm7 = vcmp.eq.s32.totalorder %v6564_v20, %v3547_v9 }
 0x399   : > { %vm6970_vm12 = vmor %vm2265_vm14, %vm10026_vm7  ;;  %vm2148_vm7 = vcmp.eq.s32.totalorder %v6606_v61, %v3500_v14 }
 0x39a   : > { %v6808_v60 = vpop.permute.xlu0 %1817  ;;  %v10028_v5 = vsel %vm6970_vm12, 4294967295, %v10027_v5  ;;  %vm6974_vm15 = vmor %vm2276_vm8, %vm2284_vm11  ;;  %vm2018_vm11 = vcmp.eq.s32.totalorder %v6796_v38, %v3465_v6  ;;  %vm10034_vm8 = vcmp.eq.s32.totalorder %v6796_v38, %v3458_v3  ;;  %vm10075_vm12 = vnez %v10009_v53 }
 0x39b   : > { %v10030_v42 = vsel %vm6974_vm15, 4294967295, %v10029_v42  ;;  %vm6999_vm1 = vmor %vm10035_vm9, %vm10034_vm8  ;;  %vm2409_vm9 = vcmp.eq.s32.totalorder %v6556_v56, %v3584_v15  ;;  %vm2417_vm8 = vcmp.eq.s32.totalorder %v6540_v32, %v3584_v15  ;;  %vm2140_vm15 = vcmp.eq.s32.totalorder %v6554_v47, %v3500_v14 }
 0x39c   : > { %v10048_v32 = vmov 0 }
 0x39e   : > { %v6812_v63 = vpop.permute.xlu0 %1823 }
 0x3a3   : > { %v6824_v29 = vpop.permute.xlu0 %1837 }
 0x3a4   : > { %9990 = vst [vmem:[#allocation33_spill] sm:$0xff] %v6824_v29  ;;  %v10036_v29 = vmov 0 }
 0x3a5   : > { %v10037_v29 = vsel %vm6999_vm1, 4294967295, %v10036_v29 }
 0x3a7   : > { %v6878_v17 = vpop.permute.xlu0 %1846 }
 0x3a8   : > { %10004 = vst [vmem:[#allocation35_spill] sm:$0xff] %v6878_v17  ;;  %v10013_v17 = vmov 0 }
 0x3a9   : > { %v10014_v17 = vsel %vm6912_vm2, 4294967295, %v10013_v17  ;;  %vm2268_vm2 = vcmp.eq.s32.totalorder %v6556_v56, %v3547_v9  ;;  %v10045_v56 = vmov 0 }
 0x3ab   : > { %v6937_v44 = vpop.permute.xlu0 %1852 }
 0x3ac   : > { %10019 = vst [vmem:[#allocation37_spill] sm:$0xff] %v6937_v44  ;;  %v10024_v44 = vmov 0 }
 0x3ad   : > { %v10025_v44 = vsel %vm6955_vm6, 4294967295, %v10024_v44  ;;  %vm10031_vm6 = vcmp.eq.s32.totalorder %v6606_v61, %v3465_v6 }
 0x3ae   : > { %vm6983_vm10 = vmor %vm1999_vm4, %vm10031_vm6  ;;  %vm2260_vm6 = vcmp.eq.s32.totalorder %v6490_v7, %v3547_v9 }
 0x3af   : > { %v10033_v39 = vsel %vm6983_vm10, 4294967295, %v10032_v39  ;;  %v7005_v35 = vpop.permute.xlu0 %1858  ;;  %vm7011_vm14 = vmor %vm2260_vm6, %vm2268_vm2  ;;  %vm10042_vm2 = vcmp.eq.s32.totalorder %v6580_v27, %v3584_v15  ;;  %v10052_v27 = vmov 0 }
 0x3b0   : > { %10038 = vst [vmem:[#allocation38_spill] sm:$0xff] %v7005_v35  ;;  %v10040_v34 = vsel %vm7011_vm14, 4294967295, %v10039_v34  ;;  %v7025_v35 = vpop.permute.xlu1 %1840  ;;  %vm7030_vm6 = vmor %vm2417_vm8, %vm10042_vm2  ;;  %vm2289_vm14 = vcmp.eq.s32.totalorder %v6606_v61, %v3547_v9  ;;  %vm2151_vm8 = vcmp.eq.s32.totalorder %v6582_v46, %v3500_v14  ;;  %vm2159_vm2 = vcmp.eq.s32.totalorder %v6796_v38, %v3500_v14 }
 0x3b1   : > { %v10044_v57 = vsel %vm7030_vm6, 4294967295, %v10043_v57  ;;  %vm7034_vm4 = vmor %vm2140_vm15, %vm2148_vm7  ;;  %vm2401_vm15 = vcmp.eq.s32.totalorder %v6490_v7, %v3584_v15  ;;  %vm1861_vm3 = vcmp.eq.s32.totalorder %v7025_v35, %v3458_v3  ;;  %v10055_v7 = vmov 0 }
 0x3b2   : > { %v10046_v56 = vsel %vm7034_vm4, 4294967295, %v10045_v56  ;;  %vm7043_vm10 = vmor %vm10047_vm0, %vm2018_vm11  ;;  %vm2300_vm11 = vcmp.eq.s32.totalorder %v6796_v38, %v3547_v9 }
 0x3b3   : > { %v10049_v32 = vsel %vm7043_vm10, 4294967295, %v10048_v32  ;;  %vm7057_vm13 = vmor %vm2401_vm15, %vm2409_vm9  ;;  %vm2281_vm10 = vcmp.eq.s32.totalorder %v6554_v47, %v3547_v9  ;;  %vm2292_vm15 = vcmp.eq.s32.totalorder %v6582_v46, %v3547_v9  ;;  %v10063_v47 = vmov 0 }
 0x3b4   : > { %v10053_v27 = vsel %vm7057_vm13, 4294967295, %v10052_v27  ;;  %vm7069_vm1 = vmor %vm2281_vm10, %vm2289_vm14  ;;  %v7073_v26 = vpop.permute.xlu0 %1872  ;;  %vm10061_vm14 = vnez %v10025_v44  ;;  %vm10062_vm13 = vnez %v10037_v29  ;;  %vm2167_vm10 = vcmp.eq.s32.totalorder %v7025_v35, %v3500_v14  ;;  %v7160_v29 = vld [vmem:[%s9103_s2 + $0x2] ss:$0 sm:$0xff]  ;;  %v7206_v44 = vpop.permute.xlu1 %1843 }
 0x3b5   : > { %v10056_v7 = vsel %vm7069_vm1, 4294967295, %v10055_v7  ;;  %vm7075_vm9 = vmor %vm2151_vm8, %vm2159_vm2  ;;  %vm1893_vm6 = vcmp.eq.s32.totalorder %v7073_v26, %v3458_v3  ;;  %vm2026_vm2 = vcmp.eq.s32.totalorder %v7025_v35, %v3465_v6  ;;  %vm2034_vm0 = vcmp.eq.s32.totalorder %v7073_v26, %v3465_v6 }
 0x3b6   : > { %10057 = vst [vmem:[#allocation39_spill] sm:$0xff] %v10056_v7  ;;  %v10059_v58 = vsel %vm7075_vm9, 4294967295, %v10058_v58  ;;  %vm1925_vm9 = vmor %vm1861_vm3, %vm1893_vm6  ;;  %vm2433_vm8 = vcmp.eq.s32.totalorder %v6582_v46, %v3584_v15  ;;  %vm2441_vm1 = vcmp.eq.s32.totalorder %v6796_v38, %v3584_v15  ;;  %vm10065_vm3 = vnez %v9998_v48  ;;  %v7128_v7 = vld [vmem:[%s9103_s2 + $0x1] ss:$0 sm:$0xff] }
 0x3b7   : > { %vm1941_vm7 = vmor %vm10062_vm13, %vm1925_vm9  ;;  %vm10066_vm6 = vnez %v10000_v52 }
 0x3b8   : > { %vm7104_vm4 = vmor %vm2292_vm15, %vm2300_vm11  ;;  %v7261_v48 = vpop.permute.xlu1 %1849 }
 0x3b9   : > { %v10064_v47 = vsel %vm7104_vm4, 4294967295, %v10063_v47  ;;  %vm10067_vm13 = vmor %vm10065_vm3, %vm10066_vm6  ;;  %vm10072_vm3 = vnez %v10049_v32 }
 0x3ba   : > { %vm7117_vm9 = vmor %vm10067_vm13, %vm1941_vm7  ;;  %vm2175_vm7 = vcmp.eq.s32.totalorder %v7073_v26, %v3500_v14 }
 0x3bb   : > { %vm2066_vm4 = vmor %vm2026_vm2, %vm2034_vm0  ;;  %v1962_v52 = vsel %vm7117_vm9, %v7102_v0, 0.0  ;;  %vm2574_vm0 = vcmp.eq.s32.totalorder %v6582_v46, %v3635_v13  ;;  %vm2582_vm2 = vcmp.eq.s32.totalorder %v6796_v38, %v3635_v13 }
 0x3bc   : > { %vm2082_vm6 = vmor %vm10072_vm3, %vm2066_vm4  ;;  %vm2308_vm3 = vcmp.eq.s32.totalorder %v7025_v35, %v3547_v9 }
 0x3bd   : > { %vm7139_vm13 = vmor %vm2433_vm8, %vm2441_vm1 }
 0x3be   : > { %vm10076_vm11 = vmor %vm10051_vm5, %vm10075_vm12  ;;  %vm2316_vm12 = vcmp.eq.s32.totalorder %v7073_v26, %v3547_v9  ;;  %vm10079_vm5 = vnez %v10059_v58  ;;  %v7185_v58 = vld [vmem:[%s9103_s2 + $0x3] ss:$0 sm:$0xff] }
 0x3bf   : > { %vm2090_vm15 = vmor %vm10076_vm11, %vm2082_vm6 }
 0x3c0   : > { %v2103_v32 = vsel %vm2090_vm15, %v7128_v7, 0.0  ;;  %vm2207_vm8 = vmor %vm2167_vm10, %vm2175_vm7  ;;  %vm2715_vm10 = vcmp.eq.s32.totalorder %v6582_v46, %v3687_v62  ;;  %vm2723_vm15 = vcmp.eq.s32.totalorder %v6796_v38, %v3687_v62  ;;  %vm10082_vm7 = vnez %v10022_v10 }
 0x3c1   : > { %v2111_v53 = vadd.f32 %v2103_v32, %v1962_v52  ;;  %vm2223_vm11 = vmor %vm10079_vm5, %vm2207_vm8  ;;  %vm10084_vm8 = vnez %v10064_v47 }
 0x3c2   : > { %vm7168_vm6 = vmor %vm2574_vm0, %vm2582_vm2  ;;  %vm2449_vm0 = vcmp.eq.s32.totalorder %v7025_v35, %v3584_v15  ;;  %vm2457_vm2 = vcmp.eq.s32.totalorder %v7073_v26, %v3584_v15 }
 0x3c3   : > { %vm10083_vm1 = vmor %vm10061_vm14, %vm10082_vm7 }
 0x3c4   : > { %vm2231_vm9 = vmor %vm10083_vm1, %vm2223_vm11  ;;  %vm2864_vm1 = vcmp.eq.s32.totalorder %v6796_v38, %v3741_v11  ;;  %v10122_v38 = vmov 0 }
 0x3c5   : > { %v2244_v52 = vsel %vm2231_vm9, %v7160_v29, 0.0  ;;  %vm2348_vm4 = vmor %vm2308_vm3, %vm2316_vm12  ;;  %vm2856_vm9 = vcmp.eq.s32.totalorder %v6582_v46, %v3741_v11  ;;  %vm10087_vm3 = vnez %v10040_v34  ;;  %vm10088_vm12 = vnez %v10030_v42  ;;  %v7237_v34 = vld [vmem:[%s9103_s2 + $0x5] ss:$0 sm:$0xff] }
 0x3c6   : > { %v2252_v32 = vadd.f32 %v2244_v52, %v2111_v53  ;;  %vm2364_vm5 = vmor %vm10084_vm8, %vm2348_vm4  ;;  %v7212_v53 = vld [vmem:[%s9103_s2 + $0x4] ss:$0 sm:$0xff]  ;;  %v7263_v52 = vpop.permute.xlu0 %1881 }
 0x3c7   : > { %vm7193_vm14 = vmor %vm2715_vm10, %vm2723_vm15  ;;  %vm2590_vm10 = vcmp.eq.s32.totalorder %v7025_v35, %v3635_v13  ;;  %vm2598_vm15 = vcmp.eq.s32.totalorder %v7073_v26, %v3635_v13 }
 0x3c8   : > { %vm10089_vm11 = vmor %vm10087_vm3, %vm10088_vm12  ;;  %vm10092_vm3 = vnez %v10053_v27  ;;  %vm10093_vm12 = vnez %v10044_v57 }
 0x3c9   : > { %vm2372_vm7 = vmor %vm10089_vm11, %vm2364_vm5  ;;  %vm1832_vm5 = vcmp.eq.s32.totalorder %v6808_v60, %v3458_v3 }
 0x3ca   : > { %v2385_v47 = vsel %vm2372_vm7, %v7185_v58, 0.0  ;;  %vm2489_vm4 = vmor %vm2449_vm0, %vm2457_vm2 }
 0x3cb   : > { %v2393_v42 = vadd.f32 %v2385_v47, %v2252_v32  ;;  %vm2505_vm0 = vmor %vm7139_vm13, %vm2489_vm4  ;;  %vm2731_vm13 = vcmp.eq.s32.totalorder %v7025_v35, %v3687_v62  ;;  %vm2021_vm4 = vcmp.eq.s32.totalorder %v6808_v60, %v3465_v6  ;;  %v7269_v32 = vld [vmem:[%s9103_s2 + $0x6] ss:$0 sm:$0xff] }
 0x3cc   : > { %vm7224_vm2 = vmor %vm2856_vm9, %vm2864_vm1  ;;  %vm2739_vm9 = vcmp.eq.s32.totalorder %v7073_v26, %v3687_v62  ;;  %vm2013_vm1 = vcmp.eq.s32.totalorder %v6656_v2, %v3465_v6 }
 0x3cd   : > { %vm10094_vm11 = vmor %vm10092_vm3, %vm10093_vm12  ;;  %vm10098_vm3 = vnez %v9944_v36  ;;  %vm10099_vm12 = vnez %v9952_v31  ;;  %v10101_v31 = vmov 0 }
 0x3ce   : > { %vm2513_vm7 = vmor %vm10094_vm11, %vm2505_vm0 }
 0x3cf   : > { %v2526_v46 = vsel %vm2513_vm7, %v7212_v53, 0.0  ;;  %vm2630_vm8 = vmor %vm2590_vm10, %vm2598_vm15  ;;  %vm10095_vm15 = vcmp.eq.s32.totalorder %v6656_v2, %v3458_v3 }
 0x3d0   : > { %v2534_v57 = vadd.f32 %v2526_v46, %v2393_v42  ;;  %vm2646_vm10 = vmor %vm7168_vm6, %vm2630_vm8  ;;  %vm2872_vm8 = vcmp.eq.s32.totalorder %v7025_v35, %v3741_v11  ;;  %v10111_v42 = vmov 0  ;;  %v10128_v46 = vmov 0 }
 0x3d1   : > { %vm7252_vm0 = vmor %vm10095_vm15, %vm1832_vm5  ;;  %vm2880_vm5 = vcmp.eq.s32.totalorder %v7073_v26, %v3741_v11  ;;  %v7301_v26 = vld [vmem:[%s9103_s2 + $0x7] ss:$0 sm:$0xff] }
 0x3d2   : > { %vm10100_vm11 = vmor %vm10098_vm3, %vm10099_vm12  ;;  %vm10103_vm3 = vnez %v9946_v1  ;;  %vm10104_vm12 = vnez %v9957_v18  ;;  %v10216_v1 = vmov 0 }
 0x3d3   : > { %vm2654_vm7 = vmor %vm10100_vm11, %vm2646_vm10 }
 0x3d4   : > { %v2667_v55 = vsel %vm2654_vm7, %v7237_v34, 0.0  ;;  %vm2771_vm6 = vmor %vm2731_vm13, %vm2739_vm9  ;;  %vm2154_vm13 = vcmp.eq.s32.totalorder %v6656_v2, %v3500_v14  ;;  %vm2162_vm9 = vcmp.eq.s32.totalorder %v6808_v60, %v3500_v14 }
 0x3d5   : > { %v2675_v36 = vadd.f32 %v2667_v55, %v2534_v57  ;;  %vm2787_vm10 = vmor %vm7193_vm14, %vm2771_vm6  ;;  %vm1864_vm14 = vcmp.eq.s32.totalorder %v7261_v48, %v3458_v3 }
 0x3d6   : > { %vm7280_vm15 = vmor %vm2013_vm1, %vm2021_vm4  ;;  %vm1896_vm1 = vcmp.eq.s32.totalorder %v7263_v52, %v3458_v3 }
 0x3d7   : > { %v10102_v31 = vsel %vm7280_vm15, 4294967295, %v10101_v31  ;;  %vm10105_vm11 = vmor %vm10103_vm3, %vm10104_vm12  ;;  %vm2303_vm12 = vcmp.eq.s32.totalorder %v6808_v60, %v3547_v9  ;;  %vm2029_vm15 = vcmp.eq.s32.totalorder %v7261_v48, %v3465_v6 }
 0x3d8   : > { %vm2795_vm7 = vmor %vm10105_vm11, %vm2787_vm10  ;;  %vm2295_vm10 = vcmp.eq.s32.totalorder %v6656_v2, %v3547_v9 }
 0x3d9   : > { %v2808_v35 = vsel %vm2795_vm7, %v7269_v32, 0.0  ;;  %vm2912_vm4 = vmor %vm2872_vm8, %vm2880_vm5  ;;  %vm10108_vm8 = vnez %v9948_v24  ;;  %vm10109_vm5 = vnez %v9961_v41 }
 0x3da   : > { %v2816_v10 = vadd.f32 %v2808_v35, %v2675_v36  ;;  %vm2928_vm6 = vmor %vm7224_vm2, %vm2912_vm4  ;;  %vm2037_vm2 = vcmp.eq.s32.totalorder %v7263_v52, %v3465_v6 }
 0x3db   : > { %vm7305_vm3 = vmor %vm2154_vm13, %vm2162_vm9 }
 0x3dc   : > { %vm10110_vm11 = vmor %vm10108_vm8, %vm10109_vm5  ;;  %vm2444_vm8 = vcmp.eq.s32.totalorder %v6808_v60, %v3584_v15  ;;  %vm10113_vm5 = vnez %v9950_v59 }
 0x3dd   : > { %vm2936_vm7 = vmor %vm10110_vm11, %vm2928_vm6  ;;  %vm2436_vm6 = vcmp.eq.s32.totalorder %v6656_v2, %v3584_v15  ;;  %vm10114_vm11 = vnez %v9966_v50 }
 0x3de   : > { %v2949_v18 = vsel %vm2936_vm7, %v7301_v26, 0.0  ;;  %vm1928_vm13 = vmor %vm1864_vm14, %vm1896_vm1 }
 0x3df   : > { %v2957_v47 = vadd.f32 %v2949_v18, %v2816_v10  ;;  %vm1944_vm9 = vmor %vm7252_vm0, %vm1928_vm13  ;;  %vm2170_vm0 = vcmp.eq.s32.totalorder %v7261_v48, %v3500_v14 }
 0x3e0   : > { %vm7325_vm4 = vmor %vm2295_vm10, %vm2303_vm12  ;;  %vm2178_vm10 = vcmp.eq.s32.totalorder %v7263_v52, %v3500_v14  ;;  %vm10116_vm12 = vnez %v10102_v31 }
 0x3e1   : > { %v10112_v42 = vsel %vm7325_vm4, 4294967295, %v10111_v42  ;;  %vm10115_vm7 = vmor %vm10113_vm5, %vm10114_vm11  ;;  %2966 = vadd.xlane.f32.xlu1 %v2957_v47  ;;  %vm10120_vm5 = vnez %v9970_v16 }
 0x3e2   : > { %vm1952_vm14 = vmor %vm10115_vm7, %vm1944_vm9  ;;  %vm2577_vm9 = vcmp.eq.s32.totalorder %v6656_v2, %v3635_v13 }
 0x3e3   : > { %vm2069_vm1 = vmor %vm2029_vm15, %vm2037_vm2  ;;  %v1965_v24 = vsel %vm1952_vm14, %v7102_v0, 0.0  ;;  %vm2585_vm15 = vcmp.eq.s32.totalorder %v6808_v60, %v3635_v13  ;;  %vm10119_vm2 = vnez %v9954_v37 }
 0x3e4   : > { %vm2085_vm13 = vmor %vm10116_vm12, %vm2069_vm1 }
 0x3e5   : > { %vm7345_vm4 = vmor %vm2436_vm6, %vm2444_vm8  ;;  %vm2311_vm6 = vcmp.eq.s32.totalorder %v7261_v48, %v3547_v9  ;;  %vm2319_vm8 = vcmp.eq.s32.totalorder %v7263_v52, %v3547_v9 }
 0x3e6   : > { %vm10121_vm11 = vmor %vm10119_vm2, %vm10120_vm5  ;;  %vm10125_vm2 = vnez %v9975_v12  ;;  %v7440_v12 = vpop.permute.xlu0 %1887 }
 0x3e7   : > { %vm2093_vm7 = vmor %vm10121_vm11, %vm2085_vm13  ;;  %vm2718_vm13 = vcmp.eq.s32.totalorder %v6656_v2, %v3687_v62 }
 0x3e8   : > { %v2106_v59 = vsel %vm2093_vm7, %v7128_v7, 0.0  ;;  %vm2210_vm14 = vmor %vm2170_vm0, %vm2178_vm10  ;;  %vm2726_vm0 = vcmp.eq.s32.totalorder %v6808_v60, %v3687_v62  ;;  %vm10124_vm10 = vnez %v9959_v19 }
 0x3e9   : > { %v2114_v50 = vadd.f32 %v2106_v59, %v1965_v24  ;;  %vm2226_vm1 = vmor %vm7305_vm3, %vm2210_vm14  ;;  %vm2452_vm3 = vcmp.eq.s32.totalorder %v7261_v48, %v3584_v15  ;;  %v10183_v24 = vld [vmem:[#allocation9_spill] sm:$0xff] }
 0x3ea   : > { %vm7365_vm12 = vmor %vm2577_vm9, %vm2585_vm15  ;;  %vm2460_vm9 = vcmp.eq.s32.totalorder %v7263_v52, %v3584_v15  ;;  %vm10127_vm15 = vnez %v10112_v42 }
 0x3eb   : > { %v10123_v38 = vsel %vm7365_vm12, 4294967295, %v10122_v38  ;;  %vm10126_vm5 = vmor %vm10124_vm10, %vm10125_vm2  ;;  %vm10131_vm10 = vnez %v9979_v23  ;;  %v10197_v23 = vld [vmem:[#allocation33_spill] sm:$0xff] }
 0x3ec   : > { %vm2234_vm11 = vmor %vm10126_vm5, %vm2226_vm1  ;;  %vm2859_vm1 = vcmp.eq.s32.totalorder %v6656_v2, %v3741_v11 }
 0x3ed   : > { %v2247_v37 = vsel %vm2234_vm11, %v7160_v29, 0.0  ;;  %vm2351_vm7 = vmor %vm2311_vm6, %vm2319_vm8  ;;  %vm2867_vm6 = vcmp.eq.s32.totalorder %v6808_v60, %v3741_v11  ;;  %vm10130_vm8 = vnez %v9963_v43 }
 0x3ee   : > { %v2255_v16 = vadd.f32 %v2247_v37, %v2114_v50  ;;  %vm2367_vm14 = vmor %vm10127_vm15, %vm2351_vm7  ;;  %vm1802_vm7 = vcmp.eq.s32.totalorder %v6720_v54, %v3458_v3  ;;  %vm1834_vm15 = vcmp.eq.s32.totalorder %v6812_v63, %v3458_v3  ;;  %v10189_v50 = vld [vmem:[#allocation20_spill] sm:$0xff]  ;;  %v10191_v37 = vld [vmem:[#allocation26_spill] sm:$0xff] }
 0x3ef   : > { %vm7385_vm12 = vmor %vm2718_vm13, %vm2726_vm0  ;;  %vm2593_vm13 = vcmp.eq.s32.totalorder %v7261_v48, %v3635_v13  ;;  %vm2601_vm0 = vcmp.eq.s32.totalorder %v7263_v52, %v3635_v13 }
 0x3f0   : > { %v10129_v46 = vsel %vm7385_vm12, 4294967295, %v10128_v46  ;;  %vm10132_vm2 = vmor %vm10130_vm8, %vm10131_vm10  ;;  %vm2734_vm12 = vcmp.eq.s32.totalorder %v7261_v48, %v3687_v62 }
 0x3f1   : > { %vm2375_vm5 = vmor %vm10132_vm2, %vm2367_vm14 }
 0x3f2   : > { %v2388_v19 = vsel %vm2375_vm5, %v7185_v58, 0.0  ;;  %vm2492_vm11 = vmor %vm2452_vm3, %vm2460_vm9  ;;  %vm10135_vm3 = vnez %v9968_v25  ;;  %vm10136_vm9 = vnez %v9983_v21  ;;  %v10139_v25 = vmov 0  ;;  %v7438_v21 = vpop.permute.xlu1 %1855 }
 0x3f3   : > { %v2396_v60 = vadd.f32 %v2388_v19, %v2255_v16  ;;  %vm2508_vm8 = vmor %vm7345_vm4, %vm2492_vm11  ;;  %vm2742_vm4 = vcmp.eq.s32.totalorder %v7263_v52, %v3687_v62  ;;  %vm10138_vm11 = vnez %v10123_v38  ;;  %v10190_v38 = vld [vmem:[#allocation8_spill] sm:$0xff]  ;;  %v10192_v16 = vld [vmem:[#allocation30_spill] sm:$0xff] }
 0x3f4   : > { %vm7409_vm14 = vmor %vm2859_vm1, %vm2867_vm6  ;;  %vm2015_vm1 = vcmp.eq.s32.totalorder %v6720_v54, %v3465_v6  ;;  %vm2023_vm6 = vcmp.eq.s32.totalorder %v6812_v63, %v3465_v6  ;;  %v8340_v19 = vld [vmem:[%s9103_s2 + $0x2] ss:$0 sm:$0xff] }
 0x3f5   : > { %vm10137_vm10 = vmor %vm10135_vm3, %vm10136_vm9 }
 0x3f6   : > { %vm2516_vm2 = vmor %vm10137_vm10, %vm2508_vm8  ;;  %v7638_v59 = vpop.permute.xlu1 %1869 }
 0x3f7   : > { %v2529_v2 = vsel %vm2516_vm2, %v7212_v53, 0.0  ;;  %vm2633_vm5 = vmor %vm2593_vm13, %vm2601_vm0  ;;  %vm10141_vm13 = vnez %v9972_v40  ;;  %vm10142_vm0 = vnez %v9985_v22 }
 0x3f8   : > { %v2537_v43 = vadd.f32 %v2529_v2, %v2396_v60  ;;  %vm2649_vm3 = vmor %vm10138_vm11, %vm2633_vm5  ;;  %vm2875_vm5 = vcmp.eq.s32.totalorder %v7261_v48, %v3741_v11  ;;  %v10195_v60 = vmov 0 }
 0x3f9   : > { %vm7429_vm8 = vmor %vm1802_vm7, %vm1834_vm15  ;;  %vm2883_vm7 = vcmp.eq.s32.totalorder %v7263_v52, %v3741_v11  ;;  %vm10144_vm15 = vnez %v10129_v46  ;;  %v10150_v52 = vmov 0 }
 0x3fa   : > { %v10140_v25 = vsel %vm7429_vm8, 4294967295, %v10139_v25  ;;  %vm10143_vm9 = vmor %vm10141_vm13, %vm10142_vm0  ;;  %vm10148_vm13 = vnez %v9987_v4 }
 0x3fb   : > { %vm2657_vm10 = vmor %vm10143_vm9, %vm2649_vm3  ;;  %vm2156_vm3 = vcmp.eq.s32.totalorder %v6720_v54, %v3500_v14 }
 0x3fc   : > { %v2670_v57 = vsel %vm2657_vm10, %v7237_v34, 0.0  ;;  %vm2774_vm2 = vmor %vm2734_vm12, %vm2742_vm4  ;;  %vm2164_vm12 = vcmp.eq.s32.totalorder %v6812_v63, %v3500_v14  ;;  %vm10147_vm4 = vnez %v9977_v33  ;;  %vm1866_vm10 = vcmp.eq.s32.totalorder %v7438_v21, %v3458_v3 }
 0x3fd   : > { %v2678_v27 = vadd.f32 %v2670_v57, %v2537_v43  ;;  %vm2790_vm11 = vmor %vm10144_vm15, %vm2774_vm2  ;;  %v10199_v43 = vmov 0  ;;  %v10263_v57 = vmov 0 }
 0x3fe   : > { %vm7449_vm8 = vmor %vm2015_vm1, %vm2023_vm6  ;;  %vm1898_vm1 = vcmp.eq.s32.totalorder %v7440_v12, %v3458_v3 }
 0x3ff   : > { %vm10149_vm0 = vmor %vm10147_vm4, %vm10148_vm13  ;;  %vm2305_vm4 = vcmp.eq.s32.totalorder %v6812_v63, %v3547_v9  ;;  %vm10152_vm13 = vnez %v9993_v45 }
 0x400   : > { %vm2798_vm9 = vmor %vm10149_vm0, %vm2790_vm11  ;;  %vm2297_vm11 = vcmp.eq.s32.totalorder %v6720_v54, %v3547_v9  ;;  %vm10153_vm0 = vnez %v10007_v30 }
 0x401   : > { %v2811_v40 = vsel %vm2798_vm9, %v7269_v32, 0.0  ;;  %vm2915_vm6 = vmor %vm2875_vm5, %vm2883_vm7  ;;  %vm2031_vm7 = vcmp.eq.s32.totalorder %v7438_v21, %v3465_v6 }
 0x402   : > { %v2819_v48 = vadd.f32 %v2811_v40, %v2678_v27  ;;  %vm2931_vm2 = vmor %vm7409_vm14, %vm2915_vm6  ;;  %vm2039_vm14 = vcmp.eq.s32.totalorder %v7440_v12, %v3465_v6 }
 0x403   : > { %vm7469_vm15 = vmor %vm2156_vm3, %vm2164_vm12  ;;  %vm10155_vm12 = vnez %v10140_v25 }
 0x404   : > { %v10151_v52 = vsel %vm7469_vm15, 4294967295, %v10150_v52  ;;  %vm10154_vm9 = vmor %vm10152_vm13, %vm10153_vm0  ;;  %vm10158_vm13 = vnez %v9995_v51 }
 0x405   : > { %vm2939_vm5 = vmor %vm10154_vm9, %vm2931_vm2  ;;  %vm10159_vm2 = vnez %v10018_v8 }
 0x406   : > { %v2952_v4 = vsel %vm2939_vm5, %v7301_v26, 0.0  ;;  %vm1930_vm3 = vmor %vm1866_vm10, %vm1898_vm1  ;;  %vm2172_vm10 = vcmp.eq.s32.totalorder %v7438_v21, %v3500_v14  ;;  %vm2180_vm1 = vcmp.eq.s32.totalorder %v7440_v12, %v3500_v14 }
 0x407   : > { %v2960_v33 = vadd.f32 %v2952_v4, %v2819_v48  ;;  %vm1946_vm6 = vmor %vm10155_vm12, %vm1930_vm3  ;;  %vm10163_vm3 = vnez %v10003_v49 }
 0x408   : > { %vm7489_vm15 = vmor %vm2297_vm11, %vm2305_vm4  ;;  %vm2414_vm11 = vcmp.eq.s32.totalorder %v6564_v20, %v3584_v15 }
 0x409   : > { %vm10160_vm0 = vmor %vm10158_vm13, %vm10159_vm2  ;;  %2972 = vadd.xlane.f32.xlu1 %v2960_v33  ;;  %vm2313_vm2 = vcmp.eq.s32.totalorder %v7438_v21, %v3547_v9 }
 0x40a   : > { %vm7498_vm9 = vmor %vm10160_vm0, %vm1946_vm6  ;;  %vm2406_vm6 = vcmp.eq.s32.totalorder %v6512_v28, %v3584_v15  ;;  %vm2321_vm0 = vcmp.eq.s32.totalorder %v7440_v12, %v3547_v9 }
 0x40b   : > { %vm2071_vm5 = vmor %vm2031_vm7, %vm2039_vm14  ;;  %v1967_v8 = vsel %vm7498_vm9, %v7102_v0, 0.0  ;;  %vm10164_vm7 = vnez %v10033_v39 }
 0x40c   : > { %vm2087_vm4 = vmor %vm7449_vm8, %vm2071_vm5  ;;  %vm10168_vm8 = vnez %v10151_v52 }
 0x40d   : > { %vm10165_vm14 = vmor %vm10163_vm3, %vm10164_vm7  ;;  %vm10170_vm3 = vnez %v10046_v56  ;;  %v10176_v56 = vld [vmem:[#allocation10_spill] sm:$0xff] }
 0x40e   : > { %vm2095_vm12 = vmor %vm10165_vm14, %vm2087_vm4  ;;  %vm10169_vm4 = vnez %v10014_v17  ;;  %vm2430_vm14 = vcmp.eq.s32.totalorder %v6606_v61, %v3584_v15  ;;  %v10173_v17 = vld [vmem:[#allocation39_spill] sm:$0xff] }
 0x40f   : > { %v2108_v51 = vsel %vm2095_vm12, %v7128_v7, 0.0  ;;  %vm2212_vm13 = vmor %vm2172_vm10, %vm2180_vm1 }
 0x410   : > { %vm7525_vm9 = vmor %vm2406_vm6, %vm2414_vm11  ;;  %v2116_v49 = vadd.f32 %v2108_v51, %v1967_v8  ;;  %vm2555_vm11 = vcmp.eq.s32.totalorder %v6564_v20, %v3635_v13  ;;  %vm2438_vm6 = vcmp.eq.s32.totalorder %v6720_v54, %v3584_v15 }
 0x411   : > { %vm2228_vm5 = vmor %vm10168_vm8, %vm2212_vm13  ;;  %vm2446_vm13 = vcmp.eq.s32.totalorder %v6812_v63, %v3584_v15  ;;  %vm10172_vm8 = vnez %v10028_v5  ;;  %v10212_v5 = vld [vmem:[#allocation31_spill] sm:$0xff] }
 0x412   : > { %vm10171_vm7 = vmor %vm10169_vm4, %vm10170_vm3  ;;  %vm2422_vm4 = vcmp.eq.s32.totalorder %v10176_v56, %v3584_v15  ;;  %vm2454_vm3 = vcmp.eq.s32.totalorder %v7438_v21, %v3584_v15 }
 0x413   : > { %vm2236_vm10 = vmor %vm10171_vm7, %vm2228_vm5  ;;  %vm2547_vm7 = vcmp.eq.s32.totalorder %v6512_v28, %v3635_v13 }
 0x414   : > { %v2249_v39 = vsel %vm2236_vm10, %v7160_v29, 0.0  ;;  %vm2353_vm1 = vmor %vm2313_vm2, %vm2321_vm0  ;;  %vm10174_vm2 = vnez %v10173_v17  ;;  %v10209_v17 = vld [vmem:[#allocation15_spill] sm:$0xff] }
 0x415   : > { %v2257_v36 = vadd.f32 %v2249_v39, %v2116_v49  ;;  %vm2369_vm12 = vmor %vm7489_vm15, %vm2353_vm1  ;;  %vm2462_vm15 = vcmp.eq.s32.totalorder %v7440_v12, %v3584_v15  ;;  %v7814_v49 = vpop.permute.xlu1 %1875 }
 0x416   : > { %vm10175_vm0 = vmor %vm10172_vm8, %vm10174_vm2 }
 0x417   : > { %vm2377_vm5 = vmor %vm10175_vm0, %vm2369_vm12  ;;  %vm2571_vm0 = vcmp.eq.s32.totalorder %v6606_v61, %v3635_v13 }
 0x418   : > { %v2390_v31 = vsel %vm2377_vm5, %v7185_v58, 0.0  ;;  %vm2478_vm10 = vmor %vm2422_vm4, %vm2430_vm14  ;;  %vm2696_vm5 = vcmp.eq.s32.totalorder %v6564_v20, %v3687_v62  ;;  %vm2579_vm14 = vcmp.eq.s32.totalorder %v6720_v54, %v3635_v13 }
 0x419   : > { %vm7561_vm1 = vmor %vm2547_vm7, %vm2555_vm11  ;;  %v2398_v35 = vadd.f32 %v2390_v31, %v2257_v36  ;;  %vm2587_vm11 = vcmp.eq.s32.totalorder %v6812_v63, %v3635_v13  ;;  %v10211_v31 = vld [vmem:[#allocation14_spill] sm:$0xff] }
 0x41a   : > { %vm2486_vm12 = vmor %vm2438_vm6, %vm2446_vm13  ;;  %vm2563_vm6 = vcmp.eq.s32.totalorder %v10176_v56, %v3635_v13  ;;  %vm2603_vm13 = vcmp.eq.s32.totalorder %v7440_v12, %v3635_v13 }
 0x41b   : > { %vm2494_vm8 = vmor %vm2454_vm3, %vm2462_vm15  ;;  %vm2688_vm3 = vcmp.eq.s32.totalorder %v6512_v28, %v3687_v62 }
 0x41c   : > { %vm2502_vm2 = vmor %vm7525_vm9, %vm2478_vm10  ;;  %vm2595_vm9 = vcmp.eq.s32.totalorder %v7438_v21, %v3635_v13 }
 0x41d   : > { %vm2510_vm4 = vmor %vm2486_vm12, %vm2494_vm8 }
 0x41e   : > { %vm2518_vm7 = vmor %vm2502_vm2, %vm2510_vm4  ;;  %vm2712_vm4 = vcmp.eq.s32.totalorder %v6606_v61, %v3687_v62 }
 0x41f   : > { %v2531_v10 = vsel %vm2518_vm7, %v7212_v53, 0.0  ;;  %vm2619_vm15 = vmor %vm2563_vm6, %vm2571_vm0  ;;  %vm2837_vm7 = vcmp.eq.s32.totalorder %v6564_v20, %v3741_v11  ;;  %vm2720_vm6 = vcmp.eq.s32.totalorder %v6720_v54, %v3687_v62 }
 0x420   : > { %vm7584_vm10 = vmor %vm2688_vm3, %vm2696_vm5  ;;  %v2539_v18 = vadd.f32 %v2531_v10, %v2398_v35  ;;  %vm2728_vm5 = vcmp.eq.s32.totalorder %v6812_v63, %v3687_v62  ;;  %v10215_v10 = vld [vmem:[#allocation16_spill] sm:$0xff] }
 0x421   : > { %vm2627_vm12 = vmor %vm2579_vm14, %vm2587_vm11  ;;  %vm2704_vm14 = vcmp.eq.s32.totalorder %v10176_v56, %v3687_v62  ;;  %vm2744_vm11 = vcmp.eq.s32.totalorder %v7440_v12, %v3687_v62 }
 0x422   : > { %vm2635_vm8 = vmor %vm2595_vm9, %vm2603_vm13  ;;  %vm2829_vm9 = vcmp.eq.s32.totalorder %v6512_v28, %v3741_v11  ;;  %v10184_v28 = vld [vmem:[#allocation5_spill] sm:$0xff] }
 0x423   : > { %vm2643_vm2 = vmor %vm7561_vm1, %vm2619_vm15  ;;  %vm2736_vm1 = vcmp.eq.s32.totalorder %v7438_v21, %v3687_v62 }
 0x424   : > { %vm2651_vm0 = vmor %vm2627_vm12, %vm2635_vm8 }
 0x425   : > { %vm2659_vm3 = vmor %vm2643_vm2, %vm2651_vm0  ;;  %vm1700_vm2 = vcmp.eq.s32.totalorder %v10183_v24, %v3458_v3 }
 0x426   : > { %v2672_v20 = vsel %vm2659_vm3, %v7237_v34, 0.0  ;;  %vm2760_vm13 = vmor %vm2704_vm14, %vm2712_vm4  ;;  %vm2853_vm3 = vcmp.eq.s32.totalorder %v6606_v61, %v3741_v11  ;;  %vm2861_vm14 = vcmp.eq.s32.totalorder %v6720_v54, %v3741_v11  ;;  %v10231_v54 = vmov 0 }
 0x427   : > { %vm7607_vm15 = vmor %vm2829_vm9, %vm2837_vm7  ;;  %v2680_v42 = vadd.f32 %v2672_v20, %v2539_v18  ;;  %vm2869_vm7 = vcmp.eq.s32.totalorder %v6812_v63, %v3741_v11  ;;  %v10187_v63 = vmov 0  ;;  %v10218_v18 = vld [vmem:[#allocation25_spill] sm:$0xff]  ;;  %v8494_v20 = vld [vmem:[%s9103_s2 + $0x7] ss:$0 sm:$0xff] }
 0x428   : > { %vm2768_vm12 = vmor %vm2720_vm6, %vm2728_vm5  ;;  %vm1668_vm6 = vcmp.eq.s32.totalorder %v10184_v28, %v3458_v3 }
 0x429   : > { %vm2776_vm8 = vmor %vm2736_vm1, %vm2744_vm11  ;;  %vm2845_vm1 = vcmp.eq.s32.totalorder %v10176_v56, %v3741_v11  ;;  %vm2885_vm11 = vcmp.eq.s32.totalorder %v7440_v12, %v3741_v11  ;;  %v10210_v56 = vld [vmem:[#allocation3_spill] sm:$0xff] }
 0x42a   : > { %vm2784_vm0 = vmor %vm7584_vm10, %vm2760_vm13  ;;  %vm2877_vm10 = vcmp.eq.s32.totalorder %v7438_v21, %v3741_v11 }
 0x42b   : > { %vm2792_vm4 = vmor %vm2768_vm12, %vm2776_vm8 }
 0x42c   : > { %vm2800_vm5 = vmor %vm2784_vm0, %vm2792_vm4  ;;  %vm1985_vm0 = vcmp.eq.s32.totalorder %v10183_v24, %v3465_v6  ;;  %vm1732_vm4 = vcmp.eq.s32.totalorder %v10189_v50, %v3458_v3 }
 0x42d   : > { %v2813_v61 = vsel %vm2800_vm5, %v7269_v32, 0.0  ;;  %vm7630_vm9 = vmor %vm2845_vm1, %vm2853_vm3  ;;  %vm1764_vm3 = vcmp.eq.s32.totalorder %v10190_v38, %v3458_v3  ;;  %vm1977_vm5 = vcmp.eq.s32.totalorder %v10184_v28, %v3465_v6  ;;  %vm1892_vm1 = vcmp.eq.s32.totalorder %v7638_v59, %v3458_v3 }
 0x42e   : > { %vm7634_vm13 = vmor %vm1668_vm6, %vm1700_vm2  ;;  %v2821_v41 = vadd.f32 %v2813_v61, %v2680_v42  ;;  %v10347_v61 = vld [vmem:[#allocation18_spill] sm:$0xff] }
 0x42f   : > { %v10188_v63 = vsel %vm7634_vm13, 4294967295, %v10187_v63  ;;  %vm2909_vm12 = vmor %vm2861_vm14, %vm2869_vm7  ;;  %vm1796_vm14 = vcmp.eq.s32.totalorder %v10191_v37, %v3458_v3  ;;  %vm1828_vm7 = vcmp.eq.s32.totalorder %v10192_v16, %v3458_v3  ;;  %vm1993_vm13 = vcmp.eq.s32.totalorder %v10189_v50, %v3465_v6 }
 0x430   : > { %vm2917_vm8 = vmor %vm2877_vm10, %vm2885_vm11 }
 0x431   : > { %vm2925_vm2 = vmor %vm7607_vm15, %vm7630_vm9  ;;  %vm1860_vm9 = vcmp.eq.s32.totalorder %v10197_v23, %v3458_v3 }
 0x432   : > { %vm2933_vm6 = vmor %vm2909_vm12, %vm2917_vm8 }
 0x433   : > { %vm2941_vm10 = vmor %vm2925_vm2, %vm2933_vm6  ;;  %vm2001_vm2 = vcmp.eq.s32.totalorder %v10190_v38, %v3465_v6  ;;  %vm2009_vm6 = vcmp.eq.s32.totalorder %v10191_v37, %v3465_v6 }
 0x434   : > { %v2954_v46 = vsel %vm2941_vm10, %v7301_v26, 0.0  ;;  %vm7659_vm11 = vmor %vm1732_vm4, %vm1764_vm3  ;;  %vm2126_vm3 = vcmp.eq.s32.totalorder %v10183_v24, %v3500_v14  ;;  %vm2118_vm10 = vcmp.eq.s32.totalorder %v10184_v28, %v3500_v14 }
 0x435   : > { %vm7663_vm15 = vmor %vm1977_vm5, %vm1985_vm0  ;;  %v2962_v2 = vadd.f32 %v2954_v46, %v2821_v41  ;;  %vm10198_vm0 = vnez %v10188_v63  ;;  %vm2033_vm5 = vcmp.eq.s32.totalorder %v7638_v59, %v3465_v6  ;;  %v8296_v63 = vld [vmem:[%s9103_s2] ss:$0 sm:$0xff]  ;;  %v10354_v46 = vmov 0 }
 0x436   : > { %v10196_v60 = vsel %vm7663_vm15, 4294967295, %v10195_v60  ;;  %vm1916_vm12 = vmor %vm1796_vm14, %vm1828_vm7  ;;  %vm2017_vm14 = vcmp.eq.s32.totalorder %v10192_v16, %v3465_v6 }
 0x437   : > { %vm1924_vm8 = vmor %vm1860_vm9, %vm1892_vm1  ;;  %2976 = vadd.xlane.f32.xlu1 %v2962_v2 }
 0x438   : > { %vm1932_vm4 = vmor %vm10198_vm0, %vm7659_vm11  ;;  %vm2025_vm0 = vcmp.eq.s32.totalorder %v10197_v23, %v3465_v6 }
 0x439   : > { %vm1940_vm7 = vmor %vm1916_vm12, %vm1924_vm8  ;;  %vm10203_vm8 = vnez %v10196_v60 }
 0x43a   : > { %vm7685_vm1 = vmor %vm1932_vm4, %vm1940_vm7  ;;  %vm2134_vm7 = vcmp.eq.s32.totalorder %v10189_v50, %v3500_v14 }
 0x43b   : > { %v10200_v43 = vsel %vm7685_vm1, 4294967295, %v10199_v43  ;;  %vm2049_vm11 = vmor %vm1993_vm13, %vm2001_vm2  ;;  %vm2142_vm1 = vcmp.eq.s32.totalorder %v10190_v38, %v3500_v14  ;;  %vm2267_vm13 = vcmp.eq.s32.totalorder %v10183_v24, %v3547_v9 }
 0x43c   : > { %vm7691_vm9 = vmor %vm2118_vm10, %vm2126_vm3  ;;  %vm10204_vm2 = vnez %v10200_v43  ;;  %vm2174_vm10 = vcmp.eq.s32.totalorder %v7638_v59, %v3500_v14 }
 0x43d   : > { %vm2057_vm15 = vmor %vm2009_vm6, %vm2017_vm14  ;;  %v1961_v21 = vsel %vm10204_vm2, %v7102_v0, 0.0  ;;  %vm2150_vm6 = vcmp.eq.s32.totalorder %v10191_v37, %v3500_v14  ;;  %vm2158_vm14 = vcmp.eq.s32.totalorder %v10192_v16, %v3500_v14 }
 0x43e   : > { %vm2065_vm12 = vmor %vm2025_vm0, %vm2033_vm5 }
 0x43f   : > { %vm2073_vm4 = vmor %vm10203_vm8, %vm2049_vm11  ;;  %vm2259_vm11 = vcmp.eq.s32.totalorder %v10184_v28, %v3547_v9 }
 0x440   : > { %vm2081_vm3 = vmor %vm2057_vm15, %vm2065_vm12  ;;  %vm2166_vm15 = vcmp.eq.s32.totalorder %v10197_v23, %v3500_v14 }
 0x441   : > { %vm2089_vm5 = vmor %vm2073_vm4, %vm2081_vm3  ;;  %vm2275_vm3 = vcmp.eq.s32.totalorder %v10189_v50, %v3547_v9 }
 0x442   : > { %v2102_v12 = vsel %vm2089_vm5, %v7128_v7, 0.0  ;;  %vm2190_vm0 = vmor %vm2134_vm7, %vm2142_vm1  ;;  %vm2283_vm5 = vcmp.eq.s32.totalorder %v10190_v38, %v3547_v9  ;;  %vm2408_vm1 = vcmp.eq.s32.totalorder %v10183_v24, %v3584_v15 }
 0x443   : > { %vm7717_vm8 = vmor %vm2259_vm11, %vm2267_vm13  ;;  %v2110_v27 = vadd.f32 %v2102_v12, %v1961_v21  ;;  %vm2291_vm13 = vcmp.eq.s32.totalorder %v10191_v37, %v3547_v9 }
 0x444   : > { %vm2198_vm12 = vmor %vm2150_vm6, %vm2158_vm14  ;;  %vm2299_vm6 = vcmp.eq.s32.totalorder %v10192_v16, %v3547_v9 }
 0x445   : > { %vm2206_vm2 = vmor %vm2166_vm15, %vm2174_vm10  ;;  %vm2400_vm10 = vcmp.eq.s32.totalorder %v10184_v28, %v3584_v15  ;;  %vm2307_vm15 = vcmp.eq.s32.totalorder %v10197_v23, %v3547_v9 }
 0x446   : > { %vm2214_vm4 = vmor %vm7691_vm9, %vm2190_vm0  ;;  %vm2315_vm9 = vcmp.eq.s32.totalorder %v7638_v59, %v3547_v9 }
 0x447   : > { %vm2222_vm7 = vmor %vm2198_vm12, %vm2206_vm2 }
 0x448   : > { %vm2230_vm14 = vmor %vm2214_vm4, %vm2222_vm7  ;;  %vm2416_vm7 = vcmp.eq.s32.totalorder %v10189_v50, %v3584_v15 }
 0x449   : > { %v2243_v22 = vsel %vm2230_vm14, %v7160_v29, 0.0  ;;  %vm2331_vm11 = vmor %vm2275_vm3, %vm2283_vm5  ;;  %vm2424_vm14 = vcmp.eq.s32.totalorder %v10190_v38, %v3584_v15  ;;  %vm2432_vm5 = vcmp.eq.s32.totalorder %v10191_v37, %v3584_v15 }
 0x44a   : > { %vm7740_vm0 = vmor %vm2400_vm10, %vm2408_vm1  ;;  %v2251_v48 = vadd.f32 %v2243_v22, %v2110_v27  ;;  %vm2440_vm1 = vcmp.eq.s32.totalorder %v10192_v16, %v3584_v15 }
 0x44b   : > { %vm2339_vm12 = vmor %vm2291_vm13, %vm2299_vm6  ;;  %vm2456_vm13 = vcmp.eq.s32.totalorder %v7638_v59, %v3584_v15  ;;  %vm2448_vm6 = vcmp.eq.s32.totalorder %v10197_v23, %v3584_v15 }
 0x44c   : > { %vm2347_vm2 = vmor %vm2307_vm15, %vm2315_vm9 }
 0x44d   : > { %vm2355_vm4 = vmor %vm7717_vm8, %vm2331_vm11 }
 0x44e   : > { %vm2363_vm3 = vmor %vm2339_vm12, %vm2347_vm2  ;;  %vm2549_vm12 = vcmp.eq.s32.totalorder %v10183_v24, %v3635_v13 }
 0x44f   : > { %vm2371_vm10 = vmor %vm2355_vm4, %vm2363_vm3  ;;  %vm2557_vm4 = vcmp.eq.s32.totalorder %v10189_v50, %v3635_v13  ;;  %vm2565_vm3 = vcmp.eq.s32.totalorder %v10190_v38, %v3635_v13 }
 0x450   : > { %v2384_v52 = vsel %vm2371_vm10, %v7185_v58, 0.0  ;;  %vm2472_vm8 = vmor %vm2416_vm7, %vm2424_vm14  ;;  %vm2541_vm14 = vcmp.eq.s32.totalorder %v10184_v28, %v3635_v13 }
 0x451   : > { %v2392_v4 = vadd.f32 %v2384_v52, %v2251_v48  ;;  %vm2480_vm9 = vmor %vm2432_vm5, %vm2440_vm1  ;;  %vm2573_vm5 = vcmp.eq.s32.totalorder %v10191_v37, %v3635_v13  ;;  %vm2597_vm1 = vcmp.eq.s32.totalorder %v7638_v59, %v3635_v13  ;;  %v8094_v48 = vpop.permute.xlu1 %1878 }
 0x452   : > { %vm2488_vm11 = vmor %vm2448_vm6, %vm2456_vm13 }
 0x453   : > { %vm2496_vm15 = vmor %vm7740_vm0, %vm2472_vm8  ;;  %vm2581_vm0 = vcmp.eq.s32.totalorder %v10192_v16, %v3635_v13  ;;  %vm2589_vm8 = vcmp.eq.s32.totalorder %v10197_v23, %v3635_v13 }
 0x454   : > { %vm2504_vm2 = vmor %vm2480_vm9, %vm2488_vm11 }
 0x455   : > { %vm2512_vm7 = vmor %vm2496_vm15, %vm2504_vm2  ;;  %vm2690_vm15 = vcmp.eq.s32.totalorder %v10183_v24, %v3687_v62 }
 0x456   : > { %v2525_v33 = vsel %vm2512_vm7, %v7212_v53, 0.0  ;;  %vm2605_vm10 = vmor %vm2541_vm14, %vm2549_vm12  ;;  %vm2698_vm7 = vcmp.eq.s32.totalorder %v10189_v50, %v3687_v62  ;;  %vm2706_vm12 = vcmp.eq.s32.totalorder %v10190_v38, %v3687_v62 }
 0x457   : > { %v2533_v55 = vadd.f32 %v2525_v33, %v2392_v4  ;;  %vm2613_vm13 = vmor %vm2557_vm4, %vm2565_vm3  ;;  %vm2682_vm4 = vcmp.eq.s32.totalorder %v10184_v28, %v3687_v62  ;;  %vm2714_vm3 = vcmp.eq.s32.totalorder %v10191_v37, %v3687_v62  ;;  %v10266_v33 = vld [vmem:[#allocation6_spill] sm:$0xff] }
 0x458   : > { %vm2621_vm6 = vmor %vm2573_vm5, %vm2581_vm0  ;;  %vm2722_vm5 = vcmp.eq.s32.totalorder %v10192_v16, %v3687_v62  ;;  %vm2738_vm0 = vcmp.eq.s32.totalorder %v7638_v59, %v3687_v62 }
 0x459   : > { %vm2629_vm9 = vmor %vm2589_vm8, %vm2597_vm1 }
 0x45a   : > { %vm2637_vm11 = vmor %vm2605_vm10, %vm2613_vm13  ;;  %vm2730_vm13 = vcmp.eq.s32.totalorder %v10197_v23, %v3687_v62 }
 0x45b   : > { %vm2645_vm2 = vmor %vm2621_vm6, %vm2629_vm9 }
 0x45c   : > { %vm2653_vm14 = vmor %vm2637_vm11, %vm2645_vm2  ;;  %vm2831_vm11 = vcmp.eq.s32.totalorder %v10183_v24, %v3741_v11 }
 0x45d   : > { %v2666_v45 = vsel %vm2653_vm14, %v7237_v34, 0.0  ;;  %vm2746_vm1 = vmor %vm2682_vm4, %vm2690_vm15  ;;  %vm2839_vm14 = vcmp.eq.s32.totalorder %v10189_v50, %v3741_v11  ;;  %vm2847_vm4 = vcmp.eq.s32.totalorder %v10190_v38, %v3741_v11  ;;  %v10242_v50 = vmov 0  ;;  %v8317_v38 = vpop.permute.xlu1 %1884 }
 0x45e   : > { %v2674_v8 = vadd.f32 %v2666_v45, %v2533_v55  ;;  %vm2754_vm10 = vmor %vm2698_vm7, %vm2706_vm12  ;;  %vm2823_vm7 = vcmp.eq.s32.totalorder %v10184_v28, %v3741_v11  ;;  %vm2855_vm12 = vcmp.eq.s32.totalorder %v10191_v37, %v3741_v11  ;;  %v10269_v55 = vld [vmem:[#allocation17_spill] sm:$0xff]  ;;  %v10270_v45 = vld [vmem:[#allocation32_spill] sm:$0xff] }
 0x45f   : > { %vm2762_vm8 = vmor %vm2714_vm3, %vm2722_vm5  ;;  %vm2863_vm3 = vcmp.eq.s32.totalorder %v10192_v16, %v3741_v11  ;;  %vm2879_vm5 = vcmp.eq.s32.totalorder %v7638_v59, %v3741_v11  ;;  %v10240_v59 = vmov 0  ;;  %v10345_v28 = vld [vmem:[#allocation13_spill] sm:$0xff]  ;;  %v10353_v16 = vld [vmem:[#allocation22_spill] sm:$0xff] }
 0x460   : > { %vm2770_vm6 = vmor %vm2730_vm13, %vm2738_vm0 }
 0x461   : > { %vm2778_vm9 = vmor %vm2746_vm1, %vm2754_vm10  ;;  %vm2871_vm10 = vcmp.eq.s32.totalorder %v10197_v23, %v3741_v11 }
 0x462   : > { %vm2786_vm2 = vmor %vm2762_vm8, %vm2770_vm6 }
 0x463   : > { %vm2794_vm15 = vmor %vm2778_vm9, %vm2786_vm2 }
 0x464   : > { %v2807_v51 = vsel %vm2794_vm15, %v7269_v32, 0.0  ;;  %vm2887_vm0 = vmor %vm2823_vm7, %vm2831_vm11  ;;  %vm1702_vm15 = vcmp.eq.s32.totalorder %v10209_v17, %v3458_v3  ;;  %vm1894_vm11 = vcmp.eq.s32.totalorder %v7814_v49, %v3458_v3  ;;  %vm1830_vm7 = vcmp.eq.s32.totalorder %v10212_v5, %v3458_v3 }
 0x465   : > { %v2815_v30 = vadd.f32 %v2807_v51, %v2674_v8  ;;  %vm2895_vm1 = vmor %vm2839_vm14, %vm2847_vm4  ;;  %vm1670_vm14 = vcmp.eq.s32.totalorder %v10210_v56, %v3458_v3  ;;  %vm1766_vm4 = vcmp.eq.s32.totalorder %v10211_v31, %v3458_v3  ;;  %v10274_v51 = vmov 0 }
 0x466   : > { %vm2903_vm13 = vmor %vm2855_vm12, %vm2863_vm3  ;;  %vm1862_vm12 = vcmp.eq.s32.totalorder %v7206_v44, %v3458_v3 }
 0x467   : > { %vm2911_vm8 = vmor %vm2871_vm10, %vm2879_vm5  ;;  %vm1734_vm5 = vcmp.eq.s32.totalorder %v10215_v10, %v3458_v3  ;;  %vm1798_vm10 = vcmp.eq.s32.totalorder %v10218_v18, %v3458_v3 }
 0x468   : > { %vm2919_vm6 = vmor %vm2887_vm0, %vm2895_vm1  ;;  %vm1987_vm1 = vcmp.eq.s32.totalorder %v10209_v17, %v3465_v6 }
 0x469   : > { %vm2927_vm9 = vmor %vm2903_vm13, %vm2911_vm8  ;;  %vm2003_vm8 = vcmp.eq.s32.totalorder %v10211_v31, %v3465_v6 }
 0x46a   : > { %vm2935_vm2 = vmor %vm2919_vm6, %vm2927_vm9  ;;  %vm1979_vm9 = vcmp.eq.s32.totalorder %v10210_v56, %v3465_v6 }
 0x46b   : > { %v2948_v39 = vsel %vm2935_vm2, %v7301_v26, 0.0  ;;  %vm7829_vm3 = vmor %vm1670_vm14, %vm1702_vm15  ;;  %vm2035_vm2 = vcmp.eq.s32.totalorder %v7814_v49, %v3465_v6  ;;  %vm2019_vm14 = vcmp.eq.s32.totalorder %v10212_v5, %v3465_v6 }
 0x46c   : > { %v2956_v36 = vadd.f32 %v2948_v39, %v2815_v30  ;;  %vm7835_vm0 = vmor %vm1862_vm12, %vm1894_vm11  ;;  %vm1995_vm11 = vcmp.eq.s32.totalorder %v10215_v10, %v3465_v6  ;;  %vm2027_vm12 = vcmp.eq.s32.totalorder %v7206_v44, %v3465_v6  ;;  %v10276_v30 = vld [vmem:[#allocation27_spill] sm:$0xff] }
 0x46d   : > { %v10217_v1 = vsel %vm7835_vm0, 4294967295, %v10216_v1  ;;  %vm7843_vm13 = vmor %vm1734_vm5, %vm1766_vm4 }
 0x46e   : > { %2964 = vadd.xlane.f32.xlu0 %v2956_v36  ;;  %vm7849_vm6 = vmor %vm1798_vm10, %vm1830_vm7  ;;  %vm2011_vm10 = vcmp.eq.s32.totalorder %v10218_v18, %v3465_v6 }
 0x46f   : > { %vm7869_vm7 = vmor %vm1979_vm9, %vm1987_vm1  ;;  %vm2128_vm1 = vcmp.eq.s32.totalorder %v10209_v17, %v3500_v14  ;;  %vm2144_vm9 = vcmp.eq.s32.totalorder %v10211_v31, %v3500_v14 }
 0x470   : > { %vm7875_vm5 = vmor %vm1995_vm11, %vm2003_vm8  ;;  %vm2120_vm11 = vcmp.eq.s32.totalorder %v10210_v56, %v3500_v14 }
 0x471   : > { %vm7881_vm15 = vmor %vm2027_vm12, %vm2035_vm2  ;;  %vm2136_vm12 = vcmp.eq.s32.totalorder %v10215_v10, %v3500_v14 }
 0x472   : > { %vm7885_vm0 = vmor %vm2011_vm10, %vm2019_vm14  ;;  %vm2176_vm14 = vcmp.eq.s32.totalorder %v7814_v49, %v3500_v14  ;;  %vm2168_vm10 = vcmp.eq.s32.totalorder %v7206_v44, %v3500_v14 }
 0x473   : > { %vm2075_vm8 = vmor %vm7869_vm7, %vm7875_vm5  ;;  %vm2160_vm7 = vcmp.eq.s32.totalorder %v10212_v5, %v3500_v14 }
 0x474   : > { %vm2083_vm2 = vmor %vm7885_vm0, %vm7881_vm15  ;;  %vm2152_vm15 = vcmp.eq.s32.totalorder %v10218_v18, %v3500_v14 }
 0x475   : > { %vm7909_vm5 = vmor %vm2120_vm11, %vm2128_vm1  ;;  %vm10237_vm1 = vnez %v10217_v1  ;;  %v10298_v1 = vmov 0 }
 0x476   : > { %v10232_v54 = vsel %vm7909_vm5, 4294967295, %v10231_v54  ;;  %vm7915_vm0 = vmor %vm2136_vm12, %vm2144_vm9 }
 0x477   : > { %vm7921_vm4 = vmor %vm2168_vm10, %vm2176_vm14  ;;  %vm10246_vm10 = vnez %v10232_v54  ;;  %v10348_v54 = vld [vmem:[#allocation11_spill] sm:$0xff] }
 0x478   : > { %vm10238_vm11 = vmor %vm7849_vm6, %vm10237_vm1  ;;  %vm2269_vm6 = vcmp.eq.s32.totalorder %v10209_v17, %v3547_v9 }
 0x479   : > { %vm10239_vm9 = vmor %vm7829_vm3, %vm7843_vm13  ;;  %vm2285_vm13 = vcmp.eq.s32.totalorder %v10211_v31, %v3547_v9 }
 0x47a   : > { %vm7935_vm12 = vmor %vm10239_vm9, %vm10238_vm11  ;;  %vm2309_vm11 = vcmp.eq.s32.totalorder %v7206_v44, %v3547_v9  ;;  %vm2293_vm9 = vcmp.eq.s32.totalorder %v10218_v18, %v3547_v9 }
 0x47b   : > { %v10241_v59 = vsel %vm7935_vm12, 4294967295, %v10240_v59  ;;  %vm7939_vm5 = vmor %vm2075_vm8, %vm2083_vm2  ;;  %vm2261_vm2 = vcmp.eq.s32.totalorder %v10210_v56, %v3547_v9  ;;  %vm2426_vm12 = vcmp.eq.s32.totalorder %v10211_v31, %v3584_v15 }
 0x47c   : > { %v10243_v50 = vsel %vm7939_vm5, 4294967295, %v10242_v50  ;;  %vm7943_vm14 = vmor %vm2152_vm15, %vm2160_vm7  ;;  %vm2317_vm7 = vcmp.eq.s32.totalorder %v7814_v49, %v3547_v9  ;;  %vm2277_vm15 = vcmp.eq.s32.totalorder %v10215_v10, %v3547_v9 }
 0x47d   : > { %vm2216_vm3 = vmor %vm10246_vm10, %vm7915_vm0  ;;  %vm2301_vm0 = vcmp.eq.s32.totalorder %v10212_v5, %v3547_v9 }
 0x47e   : > { %vm2224_vm8 = vmor %vm7943_vm14, %vm7921_vm4 }
 0x47f   : > { %vm7967_vm1 = vmor %vm2261_vm2, %vm2269_vm6  ;;  %vm2410_vm6 = vcmp.eq.s32.totalorder %v10209_v17, %v3584_v15 }
 0x480   : > { %vm7973_vm4 = vmor %vm2277_vm15, %vm2285_vm13 }
 0x481   : > { %vm2349_vm14 = vmor %vm2309_vm11, %vm2317_vm7  ;;  %vm2402_vm7 = vcmp.eq.s32.totalorder %v10210_v56, %v3584_v15 }
 0x482   : > { %vm7979_vm10 = vmor %vm2216_vm3, %vm2224_vm8  ;;  %vm2442_vm3 = vcmp.eq.s32.totalorder %v10212_v5, %v3584_v15  ;;  %vm2418_vm8 = vcmp.eq.s32.totalorder %v10215_v10, %v3584_v15 }
 0x483   : > { %vm2341_vm5 = vmor %vm2293_vm9, %vm2301_vm0  ;;  %vm10258_vm9 = vnez %v10243_v50  ;;  %v2245_v25 = vsel %vm7979_vm10, %v7160_v29, 0.0 }
 0x484   : > { %vm2365_vm2 = vmor %vm2341_vm5, %vm2349_vm14  ;;  %vm2458_vm5 = vcmp.eq.s32.totalorder %v7814_v49, %v3584_v15  ;;  %v2104_v2 = vsel %vm10258_vm9, %v7128_v7, 0.0  ;;  %vm2450_vm14 = vcmp.eq.s32.totalorder %v7206_v44, %v3584_v15  ;;  %vm2543_vm9 = vcmp.eq.s32.totalorder %v10210_v56, %v3635_v13 }
 0x485   : > { %vm2357_vm13 = vmor %vm7967_vm1, %vm7973_vm4  ;;  %vm2434_vm1 = vcmp.eq.s32.totalorder %v10218_v18, %v3584_v15  ;;  %vm10257_vm4 = vnez %v10241_v59  ;;  %v8304_v59 = vld [vmem:[%s9103_s2 + $0x1] ss:$0 sm:$0xff] }
 0x486   : > { %vm7999_vm15 = vmor %vm2402_vm7, %vm2410_vm6  ;;  %v1963_v23 = vsel %vm10257_vm4, %v7102_v0, 0.0  ;;  %vm2551_vm7 = vcmp.eq.s32.totalorder %v10209_v17, %v3635_v13  ;;  %v8364_v0 = vld [vmem:[%s9103_s2 + $0x3] ss:$0 sm:$0xff] }
 0x487   : > { %vm8003_vm0 = vmor %vm2357_vm13, %vm2365_vm2  ;;  %v2112_v43 = vadd.f32 %v2104_v2, %v1963_v23  ;;  %v10411_v23 = vld [vmem:[#allocation38_spill] sm:$0xff] }
 0x488   : > { %vm2474_vm11 = vmor %vm2418_vm8, %vm2426_vm12  ;;  %vm2567_vm8 = vcmp.eq.s32.totalorder %v10211_v31, %v3635_v13  ;;  %v2386_v29 = vsel %vm8003_vm0, %v7185_v58, 0.0  ;;  %vm2740_vm0 = vcmp.eq.s32.totalorder %v7814_v49, %v3687_v62 }
 0x489   : > { %vm2482_vm6 = vmor %vm2434_vm1, %vm2442_vm3  ;;  %vm2583_vm3 = vcmp.eq.s32.totalorder %v10212_v5, %v3635_v13  ;;  %v2253_v21 = vadd.f32 %v2245_v25, %v2112_v43  ;;  %v8353_v43 = vpop.permute.xlu1 %1890 }
 0x48a   : > { %vm2490_vm2 = vmor %vm2450_vm14, %vm2458_vm5  ;;  %vm2559_vm5 = vcmp.eq.s32.totalorder %v10215_v10, %v3635_v13 }
 0x48b   : > { %vm2498_vm13 = vmor %vm7999_vm15, %vm2474_vm11  ;;  %vm2599_vm15 = vcmp.eq.s32.totalorder %v7814_v49, %v3635_v13  ;;  %vm2575_vm11 = vcmp.eq.s32.totalorder %v10218_v18, %v3635_v13  ;;  %v2394_v12 = vadd.f32 %v2386_v29, %v2253_v21  ;;  %v10417_v21 = vld [vmem:[#allocation29_spill] sm:$0xff] }
 0x48c   : > { %vm2506_vm12 = vmor %vm2482_vm6, %vm2490_vm2  ;;  %vm2591_vm6 = vcmp.eq.s32.totalorder %v7206_v44, %v3635_v13 }
 0x48d   : > { %vm8023_vm4 = vmor %vm2498_vm13, %vm2506_vm12  ;;  %vm2692_vm12 = vcmp.eq.s32.totalorder %v10209_v17, %v3687_v62 }
 0x48e   : > { %vm8035_vm1 = vmor %vm2543_vm9, %vm2551_vm7  ;;  %v2527_v58 = vsel %vm8023_vm4, %v7212_v53, 0.0  ;;  %vm2825_vm4 = vcmp.eq.s32.totalorder %v10210_v56, %v3741_v11 }
 0x48f   : > { %vm2615_vm14 = vmor %vm2559_vm5, %vm2567_vm8  ;;  %vm2708_vm8 = vcmp.eq.s32.totalorder %v10211_v31, %v3687_v62  ;;  %vm2724_vm5 = vcmp.eq.s32.totalorder %v10212_v5, %v3687_v62  ;;  %v2535_v27 = vadd.f32 %v2527_v58, %v2394_v12  ;;  %v8396_v58 = vld [vmem:[%s9103_s2 + $0x4] ss:$0 sm:$0xff]  ;;  %v10369_v12 = vmov 0 }
 0x490   : > { %vm2623_vm2 = vmor %vm2575_vm11, %vm2583_vm3  ;;  %vm2684_vm3 = vcmp.eq.s32.totalorder %v10210_v56, %v3687_v62  ;;  %vm2716_vm11 = vcmp.eq.s32.totalorder %v10218_v18, %v3687_v62 }
 0x491   : > { %vm2631_vm13 = vmor %vm2591_vm6, %vm2599_vm15  ;;  %vm2700_vm15 = vcmp.eq.s32.totalorder %v10215_v10, %v3687_v62  ;;  %vm2732_vm6 = vcmp.eq.s32.totalorder %v7206_v44, %v3687_v62 }
 0x492   : > { %vm2639_vm7 = vmor %vm8035_vm1, %vm2615_vm14 }
 0x493   : > { %vm2647_vm10 = vmor %vm2623_vm2, %vm2631_vm13 }
 0x494   : > { %vm8055_vm9 = vmor %vm2639_vm7, %vm2647_vm10  ;;  %vm2833_vm10 = vcmp.eq.s32.totalorder %v10209_v17, %v3741_v11 }
 0x495   : > { %v10264_v57 = vsel %vm8055_vm9, 4294967295, %v10263_v57  ;;  %vm2748_vm1 = vmor %vm2684_vm3, %vm2692_vm12  ;;  %vm2849_vm12 = vcmp.eq.s32.totalorder %v10211_v31, %v3741_v11 }
 0x496   : > { %vm2756_vm14 = vmor %vm2700_vm15, %vm2708_vm8  ;;  %vm10265_vm8 = vnez %v10264_v57  ;;  %vm2841_vm15 = vcmp.eq.s32.totalorder %v10215_v10, %v3741_v11  ;;  %v2967_v57 = vpop.xlane.xlu1 %2966 }
 0x497   : > { %vm2764_vm2 = vmor %vm2716_vm11, %vm2724_vm5  ;;  %v2668_v22 = vsel %vm10265_vm8, %v7237_v34, 0.0  ;;  %vm2865_vm5 = vcmp.eq.s32.totalorder %v10212_v5, %v3741_v11  ;;  %vm2857_vm11 = vcmp.eq.s32.totalorder %v10218_v18, %v3741_v11  ;;  %v10289_v5 = vmov 0 }
 0x498   : > { %vm2772_vm13 = vmor %vm2732_vm6, %vm2740_vm0  ;;  %v2676_v53 = vadd.f32 %v2668_v22, %v2535_v27  ;;  %vm2881_vm0 = vcmp.eq.s32.totalorder %v7814_v49, %v3741_v11  ;;  %v10300_v18 = vmov 0  ;;  %v8427_v49 = vld [vmem:[%s9103_s2 + $0x5] ss:$0 sm:$0xff]  ;;  %v10378_v22 = vmov 0 }
 0x499   : > { %vm2780_vm7 = vmor %vm2748_vm1, %vm2756_vm14 }
 0x49a   : > { %vm2788_vm9 = vmor %vm2764_vm2, %vm2772_vm13 }
 0x49b   : > { %vm2796_vm3 = vmor %vm2780_vm7, %vm2788_vm9  ;;  %vm2873_vm9 = vcmp.eq.s32.totalorder %v7206_v44, %v3741_v11  ;;  %v10267_v44 = vld [vmem:[#allocation12_spill] sm:$0xff] }
 0x49c   : > { %vm2889_vm1 = vmor %vm2825_vm4, %vm2833_vm10  ;;  %v2809_v34 = vsel %vm2796_vm3, %v7269_v32, 0.0  ;;  %vm1703_vm10 = vcmp.eq.s32.totalorder %v10266_v33, %v3458_v3  ;;  %vm1671_vm3 = vcmp.eq.s32.totalorder %v10267_v44, %v3458_v3  ;;  %v10268_v32 = vld [vmem:[#allocation7_spill] sm:$0xff] }
 0x49d   : > { %vm2897_vm14 = vmor %vm2841_vm15, %vm2849_vm12  ;;  %v2817_v40 = vadd.f32 %v2809_v34, %v2676_v53  ;;  %vm1895_vm12 = vcmp.eq.s32.totalorder %v8094_v48, %v3458_v3  ;;  %vm1735_vm4 = vcmp.eq.s32.totalorder %v10268_v32, %v3458_v3  ;;  %vm1831_vm15 = vcmp.eq.s32.totalorder %v10270_v45, %v3458_v3  ;;  %v10333_v53 = vld [vmem:[#allocation4_spill] sm:$0xff] }
 0x49e   : > { %vm2905_vm6 = vmor %vm2857_vm11, %vm2865_vm5  ;;  %vm1767_vm5 = vcmp.eq.s32.totalorder %v10269_v55, %v3458_v3  ;;  %v2981_v34 = vadd.f32 %v2967_v57, %v10333_v53 }
 0x49f   : > { %vm2913_vm2 = vmor %vm2873_vm9, %vm2881_vm0  ;;  %vm1799_vm9 = vcmp.eq.s32.totalorder %v10276_v30, %v3458_v3 }
 0x4a0   : > { %vm2921_vm13 = vmor %vm2889_vm1, %vm2897_vm14  ;;  %vm1988_vm14 = vcmp.eq.s32.totalorder %v10266_v33, %v3465_v6 }
 0x4a1   : > { %vm2929_vm7 = vmor %vm2905_vm6, %vm2913_vm2  ;;  %vm1996_vm2 = vcmp.eq.s32.totalorder %v10268_v32, %v3465_v6 }
 0x4a2   : > { %vm2937_vm8 = vmor %vm2921_vm13, %vm2929_vm7  ;;  %vm2004_vm13 = vcmp.eq.s32.totalorder %v10269_v55, %v3465_v6 }
 0x4a3   : > { %v2950_v52 = vsel %vm2937_vm8, %v7301_v26, 0.0  ;;  %v10271_v26 = vld [vmem:[#allocation35_spill] sm:$0xff]  ;;  %vm8111_vm1 = vmor %vm1671_vm3, %vm1703_vm10  ;;  %vm1980_vm8 = vcmp.eq.s32.totalorder %v10267_v44, %v3465_v6  ;;  %vm2036_vm10 = vcmp.eq.s32.totalorder %v8094_v48, %v3465_v6  ;;  %vm2020_vm3 = vcmp.eq.s32.totalorder %v10270_v45, %v3465_v6 }
 0x4a4   : > { %v2958_v4 = vadd.f32 %v2950_v52, %v2817_v40  ;;  %vm1863_vm0 = vcmp.eq.s32.totalorder %v10271_v26, %v3458_v3  ;;  %vm8123_vm6 = vmor %vm1735_vm4, %vm1767_vm5  ;;  %v3005_v52 = vld [vmem:[%s6257_s8 + $0x48] sm:$0xff] }
 0x4a5   : > { %vm8115_vm11 = vmor %vm1863_vm0, %vm1895_vm12 }
 0x4a6   : > { %2968 = vadd.xlane.f32.xlu0 %v2958_v4  ;;  %v10275_v51 = vsel %vm8115_vm11, 4294967295, %v10274_v51  ;;  %vm8131_vm7 = vmor %vm1799_vm9, %vm1831_vm15  ;;  %vm2028_vm15 = vcmp.eq.s32.totalorder %v10271_v26, %v3465_v6  ;;  %vm2012_vm9 = vcmp.eq.s32.totalorder %v10276_v30, %v3465_v6  ;;  %v10334_v4 = vmov 0  }
 0x4a7   : > { %vm8149_vm5 = vmor %vm1980_vm8, %vm1988_vm14  ;;  %vm2129_vm14 = vcmp.eq.s32.totalorder %v10266_v33, %v3500_v14  ;;  %vm2145_vm8 = vcmp.eq.s32.totalorder %v10269_v55, %v3500_v14 }
 0x4a8   : > { %vm8155_vm0 = vmor %vm1996_vm2, %vm2004_vm13  ;;  %vm2137_vm13 = vcmp.eq.s32.totalorder %v10268_v32, %v3500_v14 }
 0x4a9   : > { %vm8161_vm12 = vmor %vm2028_vm15, %vm2036_vm10  ;;  %vm2177_vm15 = vcmp.eq.s32.totalorder %v8094_v48, %v3500_v14 }
 0x4aa   : > { %vm8165_vm11 = vmor %vm2012_vm9, %vm2020_vm3  ;;  %vm2121_vm3 = vcmp.eq.s32.totalorder %v10267_v44, %v3500_v14  ;;  %vm2169_vm9 = vcmp.eq.s32.totalorder %v10271_v26, %v3500_v14 }
 0x4ab   : > { %vm2076_vm2 = vmor %vm8149_vm5, %vm8155_vm0  ;;  %vm2161_vm5 = vcmp.eq.s32.totalorder %v10270_v45, %v3500_v14 }
 0x4ac   : > { %vm2084_vm10 = vmor %vm8165_vm11, %vm8161_vm12  ;;  %vm2153_vm11 = vcmp.eq.s32.totalorder %v10276_v30, %v3500_v14 }
 0x4ad   : > { %vm8189_vm0 = vmor %vm2121_vm3, %vm2129_vm14  ;;  %vm10295_vm14 = vnez %v10275_v51  ;;  %v2973_v51 = vpop.xlane.xlu1 %2972 }
 0x4ae   : > { %v10290_v5 = vsel %vm8189_vm0, 4294967295, %v10289_v5  ;;  %vm8195_vm4 = vmor %vm2137_vm13, %vm2145_vm8  ;;  %v2984_v36 = vadd.f32 %v2973_v51, %v10333_v53 }
 0x4af   : > { %vm8201_vm12 = vmor %vm2169_vm9, %vm2177_vm15  ;;  %vm10304_vm9 = vnez %v10290_v5  ;;  %v3008_v5 = vld [vmem:[%s6257_s8 + $0x60] sm:$0xff] }
 0x4b0   : > { %vm10296_vm3 = vmor %vm8131_vm7, %vm10295_vm14  ;;  %vm2270_vm7 = vcmp.eq.s32.totalorder %v10266_v33, %v3547_v9 }
 0x4b1   : > { %vm10297_vm13 = vmor %vm8111_vm1, %vm8123_vm6  ;;  %vm2278_vm6 = vcmp.eq.s32.totalorder %v10268_v32, %v3547_v9 }
 0x4b2   : > { %vm8215_vm8 = vmor %vm10297_vm13, %vm10296_vm3  ;;  %vm2310_vm3 = vcmp.eq.s32.totalorder %v10271_v26, %v3547_v9 }
 0x4b3   : > { %v10299_v1 = vsel %vm8215_vm8, 4294967295, %v10298_v1  ;;  %vm8219_vm0 = vmor %vm2076_vm2, %vm2084_vm10  ;;  %vm2286_vm2 = vcmp.eq.s32.totalorder %v10269_v55, %v3547_v9  ;;  %vm2419_vm8 = vcmp.eq.s32.totalorder %v10268_v32, %v3584_v15 }
 0x4b4   : > { %v10301_v18 = vsel %vm8219_vm0, 4294967295, %v10300_v18  ;;  %vm8223_vm15 = vmor %vm2153_vm11, %vm2161_vm5  ;;  %vm2262_vm5 = vcmp.eq.s32.totalorder %v10267_v44, %v3547_v9  ;;  %vm2318_vm11 = vcmp.eq.s32.totalorder %v8094_v48, %v3547_v9 }
 0x4b5   : > { %vm2217_vm1 = vmor %vm10304_vm9, %vm8195_vm4  ;;  %vm2302_vm4 = vcmp.eq.s32.totalorder %v10270_v45, %v3547_v9 }
 0x4b6   : > { %vm2225_vm10 = vmor %vm8223_vm15, %vm8201_vm12  ;;  %vm2294_vm12 = vcmp.eq.s32.totalorder %v10276_v30, %v3547_v9 }
 0x4b7   : > { %vm8247_vm14 = vmor %vm2262_vm5, %vm2270_vm7  ;;  %vm2411_vm7 = vcmp.eq.s32.totalorder %v10266_v33, %v3584_v15 }
 0x4b8   : > { %vm8253_vm13 = vmor %vm2278_vm6, %vm2286_vm2  ;;  %vm2427_vm6 = vcmp.eq.s32.totalorder %v10269_v55, %v3584_v15 }
 0x4b9   : > { %vm2350_vm15 = vmor %vm2310_vm3, %vm2318_vm11 }
 0x4ba   : > { %vm8259_vm9 = vmor %vm2217_vm1, %vm2225_vm10  ;;  %vm2403_vm1 = vcmp.eq.s32.totalorder %v10267_v44, %v3584_v15  ;;  %vm2443_vm10 = vcmp.eq.s32.totalorder %v10270_v45, %v3584_v15 }
 0x4bb   : > { %vm2342_vm0 = vmor %vm2294_vm12, %vm2302_vm4  ;;  %vm2451_vm12 = vcmp.eq.s32.totalorder %v10271_v26, %v3584_v15  ;;  %v2246_v60 = vsel %vm8259_vm9, %v8340_v19, 0.0 }
 0x4bc   : > { %vm2366_vm5 = vmor %vm2342_vm0, %vm2350_vm15  ;;  %vm2459_vm0 = vcmp.eq.s32.totalorder %v8094_v48, %v3584_v15 }
 0x4bd   : > { %vm2358_vm2 = vmor %vm8247_vm14, %vm8253_vm13  ;;  %vm2435_vm14 = vcmp.eq.s32.totalorder %v10276_v30, %v3584_v15  ;;  %vm10317_vm13 = vnez %v10299_v1  ;;  %v3010_v1 = vld [vmem:[%s6257_s8 + $0x70] sm:$0xff] }
 0x4be   : > { %vm8279_vm11 = vmor %vm2403_vm1, %vm2411_vm7  ;;  %v1964_v41 = vsel %vm10317_vm13, %v8296_v63, 0.0  ;;  %vm2560_vm1 = vcmp.eq.s32.totalorder %v10268_v32, %v3635_v13  ;;  %vm2568_vm13 = vcmp.eq.s32.totalorder %v10269_v55, %v3635_v13 }
 0x4bf   : > { %vm8283_vm4 = vmor %vm2358_vm2, %vm2366_vm5 }
 0x4c0   : > { %vm8289_vm3 = vmor %vm2419_vm8, %vm2427_vm6  ;;  %vm10318_vm8 = vnez %v10301_v18  ;;  %vm2552_vm6 = vcmp.eq.s32.totalorder %v10266_v33, %v3635_v13  ;;  %v2387_v7 = vsel %vm8283_vm4, %v8364_v0, 0.0  ;;  %vm2741_vm4 = vcmp.eq.s32.totalorder %v8094_v48, %v3687_v62 }
 0x4c1   : > { %v2105_v50 = vsel %vm10318_vm8, %v8304_v59, 0.0  ;;  %vm2483_vm15 = vmor %vm2435_vm14, %vm2443_vm10  ;;  %vm2600_vm14 = vcmp.eq.s32.totalorder %v8094_v48, %v3635_v13  ;;  %vm2576_vm8 = vcmp.eq.s32.totalorder %v10276_v30, %v3635_v13 }
 0x4c2   : > { %vm2491_vm7 = vmor %vm2451_vm12, %vm2459_vm0  ;;  %v2113_v37 = vadd.f32 %v2105_v50, %v1964_v41  ;;  %vm2544_vm0 = vcmp.eq.s32.totalorder %v10267_v44, %v3635_v13  ;;  %v10349_v41 = vld [vmem:[#allocation34_spill] sm:$0xff]  ;;  %v10350_v50 = vld [vmem:[#allocation37_spill] sm:$0xff] }
 0x4c3   : > { %vm2499_vm5 = vmor %vm8279_vm11, %vm8289_vm3  ;;  %vm2584_vm11 = vcmp.eq.s32.totalorder %v10270_v45, %v3635_v13 }
 0x4c4   : > { %vm2507_vm2 = vmor %vm2483_vm15, %vm2491_vm7  ;;  %v2254_v2 = vadd.f32 %v2246_v60, %v2113_v37  ;;  %vm2592_vm15 = vcmp.eq.s32.totalorder %v10271_v26, %v3635_v13  ;;  %v10356_v60 = vld [vmem:[#allocation28_spill] sm:$0xff] }
 0x4c5   : > { %vm8323_vm10 = vmor %vm2499_vm5, %vm2507_vm2 }
 0x4c6   : > { %vm8333_vm3 = vmor %vm2544_vm0, %vm2552_vm6  ;;  %vm2693_vm6 = vcmp.eq.s32.totalorder %v10266_v33, %v3687_v62  ;;  %v2395_v25 = vadd.f32 %v2387_v7, %v2254_v2  ;;  %v2528_v27 = vsel %vm8323_vm10, %v8396_v58, 0.0  ;;  %vm2834_vm10 = vcmp.eq.s32.totalorder %v10266_v33, %v3741_v11  ;;  %v3004_v33 = vld [vmem:[%s6257_s8 + $0x40] sm:$0xff] }
 0x4c7   : > { %vm8347_vm12 = vmor %vm2560_vm1, %vm2568_vm13  ;;  %vm2701_vm1 = vcmp.eq.s32.totalorder %v10268_v32, %v3687_v62  ;;  %vm2709_vm13 = vcmp.eq.s32.totalorder %v10269_v55, %v3687_v62  ;;  %v10414_v7 = vld [vmem:[#allocation23_spill] sm:$0xff] }
 0x4c8   : > { %vm2624_vm7 = vmor %vm2576_vm8, %vm2584_vm11  ;;  %vm2685_vm11 = vcmp.eq.s32.totalorder %v10267_v44, %v3687_v62  ;;  %vm2717_vm8 = vcmp.eq.s32.totalorder %v10276_v30, %v3687_v62  ;;  %v2536_v40 = vadd.f32 %v2528_v27, %v2395_v25  ;;  %v10415_v25 = vmov 0 }
 0x4c9   : > { %vm2632_vm5 = vmor %vm2592_vm15, %vm2600_vm14  ;;  %vm2725_vm14 = vcmp.eq.s32.totalorder %v10270_v45, %v3687_v62  ;;  %vm2733_vm15 = vcmp.eq.s32.totalorder %v10271_v26, %v3687_v62 }
 0x4ca   : > { %vm2640_vm9 = vmor %vm8333_vm3, %vm8347_vm12 }
 0x4cb   : > { %vm2648_vm2 = vmor %vm2624_vm7, %vm2632_vm5 }
 0x4cc   : > { %vm8373_vm0 = vmor %vm2640_vm9, %vm2648_vm2 }
 0x4cd   : > { %vm8383_vm3 = vmor %vm2685_vm11, %vm2693_vm6  ;;  %vm2989_vm6 = vcmp.gt.f32.partialorder %v2981_v34, 0.0  ;;  %vm2850_vm11 = vcmp.eq.s32.totalorder %v10269_v55, %v3741_v11  ;;  %v2669_v39 = vsel %vm8373_vm0, %v8427_v49, 0.0  ;;  %vm2858_vm0 = vcmp.eq.s32.totalorder %v10276_v30, %v3741_v11 }
 0x4ce   : > { %vm8389_vm12 = vmor %vm2701_vm1, %vm2709_vm13  ;;  %vm2826_vm1 = vcmp.eq.s32.totalorder %v10267_v44, %v3741_v11  ;;  %vm2842_vm13 = vcmp.eq.s32.totalorder %v10268_v32, %v3741_v11  ;;  %v2997_v8 = vsel %vm2989_vm6, 1, %v10334_v4  ;;  %v2677_v17 = vadd.f32 %v2669_v39, %v2536_v40  ;;  %v8474_v32 = vld [vmem:[%s9103_s2 + $0x6] ss:$0 sm:$0xff] }
 0x4cf   : > { %vm8403_vm7 = vmor %vm2717_vm8, %vm2725_vm14  ;;  %vm2882_vm8 = vcmp.eq.s32.totalorder %v8094_v48, %v3741_v11  ;;  %v10380_v34 = vmov 0 }
 0x4d0   : > { %vm2773_vm5 = vmor %vm2733_vm15, %vm2741_vm4  ;;  %vm2866_vm4 = vcmp.eq.s32.totalorder %v10270_v45, %v3741_v11  ;;  %v2977_v45 = vpop.xlane.xlu1 %2976 }
 0x4d1   : > { %vm2781_vm9 = vmor %vm8383_vm3, %vm8389_vm12  ;;  %vm3013_vm3 = vcmp.eq.s32.totalorder %v2997_v8, %v3005_v52  ;;  %v10439_v52 = vmov 0 }
 0x4d2   : > { %vm2789_vm2 = vmor %vm8403_vm7, %vm2773_vm5  ;;  %v3021_v31 = vsel %vm3013_vm3, 1, %v10334_v4  ;;  %vm10341_vm7 = vcmask 7168   ;;  %vm2992_vm5 = vcmp.gt.f32.partialorder %v2984_v36, 0.0 }
 0x4d3   : > { %vm8432_vm14 = vmor %vm2781_vm9, %vm2789_vm2  ;;  %3029 = vst.msk [vmem:[%s6309_s11 + $0x48] sm:$0xff] %vm10341_vm7, %v3021_v31  ;;  %vm2874_vm9 = vcmp.eq.s32.totalorder %v10271_v26, %v3741_v11  ;;  %v3000_v55 = vsel %vm2992_vm5, 1, %v10334_v4  ;;  %v2986_v26 = vadd.f32 %v2977_v45, %v10333_v53  ;;  %vm1833_vm5 = vcmp.eq.s32.totalorder %v10349_v41, %v3458_v3 }
 0x4d4   : > { %vm8444_vm12 = vmor %vm2826_vm1, %vm2834_vm10  ;;  %v2810_v30 = vsel %vm8432_vm14, %v8474_v32, 0.0  ;;  %vm3016_vm2 = vcmp.eq.s32.totalorder %v3000_v55, %v3008_v5 }
 0x4d5   : > { %vm8458_vm15 = vmor %vm2842_vm13, %vm2850_vm11  ;;  %v2818_v35 = vadd.f32 %v2810_v30, %v2677_v17  ;;  %v3024_v10 = vsel %vm3016_vm2, 1, %v10334_v4  ;;  %vm2994_vm14 = vcmp.gt.f32.partialorder %v2986_v26, 0.0 }
 0x4d6   : > { %vm8466_vm10 = vmor %vm2858_vm0, %vm2866_vm4  ;;  %v3002_v18 = vsel %vm2994_vm14, 1, %v10334_v4  ;;  %vm1897_vm0 = vcmp.eq.s32.totalorder %v8317_v38, %v3458_v3  ;;  %vm2006_vm14 = vcmp.eq.s32.totalorder %v10348_v54, %v3465_v6 }
 0x4d7   : > { %vm2914_vm6 = vmor %vm2874_vm9, %vm2882_vm8  ;;  %vm3018_vm3 = vcmp.eq.s32.totalorder %v3002_v18, %v3010_v1  ;;  %vm1705_vm8 = vcmp.eq.s32.totalorder %v10345_v28, %v3458_v3  ;;  %vm1865_vm9 = vcmp.eq.s32.totalorder %v10350_v50, %v3458_v3 }
 0x4d8   : > { %vm2922_vm1 = vmor %vm8444_vm12, %vm8458_vm15  ;;  %v3026_v24 = vsel %vm3018_vm3, 1, %v10334_v4  ;;  %vm1673_vm15 = vcmp.eq.s32.totalorder %v10347_v61, %v3458_v3  ;;  %vm1982_vm3 = vcmp.eq.s32.totalorder %v10347_v61, %v3465_v6 }
 0x4d9   : > { %vm2930_vm13 = vmor %vm8466_vm10, %vm2914_vm6  ;;  %vm1737_vm6 = vcmp.eq.s32.totalorder %v10353_v16, %v3458_v3 }
 0x4da   : > { %vm10344_vm11 = vmmov %vm10341_vm7 }
 0x4db   : > { %3032 = vst.msk [vmem:[%s6309_s11 + $0x60] sm:$0xff] %vm10344_vm11, %v3024_v10  ;;  %vm2938_vm4 = vmor %vm2922_vm1, %vm2930_vm13  ;;  %vm1990_vm1 = vcmp.eq.s32.totalorder %v10345_v28, %v3465_v6  ;;  %vm1801_vm13 = vcmp.eq.s32.totalorder %v10356_v60, %v3458_v3 }
 0x4dc   : > { %v2951_v47 = vsel %vm2938_vm4, %v8494_v20, 0.0  ;;  %vm10346_vm12 = vmmov %vm10341_vm7  ;;  %vm1769_vm7 = vcmp.eq.s32.totalorder %v10348_v54, %v3458_v3 }
 0x4dd   : > { %v2959_v42 = vadd.f32 %v2951_v47, %v2818_v35  ;;  %3034 = vst.msk [vmem:[%s6309_s11 + $0x70] sm:$0xff] %vm10346_vm12, %v3026_v24  ;;  %vm8512_vm10 = vmor %vm1673_vm15, %vm1705_vm8  ;;  %vm2038_vm8 = vcmp.eq.s32.totalorder %v8317_v38, %v3465_v6  ;;  %vm2022_vm15 = vcmp.eq.s32.totalorder %v10349_v41, %v3465_v6  ;;  %v10404_v47 = vmov 0 }
 0x4de   : > { %vm8518_vm2 = vmor %vm1865_vm9, %vm1897_vm0  ;;  %vm1998_vm0 = vcmp.eq.s32.totalorder %v10353_v16, %v3465_v6  ;;  %vm2030_vm9 = vcmp.eq.s32.totalorder %v10350_v50, %v3465_v6 }
 0x4df   : > { %2970 = vadd.xlane.f32.xlu0 %v2959_v42  ;;  %v10355_v46 = vsel %vm8518_vm2, 4294967295, %v10354_v46  ;;  %vm8526_vm11 = vmor %vm1737_vm6, %vm1769_vm7 }
 0x4e0   : > { %vm8532_vm4 = vmor %vm1801_vm13, %vm1833_vm5  ;;  %vm2014_vm13 = vcmp.eq.s32.totalorder %v10356_v60, %v3465_v6 }
 0x4e1   : > { %vm8552_vm5 = vmor %vm1982_vm3, %vm1990_vm1  ;;  %vm2131_vm1 = vcmp.eq.s32.totalorder %v10345_v28, %v3500_v14  ;;  %vm2147_vm3 = vcmp.eq.s32.totalorder %v10348_v54, %v3500_v14 }
 0x4e2   : > { %vm8558_vm6 = vmor %vm1998_vm0, %vm2006_vm14  ;;  %vm2123_vm0 = vcmp.eq.s32.totalorder %v10347_v61, %v3500_v14 }
 0x4e3   : > { %vm8564_vm12 = vmor %vm2030_vm9, %vm2038_vm8  ;;  %vm2139_vm9 = vcmp.eq.s32.totalorder %v10353_v16, %v3500_v14 }
 0x4e4   : > { %vm8568_vm2 = vmor %vm2014_vm13, %vm2022_vm15  ;;  %vm2179_vm15 = vcmp.eq.s32.totalorder %v8317_v38, %v3500_v14  ;;  %vm2171_vm13 = vcmp.eq.s32.totalorder %v10350_v50, %v3500_v14 }
 0x4e5   : > { %vm2078_vm14 = vmor %vm8552_vm5, %vm8558_vm6  ;;  %vm2163_vm5 = vcmp.eq.s32.totalorder %v10349_v41, %v3500_v14 }
 0x4e6   : > { %vm2086_vm8 = vmor %vm8568_vm2, %vm8564_vm12  ;;  %vm2155_vm12 = vcmp.eq.s32.totalorder %v10356_v60, %v3500_v14 }
 0x4e7   : > { %vm8592_vm6 = vmor %vm2123_vm0, %vm2131_vm1  ;;  %vm10375_vm1 = vnez %v10355_v46 }
 0x4e8   : > { %v10370_v12 = vsel %vm8592_vm6, 4294967295, %v10369_v12  ;;  %vm8598_vm2 = vmor %vm2139_vm9, %vm2147_vm3 }
 0x4e9   : > { %vm8604_vm7 = vmor %vm2171_vm13, %vm2179_vm15  ;;  %vm10384_vm13 = vnez %v10370_v12 }
 0x4ea   : > { %vm10376_vm0 = vmor %vm8532_vm4, %vm10375_vm1  ;;  %vm2272_vm4 = vcmp.eq.s32.totalorder %v10345_v28, %v3547_v9 }
 0x4eb   : > { %vm10377_vm3 = vmor %vm8512_vm10, %vm8526_vm11  ;;  %vm2288_vm11 = vcmp.eq.s32.totalorder %v10348_v54, %v3547_v9 }
 0x4ec   : > { %vm8618_vm9 = vmor %vm10377_vm3, %vm10376_vm0  ;;  %vm2312_vm0 = vcmp.eq.s32.totalorder %v10350_v50, %v3547_v9  ;;  %vm2296_vm3 = vcmp.eq.s32.totalorder %v10356_v60, %v3547_v9 }
 0x4ed   : > { %v10379_v22 = vsel %vm8618_vm9, 4294967295, %v10378_v22  ;;  %vm8622_vm6 = vmor %vm2078_vm14, %vm2086_vm8  ;;  %vm2264_vm8 = vcmp.eq.s32.totalorder %v10347_v61, %v3547_v9  ;;  %vm2429_vm9 = vcmp.eq.s32.totalorder %v10348_v54, %v3584_v15 }
 0x4ee   : > { %v10381_v34 = vsel %vm8622_vm6, 4294967295, %v10380_v34  ;;  %vm8626_vm15 = vmor %vm2155_vm12, %vm2163_vm5  ;;  %vm2320_vm5 = vcmp.eq.s32.totalorder %v8317_v38, %v3547_v9  ;;  %vm2280_vm12 = vcmp.eq.s32.totalorder %v10353_v16, %v3547_v9 }
 0x4ef   : > { %vm2219_vm10 = vmor %vm10384_vm13, %vm8598_vm2  ;;  %vm2304_vm2 = vcmp.eq.s32.totalorder %v10349_v41, %v3547_v9 }
 0x4f0   : > { %vm2227_vm14 = vmor %vm8626_vm15, %vm8604_vm7 }
 0x4f1   : > { %vm8650_vm1 = vmor %vm2264_vm8, %vm2272_vm4  ;;  %vm2413_vm4 = vcmp.eq.s32.totalorder %v10345_v28, %v3584_v15 }
 0x4f2   : > { %vm8656_vm7 = vmor %vm2280_vm12, %vm2288_vm11 }
 0x4f3   : > { %vm2352_vm15 = vmor %vm2312_vm0, %vm2320_vm5  ;;  %vm2405_vm5 = vcmp.eq.s32.totalorder %v10347_v61, %v3584_v15 }
 0x4f4   : > { %vm8662_vm13 = vmor %vm2219_vm10, %vm2227_vm14  ;;  %vm2445_vm10 = vcmp.eq.s32.totalorder %v10349_v41, %v3584_v15  ;;  %vm2421_vm14 = vcmp.eq.s32.totalorder %v10353_v16, %v3584_v15 }
 0x4f5   : > { %vm2344_vm6 = vmor %vm2296_vm3, %vm2304_vm2  ;;  %vm10396_vm3 = vnez %v10381_v34  ;;  %v2248_v45 = vsel %vm8662_vm13, %v8340_v19, 0.0 }
 0x4f6   : > { %vm2368_vm8 = vmor %vm2344_vm6, %vm2352_vm15  ;;  %vm2461_vm6 = vcmp.eq.s32.totalorder %v8317_v38, %v3584_v15  ;;  %v2107_v17 = vsel %vm10396_vm3, %v8304_v59, 0.0  ;;  %vm2453_vm15 = vcmp.eq.s32.totalorder %v10350_v50, %v3584_v15 }
 0x4f7   : > { %vm2360_vm11 = vmor %vm8650_vm1, %vm8656_vm7  ;;  %vm2437_vm1 = vcmp.eq.s32.totalorder %v10356_v60, %v3584_v15  ;;  %vm10395_vm7 = vnez %v10379_v22 }
 0x4f8   : > { %vm8682_vm12 = vmor %vm2405_vm5, %vm2413_vm4  ;;  %v1966_v36 = vsel %vm10395_vm7, %v8296_v63, 0.0 }
 0x4f9   : > { %vm8686_vm2 = vmor %vm2360_vm11, %vm2368_vm8  ;;  %v2115_v31 = vadd.f32 %v2107_v17, %v1966_v36 }
 0x4fa   : > { %vm2477_vm0 = vmor %vm2421_vm14, %vm2429_vm9  ;;  %vm2554_vm9 = vcmp.eq.s32.totalorder %v10345_v28, %v3635_v13  ;;  %vm2570_vm14 = vcmp.eq.s32.totalorder %v10348_v54, %v3635_v13  ;;  %v2389_v1 = vsel %vm8686_vm2, %v8364_v0, 0.0  ;;  %vm2743_vm2 = vcmp.eq.s32.totalorder %v8317_v38, %v3687_v62 }
 0x4fb   : > { %vm2485_vm4 = vmor %vm2437_vm1, %vm2445_vm10  ;;  %v2965_v56 = vpop.xlane.xlu0 %2964  ;;  %vm2546_vm10 = vcmp.eq.s32.totalorder %v10347_v61, %v3635_v13  ;;  %vm2602_vm1 = vcmp.eq.s32.totalorder %v8317_v38, %v3635_v13  ;;  %v2256_v35 = vadd.f32 %v2248_v45, %v2115_v31 }
 0x4fc   : > { %vm2493_vm8 = vmor %vm2453_vm15, %vm2461_vm6  ;;  %v2980_v5 = vadd.f32 %v2965_v56, %v10333_v53  ;;  %vm2586_vm6 = vcmp.eq.s32.totalorder %v10349_v41, %v3635_v13  ;;  %vm2578_vm15 = vcmp.eq.s32.totalorder %v10356_v60, %v3635_v13 }
 0x4fd   : > { %vm2501_vm11 = vmor %vm8682_vm12, %vm2477_vm0  ;;  %vm2562_vm12 = vcmp.eq.s32.totalorder %v10353_v16, %v3635_v13  ;;  %v2397_v18 = vadd.f32 %v2389_v1, %v2256_v35  ;;  %v10465_v35 = vmov 0 }
 0x4fe   : > { %vm2509_vm5 = vmor %vm2485_vm4, %vm2493_vm8  ;;  %vm2988_vm3 = vcmp.gt.f32.partialorder %v2980_v5, 0.0  ;;  %vm2594_vm8 = vcmp.eq.s32.totalorder %v10350_v50, %v3635_v13 }
 0x4ff   : > { %vm8707_vm7 = vmor %vm2501_vm11, %vm2509_vm5  ;;  %v2996_v26 = vsel %vm2988_vm3, 1, %v10334_v4  ;;  %vm2727_vm3 = vcmp.eq.s32.totalorder %v10349_v41, %v3687_v62 }
 0x500   : > { %vm8720_vm0 = vmor %vm2546_vm10, %vm2554_vm9  ;;  %vm3012_vm9 = vcmp.eq.s32.totalorder %v2996_v26, %v3004_v33  ;;  %vm10403_vm10 = vcmask 7168   ;;  %v2530_v42 = vsel %vm8707_vm7, %v8396_v58, 0.0  ;;  %vm2828_vm7 = vcmp.eq.s32.totalorder %v10347_v61, %v3741_v11 }
 0x501   : > { %vm8729_vm4 = vmor %vm2562_vm12, %vm2570_vm14  ;;  %v3020_v10 = vsel %vm3012_vm9, 1, %v10334_v4  ;;  %vm2695_vm14 = vcmp.eq.s32.totalorder %v10345_v28, %v3687_v62  ;;  %vm2735_vm9 = vcmp.eq.s32.totalorder %v10350_v50, %v3687_v62  ;;  %v2538_v24 = vadd.f32 %v2530_v42, %v2397_v18 }
 0x502   : > { %vm2626_vm11 = vmor %vm2578_vm15, %vm2586_vm6  ;;  %3028 = vst.msk [vmem:[%s6309_s11 + $0x40] sm:$0xff] %vm10403_vm10, %v3020_v10  ;;  %vm2711_vm6 = vcmp.eq.s32.totalorder %v10348_v54, %v3687_v62  ;;  %vm2703_vm15 = vcmp.eq.s32.totalorder %v10353_v16, %v3687_v62 }
 0x503   : > { %vm2634_vm5 = vmor %vm2594_vm8, %vm2602_vm1  ;;  %vm2719_vm8 = vcmp.eq.s32.totalorder %v10356_v60, %v3687_v62 }
 0x504   : > { %vm2642_vm13 = vmor %vm8720_vm0, %vm8729_vm4  ;;  %vm2687_vm0 = vcmp.eq.s32.totalorder %v10347_v61, %v3687_v62 }
 0x505   : > { %vm2650_vm12 = vmor %vm2626_vm11, %vm2634_vm5 }
 0x506   : > { %vm8750_vm1 = vmor %vm2642_vm13, %vm2650_vm12  ;;  %vm2836_vm12 = vcmp.eq.s32.totalorder %v10345_v28, %v3741_v11 }
 0x507   : > { %v10405_v47 = vsel %vm8750_vm1, 4294967295, %v10404_v47  ;;  %vm2751_vm4 = vmor %vm2687_vm0, %vm2695_vm14  ;;  %vm2852_vm14 = vcmp.eq.s32.totalorder %v10348_v54, %v3741_v11 }
 0x508   : > { %vm2759_vm11 = vmor %vm2703_vm15, %vm2711_vm6  ;;  %vm10406_vm6 = vnez %v10405_v47  ;;  %vm2844_vm15 = vcmp.eq.s32.totalorder %v10353_v16, %v3741_v11  ;;  %v10409_v16 = vld [vmem:[#allocation24_spill] sm:$0xff] }
 0x509   : > { %vm2767_vm5 = vmor %vm2719_vm8, %vm2727_vm3  ;;  %v2671_v37 = vsel %vm10406_vm6, %v8427_v49, 0.0  ;;  %vm2868_vm3 = vcmp.eq.s32.totalorder %v10349_v41, %v3741_v11  ;;  %vm2860_vm8 = vcmp.eq.s32.totalorder %v10356_v60, %v3741_v11  ;;  %v10410_v60 = vld [vmem:[#allocation36_spill] sm:$0xff] }
 0x50a   : > { %vm2775_vm13 = vmor %vm2735_vm9, %vm2743_vm2  ;;  %v2679_v46 = vadd.f32 %v2671_v37, %v2538_v24  ;;  %vm2884_vm2 = vcmp.eq.s32.totalorder %v8317_v38, %v3741_v11  ;;  %v10407_v38 = vld [vmem:[#allocation19_spill] sm:$0xff]  ;;  %v3007_v24 = vld [vmem:[%s6257_s8 + $0x58] sm:$0xff] }
 0x50b   : > { %vm2783_vm10 = vmor %vm2751_vm4, %vm2759_vm11 }
 0x50c   : > { %vm2791_vm1 = vmor %vm2767_vm5, %vm2775_vm13 }
 0x50d   : > { %vm2799_vm0 = vmor %vm2783_vm10, %vm2791_vm1  ;;  %vm2876_vm1 = vcmp.eq.s32.totalorder %v10350_v50, %v3741_v11  ;;  %v10408_v50 = vld [vmem:[#allocation21_spill] sm:$0xff] }
 0x50e   : > { %vm2892_vm4 = vmor %vm2828_vm7, %vm2836_vm12  ;;  %v2812_v28 = vsel %vm2799_vm0, %v8474_v32, 0.0  ;;  %vm1707_vm12 = vcmp.eq.s32.totalorder %v10407_v38, %v3458_v3  ;;  %vm1675_vm7 = vcmp.eq.s32.totalorder %v10408_v50, %v3458_v3  ;;  %vm1771_vm0 = vcmp.eq.s32.totalorder %v10409_v16, %v3458_v3 }
 0x50f   : > { %vm2900_vm11 = vmor %vm2844_vm15, %vm2852_vm14  ;;  %v2820_v61 = vadd.f32 %v2812_v28, %v2679_v46  ;;  %vm1899_vm14 = vcmp.eq.s32.totalorder %v8353_v43, %v3458_v3  ;;  %vm1867_vm15 = vcmp.eq.s32.totalorder %v10411_v23, %v3458_v3  ;;  %v3009_v46 = vld [vmem:[%s6257_s8 + $0x68] sm:$0xff] }
 0x510   : > { %vm2908_vm9 = vmor %vm2860_vm8, %vm2868_vm3  ;;  %vm1835_vm3 = vcmp.eq.s32.totalorder %v10410_v60, %v3458_v3 }
 0x511   : > { %vm2916_vm5 = vmor %vm2876_vm1, %vm2884_vm2  ;;  %vm1803_vm1 = vcmp.eq.s32.totalorder %v10417_v21, %v3458_v3 }
 0x512   : > { %vm2924_vm13 = vmor %vm2892_vm4, %vm2900_vm11  ;;  %vm1739_vm4 = vcmp.eq.s32.totalorder %v10414_v7, %v3458_v3  ;;  %vm1992_vm11 = vcmp.eq.s32.totalorder %v10407_v38, %v3465_v6 }
 0x513   : > { %vm2932_vm10 = vmor %vm2908_vm9, %vm2916_vm5  ;;  %vm2008_vm5 = vcmp.eq.s32.totalorder %v10409_v16, %v3465_v6 }
 0x514   : > { %vm2940_vm6 = vmor %vm2924_vm13, %vm2932_vm10  ;;  %vm1984_vm10 = vcmp.eq.s32.totalorder %v10408_v50, %v3465_v6 }
 0x515   : > { %v2953_v54 = vsel %vm2940_vm6, %v8494_v20, 0.0  ;;  %vm8802_vm2 = vmor %vm1675_vm7, %vm1707_vm12  ;;  %vm2040_vm6 = vcmp.eq.s32.totalorder %v8353_v43, %v3465_v6  ;;  %vm2024_vm7 = vcmp.eq.s32.totalorder %v10410_v60, %v3465_v6 }
 0x516   : > { %v2961_v41 = vadd.f32 %v2953_v54, %v2820_v61  ;;  %vm8808_vm8 = vmor %vm1867_vm15, %vm1899_vm14  ;;  %vm2000_vm14 = vcmp.eq.s32.totalorder %v10414_v7, %v3465_v6  ;;  %vm2032_vm15 = vcmp.eq.s32.totalorder %v10411_v23, %v3465_v6 }
 0x517   : > { %v10416_v25 = vsel %vm8808_vm8, 4294967295, %v10415_v25  ;;  %vm8816_vm9 = vmor %vm1739_vm4, %vm1771_vm0 }
 0x518   : > { %2974 = vadd.xlane.f32.xlu0 %v2961_v41  ;;  %vm8822_vm13 = vmor %vm1803_vm1, %vm1835_vm3  ;;  %vm2016_vm1 = vcmp.eq.s32.totalorder %v10417_v21, %v3465_v6  ;;  %v10430_v6 = vmov 0 }
 0x519   : > { %vm8842_vm3 = vmor %vm1984_vm10, %vm1992_vm11  ;;  %vm2133_vm11 = vcmp.eq.s32.totalorder %v10407_v38, %v3500_v14  ;;  %vm2149_vm10 = vcmp.eq.s32.totalorder %v10409_v16, %v3500_v14 }
 0x51a   : > { %vm8848_vm4 = vmor %vm2000_vm14, %vm2008_vm5  ;;  %vm2125_vm14 = vcmp.eq.s32.totalorder %v10408_v50, %v3500_v14 }
 0x51b   : > { %vm8854_vm12 = vmor %vm2032_vm15, %vm2040_vm6  ;;  %vm2141_vm15 = vcmp.eq.s32.totalorder %v10414_v7, %v3500_v14 }
 0x51c   : > { %vm8858_vm8 = vmor %vm2016_vm1, %vm2024_vm7  ;;  %vm2181_vm7 = vcmp.eq.s32.totalorder %v8353_v43, %v3500_v14  ;;  %vm2173_vm1 = vcmp.eq.s32.totalorder %v10411_v23, %v3500_v14 }
 0x51d   : > { %vm2080_vm5 = vmor %vm8842_vm3, %vm8848_vm4  ;;  %vm2165_vm3 = vcmp.eq.s32.totalorder %v10410_v60, %v3500_v14 }
 0x51e   : > { %vm2088_vm6 = vmor %vm8858_vm8, %vm8854_vm12  ;;  %vm2157_vm12 = vcmp.eq.s32.totalorder %v10417_v21, %v3500_v14  ;;  %v10441_v14 = vmov 0 }
 0x51f   : > { %vm8882_vm4 = vmor %vm2125_vm14, %vm2133_vm11  ;;  %vm10436_vm11 = vnez %v10416_v25 }
 0x520   : > { %v10431_v6 = vsel %vm8882_vm4, 4294967295, %v10430_v6  ;;  %vm8888_vm8 = vmor %vm2141_vm15, %vm2149_vm10 }
 0x521   : > { %vm8894_vm0 = vmor %vm2173_vm1, %vm2181_vm7  ;;  %vm10445_vm1 = vnez %v10431_v6 }
 0x522   : > { %vm10437_vm14 = vmor %vm8822_vm13, %vm10436_vm11  ;;  %vm2274_vm13 = vcmp.eq.s32.totalorder %v10407_v38, %v3547_v9 }
 0x523   : > { %vm10438_vm10 = vmor %vm8802_vm2, %vm8816_vm9  ;;  %vm2290_vm9 = vcmp.eq.s32.totalorder %v10409_v16, %v3547_v9 }
 0x524   : > { %vm8908_vm15 = vmor %vm10438_vm10, %vm10437_vm14  ;;  %vm2314_vm14 = vcmp.eq.s32.totalorder %v10411_v23, %v3547_v9  ;;  %vm2298_vm10 = vcmp.eq.s32.totalorder %v10417_v21, %v3547_v9 }
 0x525   : > { %v10440_v52 = vsel %vm8908_vm15, 4294967295, %v10439_v52  ;;  %vm8912_vm4 = vmor %vm2080_vm5, %vm2088_vm6  ;;  %vm2266_vm6 = vcmp.eq.s32.totalorder %v10408_v50, %v3547_v9  ;;  %vm2431_vm15 = vcmp.eq.s32.totalorder %v10409_v16, %v3584_v15 }
 0x526   : > { %v10442_v14 = vsel %vm8912_vm4, 4294967295, %v10441_v14  ;;  %vm8916_vm7 = vmor %vm2157_vm12, %vm2165_vm3  ;;  %vm2322_vm3 = vcmp.eq.s32.totalorder %v8353_v43, %v3547_v9  ;;  %vm2282_vm12 = vcmp.eq.s32.totalorder %v10414_v7, %v3547_v9 }
 0x527   : > { %vm2221_vm2 = vmor %vm10445_vm1, %vm8888_vm8  ;;  %vm2306_vm8 = vcmp.eq.s32.totalorder %v10410_v60, %v3547_v9 }
 0x528   : > { %vm2229_vm5 = vmor %vm8916_vm7, %vm8894_vm0 }
 0x529   : > { %vm8940_vm11 = vmor %vm2266_vm6, %vm2274_vm13  ;;  %vm2415_vm13 = vcmp.eq.s32.totalorder %v10407_v38, %v3584_v15 }
 0x52a   : > { %vm8946_vm0 = vmor %vm2282_vm12, %vm2290_vm9 }
 0x52b   : > { %vm2354_vm7 = vmor %vm2314_vm14, %vm2322_vm3  ;;  %vm2407_vm3 = vcmp.eq.s32.totalorder %v10408_v50, %v3584_v15 }
 0x52c   : > { %vm8952_vm1 = vmor %vm2221_vm2, %vm2229_vm5  ;;  %vm2447_vm2 = vcmp.eq.s32.totalorder %v10410_v60, %v3584_v15  ;;  %vm2423_vm5 = vcmp.eq.s32.totalorder %v10414_v7, %v3584_v15 }
 0x52d   : > { %vm2346_vm4 = vmor %vm2298_vm10, %vm2306_vm8  ;;  %vm10457_vm10 = vnez %v10442_v14  ;;  %v2250_v33 = vsel %vm8952_vm1, %v8340_v19, 0.0 }
 0x52e   : > { %vm2370_vm6 = vmor %vm2346_vm4, %vm2354_vm7  ;;  %vm2463_vm4 = vcmp.eq.s32.totalorder %v8353_v43, %v3584_v15  ;;  %v2109_v56 = vsel %vm10457_vm10, %v8304_v59, 0.0  ;;  %vm2455_vm7 = vcmp.eq.s32.totalorder %v10411_v23, %v3584_v15 }
 0x52f   : > { %vm2362_vm9 = vmor %vm8940_vm11, %vm8946_vm0  ;;  %vm2439_vm11 = vcmp.eq.s32.totalorder %v10417_v21, %v3584_v15  ;;  %vm10456_vm0 = vnez %v10440_v52  ;;  %v3006_v15 = vld [vmem:[%s6257_s8 + $0x50] sm:$0xff] }
 0x530   : > { %vm8972_vm12 = vmor %vm2407_vm3, %vm2415_vm13  ;;  %v1968_v17 = vsel %vm10456_vm0, %v8296_v63, 0.0 }
 0x531   : > { %vm8976_vm8 = vmor %vm2362_vm9, %vm2370_vm6  ;;  %v2117_v5 = vadd.f32 %v2109_v56, %v1968_v17 }
 0x532   : > { %vm2479_vm14 = vmor %vm2423_vm5, %vm2431_vm15  ;;  %vm2556_vm15 = vcmp.eq.s32.totalorder %v10407_v38, %v3635_v13  ;;  %vm2572_vm5 = vcmp.eq.s32.totalorder %v10409_v16, %v3635_v13  ;;  %v2391_v19 = vsel %vm8976_vm8, %v8364_v0, 0.0  ;;  %vm2745_vm8 = vcmp.eq.s32.totalorder %v8353_v43, %v3687_v62 }
 0x533   : > { %vm2487_vm13 = vmor %vm2439_vm11, %vm2447_vm2  ;;  %v2969_v31 = vpop.xlane.xlu0 %2968  ;;  %vm2548_vm2 = vcmp.eq.s32.totalorder %v10408_v50, %v3635_v13  ;;  %vm2604_vm11 = vcmp.eq.s32.totalorder %v8353_v43, %v3635_v13  ;;  %v2258_v30 = vadd.f32 %v2250_v33, %v2117_v5 }
 0x534   : > { %vm2495_vm6 = vmor %vm2455_vm7, %vm2463_vm4  ;;  %v2982_v63 = vadd.f32 %v2969_v31, %v10333_v53  ;;  %vm2588_vm4 = vcmp.eq.s32.totalorder %v10410_v60, %v3635_v13  ;;  %vm2580_vm7 = vcmp.eq.s32.totalorder %v10417_v21, %v3635_v13 }
 0x535   : > { %vm2503_vm9 = vmor %vm8972_vm12, %vm2479_vm14  ;;  %vm2564_vm12 = vcmp.eq.s32.totalorder %v10414_v7, %v3635_v13 }
 0x536   : > { %vm2511_vm3 = vmor %vm2487_vm13, %vm2495_vm6  ;;  %vm2990_vm10 = vcmp.gt.f32.partialorder %v2982_v63, 0.0  ;;  %vm2596_vm6 = vcmp.eq.s32.totalorder %v10411_v23, %v3635_v13  ;;  %v2399_v13 = vadd.f32 %v2391_v19, %v2258_v30 }
 0x537   : > { %vm8997_vm0 = vmor %vm2503_vm9, %vm2511_vm3  ;;  %v2998_v45 = vsel %vm2990_vm10, 1, %v10334_v4  ;;  %vm2729_vm10 = vcmp.eq.s32.totalorder %v10410_v60, %v3687_v62 }
 0x538   : > { %vm9010_vm14 = vmor %vm2548_vm2, %vm2556_vm15  ;;  %vm3014_vm15 = vcmp.eq.s32.totalorder %v2998_v45, %v3006_v15  ;;  %vm10464_vm2 = vcmask 7168   ;;  %v2532_v0 = vsel %vm8997_vm0, %v8396_v58, 0.0  ;;  %vm2830_vm0 = vcmp.eq.s32.totalorder %v10408_v50, %v3741_v11 }
 0x539   : > { %vm9019_vm13 = vmor %vm2564_vm12, %vm2572_vm5  ;;  %v3022_v26 = vsel %vm3014_vm15, 1, %v10334_v4  ;;  %vm2697_vm5 = vcmp.eq.s32.totalorder %v10407_v38, %v3687_v62  ;;  %vm2737_vm15 = vcmp.eq.s32.totalorder %v10411_v23, %v3687_v62  ;;  %v2540_v10 = vadd.f32 %v2532_v0, %v2399_v13 }
 0x53a   : > { %vm2628_vm9 = vmor %vm2580_vm7, %vm2588_vm4  ;;  %3030 = vst.msk [vmem:[%s6309_s11 + $0x50] sm:$0xff] %vm10464_vm2, %v3022_v26  ;;  %vm2713_vm4 = vcmp.eq.s32.totalorder %v10409_v16, %v3687_v62  ;;  %vm2705_vm7 = vcmp.eq.s32.totalorder %v10414_v7, %v3687_v62 }
 0x53b   : > { %vm2636_vm3 = vmor %vm2596_vm6, %vm2604_vm11  ;;  %vm2721_vm6 = vcmp.eq.s32.totalorder %v10417_v21, %v3687_v62 }
 0x53c   : > { %vm2644_vm1 = vmor %vm9010_vm14, %vm9019_vm13  ;;  %vm2689_vm14 = vcmp.eq.s32.totalorder %v10408_v50, %v3687_v62 }
 0x53d   : > { %vm2652_vm12 = vmor %vm2628_vm9, %vm2636_vm3 }
 0x53e   : > { %vm9040_vm11 = vmor %vm2644_vm1, %vm2652_vm12  ;;  %vm2838_vm12 = vcmp.eq.s32.totalorder %v10407_v38, %v3741_v11  ;;  %v3011_v38 = vld [vmem:[%s6257_s8 + $0x78] sm:$0xff] }
 0x53f   : > { %v10466_v35 = vsel %vm9040_vm11, 4294967295, %v10465_v35  ;;  %vm2753_vm13 = vmor %vm2689_vm14, %vm2697_vm5  ;;  %vm2854_vm5 = vcmp.eq.s32.totalorder %v10409_v16, %v3741_v11 }
 0x540   : > { %vm2761_vm9 = vmor %vm2705_vm7, %vm2713_vm4  ;;  %vm10467_vm4 = vnez %v10466_v35  ;;  %vm2846_vm7 = vcmp.eq.s32.totalorder %v10414_v7, %v3741_v11 }
 0x541   : > { %vm2769_vm3 = vmor %vm2721_vm6, %vm2729_vm10  ;;  %v2673_v1 = vsel %vm10467_vm4, %v8427_v49, 0.0  ;;  %vm2870_vm10 = vcmp.eq.s32.totalorder %v10410_v60, %v3741_v11  ;;  %vm2862_vm6 = vcmp.eq.s32.totalorder %v10417_v21, %v3741_v11 }
 0x542   : > { %vm2777_vm1 = vmor %vm2737_vm15, %vm2745_vm8  ;;  %v2681_v62 = vadd.f32 %v2673_v1, %v2540_v10  ;;  %vm2886_vm8 = vcmp.eq.s32.totalorder %v8353_v43, %v3741_v11 }
 0x543   : > { %vm2785_vm2 = vmor %vm2753_vm13, %vm2761_vm9 }
 0x544   : > { %vm2793_vm11 = vmor %vm2769_vm3, %vm2777_vm1 }
 0x545   : > { %vm2801_vm14 = vmor %vm2785_vm2, %vm2793_vm11  ;;  %vm2878_vm11 = vcmp.eq.s32.totalorder %v10411_v23, %v3741_v11 }
 0x546   : > { %vm2894_vm13 = vmor %vm2830_vm0, %vm2838_vm12  ;;  %v2814_v58 = vsel %vm2801_vm14, %v8474_v32, 0.0  ;;  %vm10468_vm14 = vcmask 7168  }
 0x547   : > { %vm2902_vm9 = vmor %vm2846_vm7, %vm2854_vm5  ;;  %v2822_v49 = vadd.f32 %v2814_v58, %v2681_v62 }
 0x548   : > { %vm2910_vm15 = vmor %vm2862_vm6, %vm2870_vm10 }
 0x549   : > { %vm2918_vm3 = vmor %vm2878_vm11, %vm2886_vm8 }
 0x54a   : > { %vm2926_vm1 = vmor %vm2894_vm13, %vm2902_vm9 }
 0x54b   : > { %vm2934_vm2 = vmor %vm2910_vm15, %vm2918_vm3 }
 0x54c   : > { %vm2942_vm4 = vmor %vm2926_vm1, %vm2934_vm2 }
 0x54d   : > { %v2955_v43 = vsel %vm2942_vm4, %v8494_v20, 0.0  ;;  %vm10469_vm7 = vmmov %vm10468_vm14 }
 0x54e   : > { %v2963_v18 = vadd.f32 %v2955_v43, %v2822_v49  ;;  %vm10470_vm6 = vmmov %vm10469_vm7 }
 0x550   : > { %2978 = vadd.xlane.f32.xlu0 %v2963_v18 }
 0x56c   : > { %v2971_v47 = vpop.xlane.xlu0 %2970 }
 0x56d   : > { %v2983_v42 = vadd.f32 %v2971_v47, %v10333_v53 }
 0x56f   : > { %vm2991_vm12 = vcmp.gt.f32.partialorder %v2983_v42, 0.0 }
 0x570   : > { %v2999_v11 = vsel %vm2991_vm12, 1, %v10334_v4 }
 0x571   : > { %vm3015_vm5 = vcmp.eq.s32.totalorder %v2999_v11, %v3007_v24 }
 0x572   : > { %v3023_v32 = vsel %vm3015_vm5, 1, %v10334_v4 }
 0x573   : > { %3031 = vst.msk [vmem:[%s6309_s11 + $0x58] sm:$0xff] %vm10468_vm14, %v3023_v32 }
 0x5a5   : > { %v2975_v37 = vpop.xlane.xlu0 %2974 }
 0x5a6   : > { %v2985_v20 = vadd.f32 %v2975_v37, %v10333_v53 }
 0x5a8   : > { %vm2993_vm0 = vcmp.gt.f32.partialorder %v2985_v20, 0.0 }
 0x5a9   : > { %v3001_v28 = vsel %vm2993_vm0, 1, %v10334_v4 }
 0x5aa   : > { %vm3017_vm10 = vcmp.eq.s32.totalorder %v3001_v28, %v3009_v46 }
 0x5ab   : > { %v3025_v61 = vsel %vm3017_vm10, 1, %v10334_v4 }
 0x5ac   : > { %3033 = vst.msk [vmem:[%s6309_s11 + $0x68] sm:$0xff] %vm10469_vm7, %v3025_v61 }
 0x5dd   : > { %v2979_v54 = vpop.xlane.xlu0 %2978 }
 0x5de   : > { %v2987_v41 = vadd.f32 %v2979_v54, %v10333_v53 }
 0x5e0   : > { %vm2995_vm8 = vcmp.gt.f32.partialorder %v2987_v41, 0.0 }
 0x5e1   : > { %v3003_v50 = vsel %vm2995_vm8, 1, %v10334_v4 }
 0x5e2   : > { %vm3019_vm13 = vcmp.eq.s32.totalorder %v3003_v50, %v3011_v38 }
 0x5e3   : > { %v3027_v16 = vsel %vm3019_vm13, 1, %v10334_v4 }
 0x5e4   : > { %3035 = vst.msk [vmem:[%s6309_s11 + $0x78] sm:$0xff] %vm10470_vm6, %v3027_v16 }
 0x5e5 PF: > { %s15_s17 = sadd.s32 1, %s3203_s17  }
 0x5e6   : > { %p12_p4 = scmp.ge.s32.totalorder %s15_s17, 4  }
 0x5e8   :  { %14 = sbr.rel (!%p12_p4) target bundleno = 2 (0x2), region = 69 }

</bundles_post_ra>
